<compile_context>
chip_gen: v5e
topology: v5e:2x2
jax: 0.10.0
libtpu: 0.0.40
codegen_flags: <defaults>
</compile_context>

<pallas_src>
import functools
import math

import jax
import jax.numpy as jnp
from jax.experimental import pallas as pl
from jax.experimental.pallas import tpu as pltpu

_LANE = 128


def _round_up(n, m):
    return (n + m - 1) // m * m


def _pick_tile(n, cap):
    """Largest divisor of n that is <= cap (always >= 1; never falls back to an
    over-budget full extent)."""
    cap = max(1, min(n, int(cap)))
    best = 1
    for t in range(1, cap + 1):
        if n % t == 0:
            best = t
    return best


@functools.lru_cache(maxsize=None)
def _vmem_budget_bytes():
    """Generation-aware VMEM budget: ~3/4 of physical VMEM per core.
    128 MiB parts (v5e/v6e) -> 96 MiB, 64 MiB parts (v7x) -> 48 MiB.
    Conservative 48 MiB fallback if the query is unavailable."""
    phys = 64 * 1024 * 1024
    try:
        info = pltpu.get_tpu_info()
        for attr in ("vmem_capacity_bytes", "vmem_size_bytes", "vmem_bytes"):
            v = getattr(info, attr, None)
            if v:
                phys = int(v)
                break
    except Exception:
        pass
    return (phys * 3) // 4


# ---------------------------------------------------------------------------
# Fused Conv3x3 (padding=1) kernel.
#
# Optional input fusions, executed once per batch element (at h == 0) into a
# VMEM scratch that persists across the row-tile axis:
#   * pool_input:   2x2 max-pool of the raw input (the MaxPool2d(2) stage)
#   * input_affine: per-channel scale/shift + ReLU (the previous conv's BN)
# The scratch holds the zero-bordered padded activation, so no jnp.pad or
# standalone BN/ReLU pass ever round-trips HBM for the conv input.
#
# Outputs: conv result (bf16, pre-BN) and per-tile [sum | sum_sq] partial BN
# statistics as one lane-dense (1,1,1,2*Cpad) f32 row (computed from the f32
# accumulator, i.e. before the bf16 rounding of y).
# ---------------------------------------------------------------------------
def _conv3x3_kernel(x_ref, w_ref, sc_ref, sh_ref, y_ref, st_ref, xpad_ref, *,
                    TH, Hout, Wout, Cin, Cpad, pool_input, input_affine):
    h = pl.program_id(1)

    @pl.when(h == 0)
    def _build_padded_input():
        xin = x_ref[0]
        if pool_input:
            # Wrapper reshape put the horizontal pixel pair on the lane axis:
            # last dim = [even-col channels | odd-col channels].
            m = jnp.maximum(xin[..., :Cin], xin[..., Cin:])      # (2*Hout, Wout, Cin)
            m = m.reshape(Hout, 2, Wout, Cin)                    # split row pairs
            xin = jnp.maximum(m[:, 0], m[:, 1])                  # (Hout, Wout, Cin)
        if input_affine:
            xf = (xin.astype(jnp.float32) * sc_ref[...].reshape(1, 1, Cin)
                  + sh_ref[...].reshape(1, 1, Cin))
            xin = jnp.maximum(xf, 0.0)
        # Zero border + interior write: the padded activation lives only in VMEM.
        xpad_ref[...] = jnp.zeros((Hout + 2, Wout + 2, Cin), jnp.bfloat16)
        xpad_ref[1:Hout + 1, 1:Wout + 1, :] = xin.astype(jnp.bfloat16)

    row0 = pl.multiple_of(h * TH, TH)
    # In-VMEM im2col: 9 shifted taps concatenated on the channel (lane) axis
    # -> one MXU matmul with K = 9*Cin (no per-tap accumulator RMW passes).
    taps = [xpad_ref[pl.ds(row0 + r, TH), c:c + Wout, :]
            for r in range(3) for c in range(3)]
    patch = jnp.concatenate(taps, axis=-1).reshape(TH * Wout, 9 * Cin)
    acc = jnp.dot(patch, w_ref[...], preferred_element_type=jnp.float32)

    y_ref[...] = acc.reshape(1, TH, Wout, Cpad).astype(y_ref.dtype)
    s = jnp.sum(acc, axis=0, keepdims=True)
    ss = jnp.sum(acc * acc, axis=0, keepdims=True)
    st_ref[...] = jnp.concatenate([s, ss], axis=-1).reshape(1, 1, 1, 2 * Cpad)


def conv3x3_fused(x, w_k9, scale_in, shift_in, *, pool_input, input_affine,
                  out_dtype=jnp.bfloat16):
    B = x.shape[0]
    Cin = w_k9.shape[0] // 9
    Cpad = w_k9.shape[-1]
    if pool_input:
        assert x.shape[3] == 2 * Cin and x.shape[1] % 2 == 0
        Hout, Wout = x.shape[1] // 2, x.shape[2]
    else:
        assert x.shape[3] == Cin
        Hout, Wout = x.shape[1], x.shape[2]

    budget = _vmem_budget_bytes()
    # Byte-aware tile pick: fixed residents (double-buffered image + weights +
    # padded scratch) plus TH-dependent tiles (bf16 y block x2, f32 acc,
    # bf16 taps + im2col patch).
    x_block_bytes = math.prod(x.shape[1:]) * 2
    fixed = (2 * x_block_bytes + 2 * w_k9.size * 2
             + (Hout + 2) * (Wout + 2) * Cin * 2 + (1 << 16))
    row_bytes = Wout * (2 * 2 * Cpad + 4 * Cpad + 4 * 9 * Cin)
    soft_rows = max(1, (4096 if budget >= 80 * 1024 * 1024 else 2048) // max(Wout, 1))
    avail_rows = (budget - fixed) // row_bytes if budget > fixed else 1
    TH = _pick_tile(Hout, max(1, min(avail_rows, soft_rows)))
    nh = Hout // TH
    # TODO(synk): halo-tiled row blocks (manual DMA, memory_space=pl.ANY) so the
    #             full image need not stay VMEM-resident / double-buffered for
    #             very large H*W on v7x (64 MiB per TensorCore).

    kernel = functools.partial(
        _conv3x3_kernel, TH=TH, Hout=Hout, Wout=Wout, Cin=Cin, Cpad=Cpad,
        pool_input=pool_input, input_affine=input_affine)
    y, stats = pl.pallas_call(
        kernel,
        grid=(B, nh),
        in_specs=[
            # Un-padded image, resident per batch element (index only depends
            # on b, so it is re-DMA'd only when b changes).
            pl.BlockSpec((1,) + tuple(x.shape[1:]), lambda b, h: (b, 0, 0, 0)),
            pl.BlockSpec(tuple(w_k9.shape), lambda b, h: (0, 0)),       # resident taps
            pl.BlockSpec(tuple(scale_in.shape), lambda b, h: (0, 0)),
            pl.BlockSpec(tuple(shift_in.shape), lambda b, h: (0, 0)),
        ],
        out_specs=[
            pl.BlockSpec((1, TH, Wout, Cpad), lambda b, h: (b, h, 0, 0)),
            pl.BlockSpec((1, 1, 1, 2 * Cpad), lambda b, h: (b, h, 0, 0)),
        ],
        out_shape=[
            jax.ShapeDtypeStruct((B, Hout, Wout, Cpad), out_dtype),
            jax.ShapeDtypeStruct((B, nh, 1, 2 * Cpad), jnp.float32),
        ],
        scratch_shapes=[pltpu.VMEM((Hout + 2, Wout + 2, Cin), jnp.bfloat16)],
        compiler_params=pltpu.CompilerParams(
            # b "parallel": v7x megacore shards whole batch elements (each core
            # owns its image).  h must stay "arbitrary"/sequential: the padded
            # input scratch is built at h == 0 and reused by later row tiles.
            dimension_semantics=("parallel", "arbitrary"),
            vmem_limit_bytes=budget),
    )(x, w_k9, scale_in, shift_in)
    return y, stats


# ---------------------------------------------------------------------------
# Final BN (batch statistics) + ReLU.  Only needed after the last conv; the
# lane-padding channel slice is fused into the store.
# ---------------------------------------------------------------------------
def _bn_relu_kernel(y_ref, sc_ref, sh_ref, o_ref, *, Cout):
    y = y_ref[...][..., :Cout].astype(jnp.float32)
    y = y * sc_ref[...].reshape(1, 1, 1, Cout) + sh_ref[...].reshape(1, 1, 1, Cout)
    o_ref[...] = jnp.maximum(y, 0.0).astype(o_ref.dtype)


def bn_relu_nhwc(y, scale, shift, out_channels, out_dtype):
    B, H, W, Cpad = y.shape
    budget = _vmem_budget_bytes()
    row_bytes = W * (2 * 2 * Cpad + 2 * 4 * out_channels + 4 * Cpad)
    soft_rows = max(1, (8192 if budget >= 80 * 1024 * 1024 else 4096) // max(W, 1))
    avail_rows = max(1, (budget - (1 << 20)) // row_bytes)
    TH = _pick_tile(H, min(avail_rows, soft_rows))
    return pl.pallas_call(
        functools.partial(_bn_relu_kernel, Cout=out_channels),
        grid=(B, H // TH),
        in_specs=[pl.BlockSpec((1, TH, W, Cpad), lambda b, h: (b, h, 0, 0)),
                  pl.BlockSpec((1, out_channels), lambda b, h: (0, 0)),
                  pl.BlockSpec((1, out_channels), lambda b, h: (0, 0))],
        out_specs=pl.BlockSpec((1, TH, W, out_channels), lambda b, h: (b, h, 0, 0)),
        out_shape=jax.ShapeDtypeStruct((B, H, W, out_channels), out_dtype),
        compiler_params=pltpu.CompilerParams(
            dimension_semantics=("parallel", "parallel"),
            vmem_limit_bytes=budget),
    )(y, scale.reshape(1, -1).astype(jnp.float32),
      shift.reshape(1, -1).astype(jnp.float32))


def _bn_scale_shift(stats, gamma, beta, n, eps=1e-5):
    """Training-mode BatchNorm2d: biased variance over N*H*W -> scale/shift."""
    # TODO(synk): E[x^2]-E[x]^2 in f32 can cancel when |mean| >> std; a
    #             two-pass / centered-sum scheme would be numerically safer.
    Cpad = stats.shape[-1] // 2
    s = jnp.sum(stats[..., :Cpad], axis=(0, 1, 2))
    ss = jnp.sum(stats[..., Cpad:], axis=(0, 1, 2))
    mean = s / n
    var = jnp.maximum(ss / n - mean * mean, 0.0)
    scale = gamma * jax.lax.rsqrt(var + eps)
    shift = beta - mean * scale
    return scale, shift


# ---------------------------------------------------------------------------
# Parameters: PyTorch-shaped init + one-time conversion to kernel layout.
# ---------------------------------------------------------------------------
def init_down_params(key, in_channels, out_channels):
    k1, k2, k3, k4 = jax.random.split(key, 4)
    fan1, fan2 = in_channels * 9, out_channels * 9
    return {
        "w1": jax.random.normal(k1, (out_channels, in_channels, 3, 3),
                                jnp.float32) / jnp.sqrt(fan1),
        "b1": jax.random.normal(k2, (out_channels,), jnp.float32) * 0.01,
        "g1": jnp.ones((out_channels,), jnp.float32),
        "beta1": jnp.zeros((out_channels,), jnp.float32),
        "w2": jax.random.normal(k3, (out_channels, out_channels, 3, 3),
                                jnp.float32) / jnp.sqrt(fan2),
        "b2": jax.random.normal(k4, (out_channels,), jnp.float32) * 0.01,
        "g2": jnp.ones((out_channels,), jnp.float32),
        "beta2": jnp.zeros((out_channels,), jnp.float32),
    }


def _weight_to_taps(w_oihw, cin_pad, cout_pad):
    """(Cout, Cin, 3, 3) OIHW -> (9*cin_pad, cout_pad) bf16 tap matrix whose row
    order matches the kernel's (r, c, ci) im2col concatenation."""
    cout, cin = w_oihw.shape[:2]
    wt = jnp.transpose(w_oihw, (2, 3, 1, 0))                  # (3, 3, Cin, Cout)
    wt = jnp.pad(wt, ((0, 0), (0, 0), (0, cin_pad - cin), (0, cout_pad - cout)))
    return wt.reshape(9 * cin_pad, cout_pad).astype(jnp.bfloat16)


def prepare_down_params(params, in_channels, out_channels):
    """One-time conversion (hoisted off the per-forward path).

    Hard assumption: BatchNorm runs in training mode (batch statistics), so the
    conv biases b1/b2 are exactly cancelled by the mean subtraction and are
    dropped.  Padded output channels get gamma = beta = 0 so they stay exactly
    zero through BN + ReLU and the next conv.
    """
    cpad = _round_up(out_channels, _LANE)
    pad = (0, cpad - out_channels)
    return {
        "w1_k9": _weight_to_taps(params["w1"], in_channels, cpad),
        "w2_k9": _weight_to_taps(params["w2"], cpad, cpad),
        "g1": jnp.pad(params["g1"].astype(jnp.float32), pad),
        "beta1": jnp.pad(params["beta1"].astype(jnp.float32), pad),
        "g2": jnp.pad(params["g2"].astype(jnp.float32), pad),
        "beta2": jnp.pad(params["beta2"].astype(jnp.float32), pad),
    }


# ---------------------------------------------------------------------------
# Forward.
# ---------------------------------------------------------------------------
def down_forward_nhwc(x_nhwc, prepared, out_channels, out_dtype=None):
    """Down in NHWC: MaxPool2d(2) -> (Conv3x3 -> BN(batch stats) -> ReLU) x 2.
    Keeps activations NHWC end-to-end; chain Down blocks through this entry
    point to avoid per-block NCHW<->NHWC relayout passes."""
    B, H, W, Cin = x_nhwc.shape
    assert H % 2 == 0 and W % 2 == 0, "MaxPool2d(2) requires even H and W"
    out_dtype = out_dtype or x_nhwc.dtype
    Hp, Wp = H // 2, W // 2
    Cpad = prepared["w1_k9"].shape[-1]
    n = B * Hp * Wp

    # Free contiguous reshape: horizontal pixel pair moves to the lane axis so
    # the in-kernel 2x2 max needs no strided HBM access.
    xr = x_nhwc.astype(jnp.bfloat16).reshape(B, H, Wp, 2 * Cin)

    # Conv1: MaxPool fused into the kernel's input stage (no pooled
    # intermediate in HBM, no jnp.pad pass).  Identity scale/shift (unused).
    one = jnp.ones((1, Cin), jnp.float32)
    zero = jnp.zeros((1, Cin), jnp.float32)
    y1, st1 = conv3x3_fused(xr, prepared["w1_k9"], one, zero,
                            pool_input=True, input_affine=False)
    scale1, shift1 = _bn_scale_shift(st1, prepared["g1"], prepared["beta1"], n)

    # Conv2: conv1's BN + ReLU fused into the kernel's input stage (no
    # standalone bn_relu pass over the (B,H,W,Cpad) intermediate).
    y2, st2 = conv3x3_fused(y1, prepared["w2_k9"],
                            scale1.reshape(1, Cpad), shift1.reshape(1, Cpad),
                            pool_input=False, input_affine=True)
    scale2, shift2 = _bn_scale_shift(st2, prepared["g2"], prepared["beta2"], n)

    # Final BN + ReLU; the lane-padding channel slice is fused into the store.
    return bn_relu_nhwc(y2, scale2[:out_channels], shift2[:out_channels],
                        out_channels, out_dtype)


def down_forward(x_nchw, prepared, out_channels):
    """NCHW boundary matching the PyTorch module.  The two transposes are XLA
    relayouts at the module boundary only; chained Down blocks should call
    down_forward_nhwc directly."""
    x = jnp.transpose(x_nchw, (0, 2, 3, 1))                    # NCHW -> NHWC
    out = down_forward_nhwc(x, prepared, out_channels, out_dtype=x_nchw.dtype)
    return jnp.transpose(out, (0, 3, 1, 2))                    # NHWC -> NCHW


if __name__ == "__main__":
    key = jax.random.PRNGKey(0)
    kx, kp = jax.random.split(key)
    B, Cin, H, W = 2, 4, 16, 16
    Cout = 8
    x = jax.random.normal(kx, (B, Cin, H, W), jnp.float32)
    params = init_down_params(kp, Cin, Cout)
    prepared = prepare_down_params(params, Cin, Cout)

    fwd = jax.jit(down_forward, static_argnames=("out_channels",))
    out = jax.block_until_ready(fwd(x, prepared, out_channels=Cout))

    assert out.shape == (B, Cout, H // 2, W // 2), out.shape
    assert bool(jnp.all(jnp.isfinite(out)))
    assert bool(jnp.all(out >= 0.0))          # ReLU output must be non-negative
    print("KERNEL_OK")
</pallas_src>

<mosaic_0001>
module attributes {stable_mosaic.version = 11 : i64} {
  func.func @_conv3x3_kernel(%arg0: i32, %arg1: i32, %arg2: memref<1x16x8x8xbf16, #tpu.memory_space<vmem>>, %arg3: memref<36x128xbf16, #tpu.memory_space<vmem>>, %arg4: memref<1x4xf32, #tpu.memory_space<vmem>>, %arg5: memref<1x4xf32, #tpu.memory_space<vmem>>, %arg6: memref<1x8x8x128xbf16, #tpu.memory_space<vmem>>, %arg7: memref<1x1x1x256xf32, #tpu.memory_space<vmem>>, %arg8: memref<10x10x4xbf16, #tpu.memory_space<vmem>>) attributes {dimension_semantics = [#tpu.dimension_semantics<parallel>, #tpu.dimension_semantics<arbitrary>], iteration_bounds = array<i64: 2, 1>, scalar_prefetch = 0 : i64, scratch_operands = 1 : i64, tpu.core_type = #tpu.core_type<tc>, window_params = [{transform_indices = @transform_0, window_bounds = array<i64: 1, 16, 8, 8>}, {pipeline_mode = #tpu.pipeline_mode<synchronous>, transform_indices = @transform_1, window_bounds = array<i64: 36, 128>}, {pipeline_mode = #tpu.pipeline_mode<synchronous>, transform_indices = @transform_2, window_bounds = array<i64: 1, 4>}, {pipeline_mode = #tpu.pipeline_mode<synchronous>, transform_indices = @transform_3, window_bounds = array<i64: 1, 4>}, {transform_indices = @transform_4, window_bounds = array<i64: 1, 8, 8, 128>}, {transform_indices = @transform_5, window_bounds = array<i64: 1, 1, 1, 256>}]} {
    %c0_i32 = arith.constant 0 : i32
    %0 = arith.cmpi eq, %arg1, %c0_i32 : i32
    %1 = arith.extui %0 : i1 to i32
    %c0_i32_0 = arith.constant 0 : i32
    %2 = arith.cmpi ne, %1, %c0_i32_0 : i32
    scf.if %2 {
      %c0_35 = arith.constant 0 : index
      %c0_36 = arith.constant 0 : index
      %c0_37 = arith.constant 0 : index
      %c0_38 = arith.constant 0 : index
      %47 = vector.load %arg2[%c0_35, %c0_36, %c0_37, %c0_38] : memref<1x16x8x8xbf16, #tpu.memory_space<vmem>>, vector<1x16x8x8xbf16>
      %48 = vector.shape_cast %47 : vector<1x16x8x8xbf16> to vector<16x8x8xbf16>
      %49 = vector.extract_strided_slice %48 {offsets = [0, 0, 0], sizes = [16, 8, 4], strides = [1, 1, 1]} : vector<16x8x8xbf16> to vector<16x8x4xbf16>
      %50 = vector.extract_strided_slice %48 {offsets = [0, 0, 4], sizes = [16, 8, 4], strides = [1, 1, 1]} : vector<16x8x8xbf16> to vector<16x8x4xbf16>
      %51 = arith.maximumf %49, %50 : vector<16x8x4xbf16>
      %52 = vector.shape_cast %51 : vector<16x8x4xbf16> to vector<8x2x8x4xbf16>
      %53 = vector.extract_strided_slice %52 {offsets = [0, 0, 0, 0], sizes = [8, 1, 8, 4], strides = [1, 1, 1, 1]} : vector<8x2x8x4xbf16> to vector<8x1x8x4xbf16>
      %54 = vector.shape_cast %53 : vector<8x1x8x4xbf16> to vector<8x8x4xbf16>
      %55 = vector.extract_strided_slice %52 {offsets = [0, 1, 0, 0], sizes = [8, 1, 8, 4], strides = [1, 1, 1, 1]} : vector<8x2x8x4xbf16> to vector<8x1x8x4xbf16>
      %56 = vector.shape_cast %55 : vector<8x1x8x4xbf16> to vector<8x8x4xbf16>
      %57 = arith.maximumf %54, %56 : vector<8x8x4xbf16>
      %cst_39 = arith.constant 0.000000e+00 : bf16
      %58 = vector.broadcast %cst_39 : bf16 to vector<10x10x4xbf16>
      %c0_40 = arith.constant 0 : index
      %c0_41 = arith.constant 0 : index
      %c0_42 = arith.constant 0 : index
      %59 = vector.load %arg8[%c0_40, %c0_41, %c0_42] : memref<10x10x4xbf16, #tpu.memory_space<vmem>>, vector<10x10x4xbf16>
      tpu.vector_store %arg8[%c0_40, %c0_41, %c0_42], %58 {strides = array<i32>} : memref<10x10x4xbf16, #tpu.memory_space<vmem>>, vector<10x10x4xbf16>,
      %c1_43 = arith.constant 1 : index
      %c1_44 = arith.constant 1 : index
      %c0_45 = arith.constant 0 : index
      %60 = vector.load %arg8[%c1_43, %c1_44, %c0_45] : memref<10x10x4xbf16, #tpu.memory_space<vmem>>, vector<8x8x4xbf16>
      tpu.vector_store %arg8[%c1_43, %c1_44, %c0_45], %57 {strides = array<i32>} : memref<10x10x4xbf16, #tpu.memory_space<vmem>>, vector<8x8x4xbf16>,
    } else {
    }
    %c8_i32 = arith.constant 8 : i32
    %3 = arith.muli %arg1, %c8_i32 : i32
    %4 = tpu.assume_multiple %3, 8 : i32
    %c0_i32_1 = arith.constant 0 : i32
    %5 = arith.addi %4, %c0_i32_1 : i32
    %6 = arith.index_cast %5 : i32 to index
    %c0 = arith.constant 0 : index
    %c0_2 = arith.constant 0 : index
    %7 = vector.load %arg8[%6, %c0, %c0_2] : memref<10x10x4xbf16, #tpu.memory_space<vmem>>, vector<8x8x4xbf16>
    %c0_i32_3 = arith.constant 0 : i32
    %8 = arith.addi %4, %c0_i32_3 : i32
    %9 = arith.index_cast %8 : i32 to index
    %c1 = arith.constant 1 : index
    %c0_4 = arith.constant 0 : index
    %10 = vector.load %arg8[%9, %c1, %c0_4] : memref<10x10x4xbf16, #tpu.memory_space<vmem>>, vector<8x8x4xbf16>
    %c0_i32_5 = arith.constant 0 : i32
    %11 = arith.addi %4, %c0_i32_5 : i32
    %12 = arith.index_cast %11 : i32 to index
    %c2 = arith.constant 2 : index
    %c0_6 = arith.constant 0 : index
    %13 = vector.load %arg8[%12, %c2, %c0_6] : memref<10x10x4xbf16, #tpu.memory_space<vmem>>, vector<8x8x4xbf16>
    %c1_i32 = arith.constant 1 : i32
    %14 = arith.addi %4, %c1_i32 : i32
    %15 = arith.index_cast %14 : i32 to index
    %c0_7 = arith.constant 0 : index
    %c0_8 = arith.constant 0 : index
    %16 = vector.load %arg8[%15, %c0_7, %c0_8] : memref<10x10x4xbf16, #tpu.memory_space<vmem>>, vector<8x8x4xbf16>
    %c1_i32_9 = arith.constant 1 : i32
    %17 = arith.addi %4, %c1_i32_9 : i32
    %18 = arith.index_cast %17 : i32 to index
    %c1_10 = arith.constant 1 : index
    %c0_11 = arith.constant 0 : index
    %19 = vector.load %arg8[%18, %c1_10, %c0_11] : memref<10x10x4xbf16, #tpu.memory_space<vmem>>, vector<8x8x4xbf16>
    %c1_i32_12 = arith.constant 1 : i32
    %20 = arith.addi %4, %c1_i32_12 : i32
    %21 = arith.index_cast %20 : i32 to index
    %c2_13 = arith.constant 2 : index
    %c0_14 = arith.constant 0 : index
    %22 = vector.load %arg8[%21, %c2_13, %c0_14] : memref<10x10x4xbf16, #tpu.memory_space<vmem>>, vector<8x8x4xbf16>
    %c2_i32 = arith.constant 2 : i32
    %23 = arith.addi %4, %c2_i32 : i32
    %24 = arith.index_cast %23 : i32 to index
    %c0_15 = arith.constant 0 : index
    %c0_16 = arith.constant 0 : index
    %25 = vector.load %arg8[%24, %c0_15, %c0_16] : memref<10x10x4xbf16, #tpu.memory_space<vmem>>, vector<8x8x4xbf16>
    %c2_i32_17 = arith.constant 2 : i32
    %26 = arith.addi %4, %c2_i32_17 : i32
    %27 = arith.index_cast %26 : i32 to index
    %c1_18 = arith.constant 1 : index
    %c0_19 = arith.constant 0 : index
    %28 = vector.load %arg8[%27, %c1_18, %c0_19] : memref<10x10x4xbf16, #tpu.memory_space<vmem>>, vector<8x8x4xbf16>
    %c2_i32_20 = arith.constant 2 : i32
    %29 = arith.addi %4, %c2_i32_20 : i32
    %30 = arith.index_cast %29 : i32 to index
    %c2_21 = arith.constant 2 : index
    %c0_22 = arith.constant 0 : index
    %31 = vector.load %arg8[%30, %c2_21, %c0_22] : memref<10x10x4xbf16, #tpu.memory_space<vmem>>, vector<8x8x4xbf16>
    %32 = tpu.concatenate %7, %10, %13, %16, %19, %22, %25, %28, %31 in 2 : vector<8x8x4xbf16>, vector<8x8x4xbf16>, vector<8x8x4xbf16>, vector<8x8x4xbf16>, vector<8x8x4xbf16>, vector<8x8x4xbf16>, vector<8x8x4xbf16>, vector<8x8x4xbf16>, vector<8x8x4xbf16> -> vector<8x8x36xbf16>
    %33 = vector.shape_cast %32 : vector<8x8x36xbf16> to vector<64x36xbf16>
    %c0_23 = arith.constant 0 : index
    %c0_24 = arith.constant 0 : index
    %34 = vector.load %arg3[%c0_23, %c0_24] : memref<36x128xbf16, #tpu.memory_space<vmem>>, vector<36x128xbf16>
    %cst = arith.constant dense<0.000000e+00> : vector<64x128xf32>
    %35 = tpu.matmul %33, %34, %cst {dimension_numbers = #tpu.dot_dimension_numbers<[1], [0], [0], [1], [0, 0, 1, 1], [], []>} : vector<64x36xbf16>, vector<36x128xbf16>, vector<64x128xf32> -> vector<64x128xf32>
    %36 = vector.shape_cast %35 : vector<64x128xf32> to vector<1x8x8x128xf32>
    %37 = arith.truncf %36 : vector<1x8x8x128xf32> to vector<1x8x8x128xbf16>
    %c0_25 = arith.constant 0 : index
    %c0_26 = arith.constant 0 : index
    %c0_27 = arith.constant 0 : index
    %c0_28 = arith.constant 0 : index
    %38 = vector.load %arg6[%c0_25, %c0_26, %c0_27, %c0_28] : memref<1x8x8x128xbf16, #tpu.memory_space<vmem>>, vector<1x8x8x128xbf16>
    tpu.vector_store %arg6[%c0_25, %c0_26, %c0_27, %c0_28], %37 {strides = array<i32>} : memref<1x8x8x128xbf16, #tpu.memory_space<vmem>>, vector<1x8x8x128xbf16>,
    %cst_29 = arith.constant dense<0.000000e+00> : vector<128xf32>
    %39 = vector.multi_reduction <add>, %35, %cst_29 [0] : vector<64x128xf32> to vector<128xf32>
    %40 = vector.shape_cast %39 : vector<128xf32> to vector<1x128xf32>
    %41 = arith.mulf %35, %35 : vector<64x128xf32>
    %cst_30 = arith.constant dense<0.000000e+00> : vector<128xf32>
    %42 = vector.multi_reduction <add>, %41, %cst_30 [0] : vector<64x128xf32> to vector<128xf32>
    %43 = vector.shape_cast %42 : vector<128xf32> to vector<1x128xf32>
    %44 = tpu.concatenate %40, %43 in 1 : vector<1x128xf32>, vector<1x128xf32> -> vector<1x256xf32>
    %45 = vector.shape_cast %44 : vector<1x256xf32> to vector<1x1x1x256xf32>
    %c0_31 = arith.constant 0 : index
    %c0_32 = arith.constant 0 : index
    %c0_33 = arith.constant 0 : index
    %c0_34 = arith.constant 0 : index
    %46 = vector.load %arg7[%c0_31, %c0_32, %c0_33, %c0_34] : memref<1x1x1x256xf32, #tpu.memory_space<vmem>>, vector<1x1x1x256xf32>
    tpu.vector_store %arg7[%c0_31, %c0_32, %c0_33, %c0_34], %45 {strides = array<i32>} : memref<1x1x1x256xf32, #tpu.memory_space<vmem>>, vector<1x1x1x256xf32>,
    return
  }
  func.func @transform_0(%arg0: i32, %arg1: i32) -> (i32, i32, i32, i32) {
    %c0_i32 = arith.constant 0 : i32
    %c0_i32_0 = arith.constant 0 : i32
    %c0_i32_1 = arith.constant 0 : i32
    %c0_i32_2 = arith.constant 0 : i32
    return %arg0, %c0_i32, %c0_i32_0, %c0_i32_1 : i32, i32, i32, i32
  }
  func.func @transform_1(%arg0: i32, %arg1: i32) -> (i32, i32) {
    %c0_i32 = arith.constant 0 : i32
    %c0_i32_0 = arith.constant 0 : i32
    %c0_i32_1 = arith.constant 0 : i32
    return %c0_i32, %c0_i32_0 : i32, i32
  }
  func.func @transform_2(%arg0: i32, %arg1: i32) -> (i32, i32) {
    %c0_i32 = arith.constant 0 : i32
    %c0_i32_0 = arith.constant 0 : i32
    %c0_i32_1 = arith.constant 0 : i32
    return %c0_i32, %c0_i32_0 : i32, i32
  }
  func.func @transform_3(%arg0: i32, %arg1: i32) -> (i32, i32) {
    %c0_i32 = arith.constant 0 : i32
    %c0_i32_0 = arith.constant 0 : i32
    %c0_i32_1 = arith.constant 0 : i32
    return %c0_i32, %c0_i32_0 : i32, i32
  }
  func.func @transform_4(%arg0: i32, %arg1: i32) -> (i32, i32, i32, i32) {
    %c0_i32 = arith.constant 0 : i32
    %c0_i32_0 = arith.constant 0 : i32
    %c0_i32_1 = arith.constant 0 : i32
    return %arg0, %arg1, %c0_i32, %c0_i32_0 : i32, i32, i32, i32
  }
  func.func @transform_5(%arg0: i32, %arg1: i32) -> (i32, i32, i32, i32) {
    %c0_i32 = arith.constant 0 : i32
    %c0_i32_0 = arith.constant 0 : i32
    %c0_i32_1 = arith.constant 0 : i32
    return %arg0, %arg1, %c0_i32, %c0_i32_0 : i32, i32, i32, i32
  }
}

module attributes {stable_mosaic.version = 11 : i64} {
  func.func @_conv3x3_kernel(%arg0: i32, %arg1: i32, %arg2: memref<1x8x8x128xbf16, #tpu.memory_space<vmem>>, %arg3: memref<1152x128xbf16, #tpu.memory_space<vmem>>, %arg4: memref<1x128xf32, #tpu.memory_space<vmem>>, %arg5: memref<1x128xf32, #tpu.memory_space<vmem>>, %arg6: memref<1x8x8x128xbf16, #tpu.memory_space<vmem>>, %arg7: memref<1x1x1x256xf32, #tpu.memory_space<vmem>>, %arg8: memref<10x10x128xbf16, #tpu.memory_space<vmem>>) attributes {dimension_semantics = [#tpu.dimension_semantics<parallel>, #tpu.dimension_semantics<arbitrary>], iteration_bounds = array<i64: 2, 1>, scalar_prefetch = 0 : i64, scratch_operands = 1 : i64, tpu.core_type = #tpu.core_type<tc>, window_params = [{transform_indices = @transform_0, window_bounds = array<i64: 1, 8, 8, 128>}, {pipeline_mode = #tpu.pipeline_mode<synchronous>, transform_indices = @transform_1, window_bounds = array<i64: 1152, 128>}, {pipeline_mode = #tpu.pipeline_mode<synchronous>, transform_indices = @transform_2, window_bounds = array<i64: 1, 128>}, {pipeline_mode = #tpu.pipeline_mode<synchronous>, transform_indices = @transform_3, window_bounds = array<i64: 1, 128>}, {transform_indices = @transform_4, window_bounds = array<i64: 1, 8, 8, 128>}, {transform_indices = @transform_5, window_bounds = array<i64: 1, 1, 1, 256>}]} {
    %c0_i32 = arith.constant 0 : i32
    %0 = arith.cmpi eq, %arg1, %c0_i32 : i32
    %1 = arith.extui %0 : i1 to i32
    %c0_i32_0 = arith.constant 0 : i32
    %2 = arith.cmpi ne, %1, %c0_i32_0 : i32
    scf.if %2 {
      %c0_35 = arith.constant 0 : index
      %c0_36 = arith.constant 0 : index
      %c0_37 = arith.constant 0 : index
      %c0_38 = arith.constant 0 : index
      %47 = vector.load %arg2[%c0_35, %c0_36, %c0_37, %c0_38] : memref<1x8x8x128xbf16, #tpu.memory_space<vmem>>, vector<1x8x8x128xbf16>
      %48 = vector.shape_cast %47 : vector<1x8x8x128xbf16> to vector<8x8x128xbf16>
      %49 = arith.extf %48 : vector<8x8x128xbf16> to vector<8x8x128xf32>
      %c0_39 = arith.constant 0 : index
      %c0_40 = arith.constant 0 : index
      %50 = vector.load %arg4[%c0_39, %c0_40] : memref<1x128xf32, #tpu.memory_space<vmem>>, vector<1x128xf32>
      %51 = vector.shape_cast %50 : vector<1x128xf32> to vector<1x1x128xf32>
      %52 = vector.broadcast %51 : vector<1x1x128xf32> to vector<8x8x128xf32>
      %53 = arith.mulf %49, %52 : vector<8x8x128xf32>
      %c0_41 = arith.constant 0 : index
      %c0_42 = arith.constant 0 : index
      %54 = vector.load %arg5[%c0_41, %c0_42] : memref<1x128xf32, #tpu.memory_space<vmem>>, vector<1x128xf32>
      %55 = vector.shape_cast %54 : vector<1x128xf32> to vector<1x1x128xf32>
      %56 = vector.broadcast %55 : vector<1x1x128xf32> to vector<8x8x128xf32>
      %57 = arith.addf %53, %56 : vector<8x8x128xf32>
      %cst_43 = arith.constant 0.000000e+00 : f32
      %58 = vector.broadcast %cst_43 : f32 to vector<8x8x128xf32>
      %59 = arith.maximumf %57, %58 : vector<8x8x128xf32>
      %cst_44 = arith.constant 0.000000e+00 : bf16
      %60 = vector.broadcast %cst_44 : bf16 to vector<10x10x128xbf16>
      %c0_45 = arith.constant 0 : index
      %c0_46 = arith.constant 0 : index
      %c0_47 = arith.constant 0 : index
      %61 = vector.load %arg8[%c0_45, %c0_46, %c0_47] : memref<10x10x128xbf16, #tpu.memory_space<vmem>>, vector<10x10x128xbf16>
      tpu.vector_store %arg8[%c0_45, %c0_46, %c0_47], %60 {strides = array<i32>} : memref<10x10x128xbf16, #tpu.memory_space<vmem>>, vector<10x10x128xbf16>,
      %62 = arith.truncf %59 : vector<8x8x128xf32> to vector<8x8x128xbf16>
      %c1_48 = arith.constant 1 : index
      %c1_49 = arith.constant 1 : index
      %c0_50 = arith.constant 0 : index
      %63 = vector.load %arg8[%c1_48, %c1_49, %c0_50] : memref<10x10x128xbf16, #tpu.memory_space<vmem>>, vector<8x8x128xbf16>
      tpu.vector_store %arg8[%c1_48, %c1_49, %c0_50], %62 {strides = array<i32>} : memref<10x10x128xbf16, #tpu.memory_space<vmem>>, vector<8x8x128xbf16>,
    } else {
    }
    %c8_i32 = arith.constant 8 : i32
    %3 = arith.muli %arg1, %c8_i32 : i32
    %4 = tpu.assume_multiple %3, 8 : i32
    %c0_i32_1 = arith.constant 0 : i32
    %5 = arith.addi %4, %c0_i32_1 : i32
    %6 = arith.index_cast %5 : i32 to index
    %c0 = arith.constant 0 : index
    %c0_2 = arith.constant 0 : index
    %7 = vector.load %arg8[%6, %c0, %c0_2] : memref<10x10x128xbf16, #tpu.memory_space<vmem>>, vector<8x8x128xbf16>
    %c0_i32_3 = arith.constant 0 : i32
    %8 = arith.addi %4, %c0_i32_3 : i32
    %9 = arith.index_cast %8 : i32 to index
    %c1 = arith.constant 1 : index
    %c0_4 = arith.constant 0 : index
    %10 = vector.load %arg8[%9, %c1, %c0_4] : memref<10x10x128xbf16, #tpu.memory_space<vmem>>, vector<8x8x128xbf16>
    %c0_i32_5 = arith.constant 0 : i32
    %11 = arith.addi %4, %c0_i32_5 : i32
    %12 = arith.index_cast %11 : i32 to index
    %c2 = arith.constant 2 : index
    %c0_6 = arith.constant 0 : index
    %13 = vector.load %arg8[%12, %c2, %c0_6] : memref<10x10x128xbf16, #tpu.memory_space<vmem>>, vector<8x8x128xbf16>
    %c1_i32 = arith.constant 1 : i32
    %14 = arith.addi %4, %c1_i32 : i32
    %15 = arith.index_cast %14 : i32 to index
    %c0_7 = arith.constant 0 : index
    %c0_8 = arith.constant 0 : index
    %16 = vector.load %arg8[%15, %c0_7, %c0_8] : memref<10x10x128xbf16, #tpu.memory_space<vmem>>, vector<8x8x128xbf16>
    %c1_i32_9 = arith.constant 1 : i32
    %17 = arith.addi %4, %c1_i32_9 : i32
    %18 = arith.index_cast %17 : i32 to index
    %c1_10 = arith.constant 1 : index
    %c0_11 = arith.constant 0 : index
    %19 = vector.load %arg8[%18, %c1_10, %c0_11] : memref<10x10x128xbf16, #tpu.memory_space<vmem>>, vector<8x8x128xbf16>
    %c1_i32_12 = arith.constant 1 : i32
    %20 = arith.addi %4, %c1_i32_12 : i32
    %21 = arith.index_cast %20 : i32 to index
    %c2_13 = arith.constant 2 : index
    %c0_14 = arith.constant 0 : index
    %22 = vector.load %arg8[%21, %c2_13, %c0_14] : memref<10x10x128xbf16, #tpu.memory_space<vmem>>, vector<8x8x128xbf16>
    %c2_i32 = arith.constant 2 : i32
    %23 = arith.addi %4, %c2_i32 : i32
    %24 = arith.index_cast %23 : i32 to index
    %c0_15 = arith.constant 0 : index
    %c0_16 = arith.constant 0 : index
    %25 = vector.load %arg8[%24, %c0_15, %c0_16] : memref<10x10x128xbf16, #tpu.memory_space<vmem>>, vector<8x8x128xbf16>
    %c2_i32_17 = arith.constant 2 : i32
    %26 = arith.addi %4, %c2_i32_17 : i32
    %27 = arith.index_cast %26 : i32 to index
    %c1_18 = arith.constant 1 : index
    %c0_19 = arith.constant 0 : index
    %28 = vector.load %arg8[%27, %c1_18, %c0_19] : memref<10x10x128xbf16, #tpu.memory_space<vmem>>, vector<8x8x128xbf16>
    %c2_i32_20 = arith.constant 2 : i32
    %29 = arith.addi %4, %c2_i32_20 : i32
    %30 = arith.index_cast %29 : i32 to index
    %c2_21 = arith.constant 2 : index
    %c0_22 = arith.constant 0 : index
    %31 = vector.load %arg8[%30, %c2_21, %c0_22] : memref<10x10x128xbf16, #tpu.memory_space<vmem>>, vector<8x8x128xbf16>
    %32 = tpu.concatenate %7, %10, %13, %16, %19, %22, %25, %28, %31 in 2 : vector<8x8x128xbf16>, vector<8x8x128xbf16>, vector<8x8x128xbf16>, vector<8x8x128xbf16>, vector<8x8x128xbf16>, vector<8x8x128xbf16>, vector<8x8x128xbf16>, vector<8x8x128xbf16>, vector<8x8x128xbf16> -> vector<8x8x1152xbf16>
    %33 = vector.shape_cast %32 : vector<8x8x1152xbf16> to vector<64x1152xbf16>
    %c0_23 = arith.constant 0 : index
    %c0_24 = arith.constant 0 : index
    %34 = vector.load %arg3[%c0_23, %c0_24] : memref<1152x128xbf16, #tpu.memory_space<vmem>>, vector<1152x128xbf16>
    %cst = arith.constant dense<0.000000e+00> : vector<64x128xf32>
    %35 = tpu.matmul %33, %34, %cst {dimension_numbers = #tpu.dot_dimension_numbers<[1], [0], [0], [1], [0, 0, 1, 1], [], []>} : vector<64x1152xbf16>, vector<1152x128xbf16>, vector<64x128xf32> -> vector<64x128xf32>
    %36 = vector.shape_cast %35 : vector<64x128xf32> to vector<1x8x8x128xf32>
    %37 = arith.truncf %36 : vector<1x8x8x128xf32> to vector<1x8x8x128xbf16>
    %c0_25 = arith.constant 0 : index
    %c0_26 = arith.constant 0 : index
    %c0_27 = arith.constant 0 : index
    %c0_28 = arith.constant 0 : index
    %38 = vector.load %arg6[%c0_25, %c0_26, %c0_27, %c0_28] : memref<1x8x8x128xbf16, #tpu.memory_space<vmem>>, vector<1x8x8x128xbf16>
    tpu.vector_store %arg6[%c0_25, %c0_26, %c0_27, %c0_28], %37 {strides = array<i32>} : memref<1x8x8x128xbf16, #tpu.memory_space<vmem>>, vector<1x8x8x128xbf16>,
    %cst_29 = arith.constant dense<0.000000e+00> : vector<128xf32>
    %39 = vector.multi_reduction <add>, %35, %cst_29 [0] : vector<64x128xf32> to vector<128xf32>
    %40 = vector.shape_cast %39 : vector<128xf32> to vector<1x128xf32>
    %41 = arith.mulf %35, %35 : vector<64x128xf32>
    %cst_30 = arith.constant dense<0.000000e+00> : vector<128xf32>
    %42 = vector.multi_reduction <add>, %41, %cst_30 [0] : vector<64x128xf32> to vector<128xf32>
    %43 = vector.shape_cast %42 : vector<128xf32> to vector<1x128xf32>
    %44 = tpu.concatenate %40, %43 in 1 : vector<1x128xf32>, vector<1x128xf32> -> vector<1x256xf32>
    %45 = vector.shape_cast %44 : vector<1x256xf32> to vector<1x1x1x256xf32>
    %c0_31 = arith.constant 0 : index
    %c0_32 = arith.constant 0 : index
    %c0_33 = arith.constant 0 : index
    %c0_34 = arith.constant 0 : index
    %46 = vector.load %arg7[%c0_31, %c0_32, %c0_33, %c0_34] : memref<1x1x1x256xf32, #tpu.memory_space<vmem>>, vector<1x1x1x256xf32>
    tpu.vector_store %arg7[%c0_31, %c0_32, %c0_33, %c0_34], %45 {strides = array<i32>} : memref<1x1x1x256xf32, #tpu.memory_space<vmem>>, vector<1x1x1x256xf32>,
    return
  }
  func.func @transform_0(%arg0: i32, %arg1: i32) -> (i32, i32, i32, i32) {
    %c0_i32 = arith.constant 0 : i32
    %c0_i32_0 = arith.constant 0 : i32
    %c0_i32_1 = arith.constant 0 : i32
    %c0_i32_2 = arith.constant 0 : i32
    return %arg0, %c0_i32, %c0_i32_0, %c0_i32_1 : i32, i32, i32, i32
  }
  func.func @transform_1(%arg0: i32, %arg1: i32) -> (i32, i32) {
    %c0_i32 = arith.constant 0 : i32
    %c0_i32_0 = arith.constant 0 : i32
    %c0_i32_1 = arith.constant 0 : i32
    return %c0_i32, %c0_i32_0 : i32, i32
  }
  func.func @transform_2(%arg0: i32, %arg1: i32) -> (i32, i32) {
    %c0_i32 = arith.constant 0 : i32
    %c0_i32_0 = arith.constant 0 : i32
    %c0_i32_1 = arith.constant 0 : i32
    return %c0_i32, %c0_i32_0 : i32, i32
  }
  func.func @transform_3(%arg0: i32, %arg1: i32) -> (i32, i32) {
    %c0_i32 = arith.constant 0 : i32
    %c0_i32_0 = arith.constant 0 : i32
    %c0_i32_1 = arith.constant 0 : i32
    return %c0_i32, %c0_i32_0 : i32, i32
  }
  func.func @transform_4(%arg0: i32, %arg1: i32) -> (i32, i32, i32, i32) {
    %c0_i32 = arith.constant 0 : i32
    %c0_i32_0 = arith.constant 0 : i32
    %c0_i32_1 = arith.constant 0 : i32
    return %arg0, %arg1, %c0_i32, %c0_i32_0 : i32, i32, i32, i32
  }
  func.func @transform_5(%arg0: i32, %arg1: i32) -> (i32, i32, i32, i32) {
    %c0_i32 = arith.constant 0 : i32
    %c0_i32_0 = arith.constant 0 : i32
    %c0_i32_1 = arith.constant 0 : i32
    return %arg0, %arg1, %c0_i32, %c0_i32_0 : i32, i32, i32, i32
  }
}

module attributes {stable_mosaic.version = 11 : i64} {
  func.func @_bn_relu_kernel(%arg0: i32, %arg1: i32, %arg2: memref<1x8x8x128xbf16, #tpu.memory_space<vmem>>, %arg3: memref<1x8xf32, #tpu.memory_space<vmem>>, %arg4: memref<1x8xf32, #tpu.memory_space<vmem>>, %arg5: memref<1x8x8x8xf32, #tpu.memory_space<vmem>>) attributes {dimension_semantics = [#tpu.dimension_semantics<parallel>, #tpu.dimension_semantics<parallel>], iteration_bounds = array<i64: 2, 1>, scalar_prefetch = 0 : i64, scratch_operands = 0 : i64, tpu.core_type = #tpu.core_type<tc>, window_params = [{transform_indices = @transform_0, window_bounds = array<i64: 1, 8, 8, 128>}, {pipeline_mode = #tpu.pipeline_mode<synchronous>, transform_indices = @transform_1, window_bounds = array<i64: 1, 8>}, {pipeline_mode = #tpu.pipeline_mode<synchronous>, transform_indices = @transform_2, window_bounds = array<i64: 1, 8>}, {transform_indices = @transform_3, window_bounds = array<i64: 1, 8, 8, 8>}]} {
    %c0 = arith.constant 0 : index
    %c0_0 = arith.constant 0 : index
    %c0_1 = arith.constant 0 : index
    %c0_2 = arith.constant 0 : index
    %0 = vector.load %arg2[%c0, %c0_0, %c0_1, %c0_2] : memref<1x8x8x128xbf16, #tpu.memory_space<vmem>>, vector<1x8x8x128xbf16>
    %1 = vector.extract_strided_slice %0 {offsets = [0, 0, 0, 0], sizes = [1, 8, 8, 8], strides = [1, 1, 1, 1]} : vector<1x8x8x128xbf16> to vector<1x8x8x8xbf16>
    %2 = arith.extf %1 : vector<1x8x8x8xbf16> to vector<1x8x8x8xf32>
    %c0_3 = arith.constant 0 : index
    %c0_4 = arith.constant 0 : index
    %3 = vector.load %arg3[%c0_3, %c0_4] : memref<1x8xf32, #tpu.memory_space<vmem>>, vector<1x8xf32>
    %4 = vector.shape_cast %3 : vector<1x8xf32> to vector<1x1x1x8xf32>
    %5 = vector.broadcast %4 : vector<1x1x1x8xf32> to vector<1x8x8x8xf32>
    %6 = arith.mulf %2, %5 : vector<1x8x8x8xf32>
    %c0_5 = arith.constant 0 : index
    %c0_6 = arith.constant 0 : index
    %7 = vector.load %arg4[%c0_5, %c0_6] : memref<1x8xf32, #tpu.memory_space<vmem>>, vector<1x8xf32>
    %8 = vector.shape_cast %7 : vector<1x8xf32> to vector<1x1x1x8xf32>
    %9 = vector.broadcast %8 : vector<1x1x1x8xf32> to vector<1x8x8x8xf32>
    %10 = arith.addf %6, %9 : vector<1x8x8x8xf32>
    %cst = arith.constant 0.000000e+00 : f32
    %11 = vector.broadcast %cst : f32 to vector<1x8x8x8xf32>
    %12 = arith.maximumf %10, %11 : vector<1x8x8x8xf32>
    %c0_7 = arith.constant 0 : index
    %c0_8 = arith.constant 0 : index
    %c0_9 = arith.constant 0 : index
    %c0_10 = arith.constant 0 : index
    %13 = vector.load %arg5[%c0_7, %c0_8, %c0_9, %c0_10] : memref<1x8x8x8xf32, #tpu.memory_space<vmem>>, vector<1x8x8x8xf32>
    tpu.vector_store %arg5[%c0_7, %c0_8, %c0_9, %c0_10], %12 {strides = array<i32>} : memref<1x8x8x8xf32, #tpu.memory_space<vmem>>, vector<1x8x8x8xf32>,
    return
  }
  func.func @transform_0(%arg0: i32, %arg1: i32) -> (i32, i32, i32, i32) {
    %c0_i32 = arith.constant 0 : i32
    %c0_i32_0 = arith.constant 0 : i32
    %c0_i32_1 = arith.constant 0 : i32
    return %arg0, %arg1, %c0_i32, %c0_i32_0 : i32, i32, i32, i32
  }
  func.func @transform_1(%arg0: i32, %arg1: i32) -> (i32, i32) {
    %c0_i32 = arith.constant 0 : i32
    %c0_i32_0 = arith.constant 0 : i32
    %c0_i32_1 = arith.constant 0 : i32
    return %c0_i32, %c0_i32_0 : i32, i32
  }
  func.func @transform_2(%arg0: i32, %arg1: i32) -> (i32, i32) {
    %c0_i32 = arith.constant 0 : i32
    %c0_i32_0 = arith.constant 0 : i32
    %c0_i32_1 = arith.constant 0 : i32
    return %c0_i32, %c0_i32_0 : i32, i32
  }
  func.func @transform_3(%arg0: i32, %arg1: i32) -> (i32, i32, i32, i32) {
    %c0_i32 = arith.constant 0 : i32
    %c0_i32_0 = arith.constant 0 : i32
    %c0_i32_1 = arith.constant 0 : i32
    return %arg0, %arg1, %c0_i32, %c0_i32_0 : i32, i32, i32, i32
  }
}

</mosaic_0001>

<bundles_post_ra>
// kernel: down_forward.5
= control target key start
LH: loop header
LB: loop body
LE: loop exit
PB: predicated region body
PF: predicated region fallthrough
CT: control target
= control target key end

     0   :  { %s456_s12 = smov 0   ;;  %s458_s13 = smov 0   ;;  %s507_s0 = inlined_call_operand.vmem [shape: bf16[2,8,8,128], index: 0, kind: input, shape index: {}]   ;;  %s508_s1 = inlined_call_operand.vmem [shape: f32[1,8], index: 1, kind: input, shape index: {}]   ;;  %s509_s2 = inlined_call_operand.vmem [shape: f32[1,8], index: 2, kind: input, shape index: {}]   ;;  %s510_s3 = inlined_call_operand.vmem [shape: f32[2,8,8,8], index: 3, kind: output, shape index: {}]  }
   0x1   :  { %s460_s14 = smov 0  }
   0x2 LB: > { %s25_s15 = sadd.s32 1, %s430_s13  ;;  %p358_p0 = scmp.ge.s32.totalorder %s434_s14, 1  ;;  %s434_s14 = sphi %s460_s14, %s13_s14   ;;  %s430_s13 = sphi %s458_s13, %s512_s13   ;;  %s426_s12 = sphi %s456_s12, %s511_s12  }
   0x3   : > { %p27_p1 = scmp.ge.s32.totalorder %s25_s15, 2  ;;  %p158_p2 = scmp.lt.s32.totalorder %s434_s14, 3 }
   0x5   : > { %s514_s15 = smov (%p27_p1, %s25_s15), 0  ;;  %p159_p3 = pnand %p358_p0, %p158_p2 }
   0x6   : > { %p191_p4 = scmp.lt.s32.totalorder (!%p159_p3), %s426_s12, 1 }
   0x7   : > { %162 = sbr.rel (%p159_p3) target bundleno = 32 (0x20), region = 32 }
   0xc   : > { %s516_s12 = smov (!%p191_p4, %s426_s12), 1  ;;  %v410_v0 = vld [vmem:[%s508_s1] ss:$0 sm:$0xff]  ;;  %vm258_vm0 = vcmask 64512  }
   0xd   : > { %s365_s16 = sshll.u32 %s516_s12, 5  ;;  %v411_v5 = vld [vmem:[%s509_s2] ss:$0 sm:$0xff]  ;;  %s366_s24 = sshll.u32 %s516_s12, 6 }
   0xe   : > { %s198_s19 = scalar_lea.vmem %s507_s0, %s365_s16  ;;  %s208_s27 = scalar_lea.vmem %s510_s3, %s366_s24 }
   0xf   : > { %v368_v1 = vld [vmem:[%s198_s19] sm:$0xff]   ;;  %v383_v2 = vld [vmem:[%s198_s19 + $0x8] sm:$0xff]   ;;  %v384_v3 = vld [vmem:[%s198_s19 + $0x10] sm:$0xff]  }
  0x10   : > { %v369_v4 = vunpack.c.l.bf16 %v368_v1  ;;  %v370_v6 = vunpack.c.h.bf16 %v368_v1  ;;  %v373_v7 = vunpack.c.l.bf16 %v383_v2  ;;  %v374_v8 = vunpack.c.h.bf16 %v383_v2  ;;  %v385_v9 = vld [vmem:[%s198_s19 + $0x18] sm:$0xff]  }
  0x11   : > { %v377_v10 = vunpack.c.l.bf16 %v384_v3  ;;  %v378_v11 = vunpack.c.h.bf16 %v384_v3  ;;  %v381_v12 = vunpack.c.l.bf16 %v385_v9  ;;  %v382_v13 = vunpack.c.h.bf16 %v385_v9 }
  0x12   : > { %v230_v14 = vmul.f32 %v410_v0, %v369_v4  ;;  %v231_v15 = vmul.f32 %v410_v0, %v370_v6  ;;  %v232_v16 = vmul.f32 %v410_v0, %v373_v7  ;;  %v233_v17 = vmul.f32 %v410_v0, %v374_v8 }
  0x13   : > { %v234_v18 = vmul.f32 %v410_v0, %v377_v10  ;;  %v235_v19 = vmul.f32 %v410_v0, %v378_v11  ;;  %v236_v20 = vmul.f32 %v410_v0, %v381_v12  ;;  %v237_v21 = vmul.f32 %v410_v0, %v382_v13 }
  0x14   : > { %v242_v22 = vadd.f32 %v411_v5, %v230_v14  ;;  %v243_v23 = vadd.f32 %v411_v5, %v231_v15  ;;  %v244_v24 = vadd.f32 %v411_v5, %v232_v16  ;;  %v245_v25 = vadd.f32 %v411_v5, %v233_v17 }
  0x15   : > { %v246_v26 = vadd.f32 %v411_v5, %v234_v18  ;;  %v247_v27 = vadd.f32 %v411_v5, %v235_v19  ;;  %v248_v31 = vadd.f32 %v411_v5, %v236_v20  ;;  %v249_v33 = vadd.f32 %v411_v5, %v237_v21 }
  0x16   : > { %v250_v28 = vmax.f32 %v242_v22, 0.0  ;;  %v251_v29 = vmax.f32 %v243_v23, 0.0  ;;  %v252_v30 = vmax.f32 %v244_v24, 0.0  ;;  %v253_v32 = vmax.f32 %v245_v25, 0.0 }
  0x17   : > { %v254_v34 = vmax.f32 %v246_v26, 0.0  ;;  %v255_v35 = vmax.f32 %v247_v27, 0.0  ;;  %v256_v36 = vmax.f32 %v248_v31, 0.0  ;;  %v257_v37 = vmax.f32 %v249_v33, 0.0 }
  0x18   : > { %259 = vst.msk [vmem:[%s208_s27] sm:$0xff] %vm258_vm0, %v250_v28 }
  0x19   : > { %260 = vst.msk [vmem:[%s208_s27 + $0x8] sm:$0xff] %vm258_vm0, %v251_v29 }
  0x1a   : > { %261 = vst.msk [vmem:[%s208_s27 + $0x10] sm:$0xff] %vm258_vm0, %v252_v30 }
  0x1b   : > { %262 = vst.msk [vmem:[%s208_s27 + $0x18] sm:$0xff] %vm258_vm0, %v253_v32 }
  0x1c   : > { %263 = vst.msk [vmem:[%s208_s27 + $0x20] sm:$0xff] %vm258_vm0, %v254_v34 }
  0x1d   : > { %264 = vst.msk [vmem:[%s208_s27 + $0x28] sm:$0xff] %vm258_vm0, %v255_v35 }
  0x1e   : > { %265 = vst.msk [vmem:[%s208_s27 + $0x30] sm:$0xff] %vm258_vm0, %v256_v36 }
  0x1f   : > { %266 = vst.msk [vmem:[%s208_s27 + $0x38] sm:$0xff] %vm258_vm0, %v257_v37 }
  0x20 PF: > { %s13_s14 = sadd.s32 1, %s434_s14   ;;  %s511_s12 = smov %s430_s13 }
  0x21   : > { %p10_p5 = scmp.ge.s32.totalorder %s13_s14, 4   ;;  %s512_s13 = smov %s514_s15 }
  0x23   :  { %12 = sbr.rel (!%p10_p5) target bundleno = 2 (0x2), region = 62 }

// kernel: down_forward.3
= control target key start
LH: loop header
LB: loop body
LE: loop exit
PB: predicated region body
PF: predicated region fallthrough
CT: control target
= control target key end

     0   :  { %s1917_s18 = smov 0   ;;  %s1919_s19 = smov 0   ;;  %s2592_s0 = inlined_call_operand.vmem [shape: bf16[2,16,8,8], index: 0, kind: input, shape index: {}]   ;;  %s2593_s1 = inlined_call_operand.vmem [shape: bf16[36,128], index: 1, kind: input, shape index: {}]   ;;  %s2594_s2 = inlined_call_operand.vmem [shape: f32[1,4], index: 2, kind: input, shape index: {}]   ;;  %s2595_s3 = inlined_call_operand.vmem [shape: f32[1,4], index: 3, kind: input, shape index: {}]   ;;  %s2596_s4 = inlined_call_operand.vmem [shape: bf16[2,8,8,128], index: 4, kind: output, shape index: {0}]   ;;  %s2597_s5 = inlined_call_operand.vmem [shape: f32[2,1,1,256], index: 5, kind: output, shape index: {1}]  }
   0x1   :  { %s1921_s20 = smov 0  }
   0x2 LB: > { %s28_s2 = sadd.s32 1, %s1871_s19  ;;  %p1636_p0 = scmp.ge.s32.totalorder %s1875_s20, 1  ;;  %s1875_s20 = sphi %s1921_s20, %s16_s20   ;;  %s1871_s19 = sphi %s1919_s19, %s2603_s19   ;;  %s1867_s18 = sphi %s1917_s18, %s2602_s18  }
   0x3   : > { %p30_p1 = scmp.ge.s32.totalorder %s28_s2, 2  ;;  %p206_p2 = scmp.lt.s32.totalorder %s1875_s20, 3 }
   0x5   : > { %s2605_s2 = smov (%p30_p1, %s28_s2), 0  ;;  %p207_p3 = pnand %p1636_p0, %p206_p2 }
   0x6   : > { %p246_p4 = scmp.lt.s32.totalorder (!%p207_p3), %s1867_s18, 1  ;;  %s1878_s24 = smov (!%p207_p3), 124  }
   0x7   : > { %210 = sbr.rel (%p207_p3) target bundleno = 611 (0x263), region = 36  ;;  %s1879_s25 = smov (!%p207_p3), 8  }
   0x8   : > { %s1880_s26 = smov (!%p207_p3), 4   ;;  %s1881_s27 = smov (!%p207_p3), 12  }
   0x9   : > { %s1882_s28 = smov (!%p207_p3), 24   ;;  %s1883_s29 = smov (!%p207_p3), 20  }
   0xa   : > { %s1884_s30 = smov (!%p207_p3), 32   ;;  %s1885_s6 = smov (!%p207_p3), 16  }
   0xb   : > { %s1886_s7 = smov (!%p207_p3), 28  }
   0xc   : > { %vm434_vm0 = vcmask 27648   ;;  %vm436_vm1 = vcmask 24576   ;;  %v1877_v0 = vmov 0   ;;  %s2607_s18 = smov (!%p246_p4, %s1867_s18), 1  ;;  %vm538_vm2 = vsmask.f32 7938 }
   0xd   : > { %446 = vst.msk [vmem:[#allocation2 + $0x28] sm:$0xf] %vm434_vm0, %v1877_v0  ;;  %s1704_s3 = sshll.u32 %s2607_s18, 6  ;;  %vm544_vm3 = vsmask.f32 256  ;;  %vm2041_vm4 = vmand %vm434_vm0, %vm538_vm2  ;;  %vm1203_vm6 = vcmask 31744  }
   0xe   : > { %447 = vst.msk [vmem:[#allocation2 + $0x2c] sm:$0x1] %vm436_vm1, %v1877_v0  ;;  %s1945_s23 = scalar_lea.vmem %s2592_s0, %s1704_s3  ;;  %vm2046_vm5 = vmand %vm436_vm1, %vm544_vm3  ;;  %vm1228_vm7 = vcmask 64512   ;;  %vm1245_vm8 = vcmask 97280   ;;  %vm1400_vm9 = vcmask 1041408   ;;  %vm1262_vm10 = vcmask 130048  }
   0xf   : > { %435 = vst.msk [vmem:[#allocation2] sm:$0xf] %vm434_vm0, %v1877_v0  ;;  %v1949_v1 = vld [vmem:[%s1945_s23 + $0x20] sm:$0xff]   ;;  %v1960_v7 = vld [vmem:[%s1945_s23 + $0x10] sm:$0xff]   ;;  %v1964_v8 = vld [vmem:[%s1945_s23 + $0x8] sm:$0xff]   ;;  %vm1279_vm11 = vcmask 162816  }
  0x10   : > { %437 = vst.msk [vmem:[#allocation2 + $0x4] sm:$0x1] %vm436_vm1, %v1877_v0  ;;  %v1952_v2 = vld [vmem:[%s1945_s23] sm:$0xff]   ;;  %v1726_v3 = vunpack.c.l.bf16 %v1949_v1  ;;  %v1727_v4 = vunpack.c.h.bf16 %v1949_v1  ;;  %v1967_v9 = vld [vmem:[%s1945_s23 + $0x18] sm:$0xff]   ;;  %v1718_v12 = vunpack.c.l.bf16 %v1960_v7  ;;  %v1719_v13 = vunpack.c.h.bf16 %v1960_v7  ;;  %v1989_v18 = vld [vmem:[%s1945_s23 + $0x28] sm:$0xff]   ;;  %s1705_s14 = sshll.u32 %s2607_s18, 5 }
  0x11   : > { %438 = vst.msk [vmem:[#allocation2 + $0x8] sm:$0xf] %vm434_vm0, %v1877_v0  ;;  %v1710_v5 = vunpack.c.l.bf16 %v1952_v2  ;;  %v1711_v6 = vunpack.c.h.bf16 %v1952_v2  ;;  %v1714_v14 = vunpack.c.l.bf16 %v1964_v8  ;;  %v1715_v15 = vunpack.c.h.bf16 %v1964_v8  ;;  %v2008_v24 = vld [vmem:[%s1945_s23 + $0x30] sm:$0xff]   ;;  %v2011_v25 = vld [vmem:[%s1945_s23 + $0x38] sm:$0xff]   ;;  %s2573_s17 = scalar_lea.vmem %s2596_s4, %s1705_s14  ;;  %s1641_s3 = sshll.u32 %s2607_s18, 1 }
  0x12   : > { %439 = vst.msk [vmem:[#allocation2 + $0xc] sm:$0x1] %vm436_vm1, %v1877_v0  ;;  %v1823_v10 = vpack.i.bf16 %v1727_v4, %v1726_v3  ;;  %v1722_v16 = vunpack.c.l.bf16 %v1967_v9  ;;  %v1723_v17 = vunpack.c.h.bf16 %v1967_v9  ;;  %v1833_v19 = vpack.i.bf16 %v1719_v13, %v1718_v12  ;;  %s268_s23 = scalar_lea.vmem %s2597_s5, %s1641_s3 }
  0x13   : > { %440 = vst.msk [vmem:[#allocation2 + $0x10] sm:$0xf] %vm434_vm0, %v1877_v0  ;;  %v1813_v11 = vpack.i.bf16 %v1711_v6, %v1710_v5  ;;  %v1730_v20 = vunpack.c.l.bf16 %v1989_v18  ;;  %v1731_v21 = vunpack.c.h.bf16 %v1989_v18  ;;  %v1828_v22 = vpack.i.bf16 %v1715_v15, %v1714_v14 }
  0x14   : > { %441 = vst.msk [vmem:[#allocation2 + $0x14] sm:$0x1] %vm436_vm1, %v1877_v0  ;;  %1824 = vrot.lane.b32.xlu1 %v1823_v10, %s1878_s24  ;;  %1834 = vrot.lane.b32.xlu2 %v1833_v19, %s1878_s24  ;;  %v1818_v23 = vpack.i.bf16 %v1723_v17, %v1722_v16  ;;  %v1734_v27 = vunpack.c.l.bf16 %v2008_v24  ;;  %v1735_v28 = vunpack.c.h.bf16 %v2008_v24  ;;  %v1738_v29 = vunpack.c.l.bf16 %v2011_v25  ;;  %v567_v2 = vld [vmem:[#allocation2 + $0x28] sm:$0xf] }
  0x15   : > { %442 = vst.msk [vmem:[#allocation2 + $0x18] sm:$0xf] %vm434_vm0, %v1877_v0  ;;  %1814 = vrot.lane.b32.xlu0 %v1813_v11, %s1878_s24  ;;  %v1838_v26 = vpack.i.bf16 %v1731_v21, %v1730_v20  ;;  %v1739_v30 = vunpack.c.h.bf16 %v2011_v25  ;;  %vm1296_vm12 = vcmask 195584   ;;  %vm1313_vm13 = vcmask 228352  }
  0x16   : > { %443 = vst.msk [vmem:[#allocation2 + $0x1c] sm:$0x1] %vm436_vm1, %v1877_v0  ;;  %v1843_v31 = vpack.i.bf16 %v1735_v28, %v1734_v27  ;;  %v611_v34 = vld [vmem:[#allocation2] sm:$0xe]  ;;  %vm1330_vm14 = vcmask 261120   ;;  %vm1387_vm15 = vcmask 293888  }
  0x17   : > { %444 = vst.msk [vmem:[#allocation2 + $0x20] sm:$0xf] %vm434_vm0, %v1877_v0  ;;  %v1848_v32 = vpack.i.bf16 %v1739_v30, %v1738_v29  ;;  %v603_v33 = vld [vmem:[#allocation2 + $0x4] sm:$0x1]  ;;  %v795_v36 = vunpack.c.l.b16 %v611_v34  ;;  %v2036_v40 = vld [vmem:[#allocation2] sm:$0xf] }
  0x18   : > { %445 = vst.msk [vmem:[#allocation2 + $0x24] sm:$0x1] %vm436_vm1, %v1877_v0  ;;  %v692_v35 = vunpack.c.l.b16 %v603_v33  ;;  %v691_v43 = vunpack.c.l.b16 %v2036_v40 }
  0x19   : > { %448 = vst.msk [vmem:[#allocation2 + $0x30] sm:$0xf] %vm434_vm0, %v1877_v0 }
  0x1a   : > { %449 = vst.msk [vmem:[#allocation2 + $0x34] sm:$0x1] %vm436_vm1, %v1877_v0  ;;  %v803_v37 = vpack.c.b16 %v692_v35, %v795_v36  ;;  %v707_v46 = vpack.c.b16 %v692_v35, %v691_v43 }
  0x1b   : > { %450 = vst.msk [vmem:[#allocation2 + $0x38] sm:$0xf] %vm434_vm0, %v1877_v0 }
  0x1c   : > { %451 = vst.msk [vmem:[#allocation2 + $0x3c] sm:$0x1] %vm436_vm1, %v1877_v0  ;;  %1829 = vrot.lane.b32.xlu1 %v1828_v22, %s1878_s24  ;;  %1839 = vrot.lane.b32.xlu2 %v1838_v26, %s1878_s24  ;;  %v811_v38 = vrot.slane %v803_v37, 1  ;;  %v718_v48 = vshll.u32 %v707_v46, 16  ;;  %v716_v50 = vshrl.u32 %v707_v46, 16 }
  0x1d   : > { %452 = vst.msk [vmem:[#allocation2 + $0x40] sm:$0xf] %vm434_vm0, %v1877_v0  ;;  %1819 = vrot.lane.b32.xlu0 %v1818_v23, %s1878_s24  ;;  %v555_v61 = vld [vmem:[#allocation2 + $0x18] sm:$0xf]  ;;  %v558_v62 = vld [vmem:[#allocation2 + $0x1c] sm:$0x1] }
  0x1e   : > { %453 = vst.msk [vmem:[#allocation2 + $0x44] sm:$0x1] %vm436_vm1, %v1877_v0  ;;  %v720_v51 = vrot.slane %v718_v48, 1 }
  0x1f   : > { %454 = vst.msk [vmem:[#allocation2 + $0x48] sm:$0xf] %vm434_vm0, %v1877_v0  ;;  %vm1486_vm0 = vcmask 1040384  }
  0x20   : > { %455 = vst.msk [vmem:[#allocation2 + $0x4c] sm:$0x1] %vm436_vm1, %v1877_v0  ;;  %v721_v57 = vor.u32 %v720_v51, %v716_v50  ;;  %v573_v22 = vld [vmem:[#allocation2 + $0x30] sm:$0xf] }
  0x21   : > { %v576_v23 = vld [vmem:[#allocation2 + $0x34] sm:$0x1] }
  0x24   : > { %1849 = vrot.lane.b32.xlu1 %v1848_v32, %s1878_s24  ;;  %771 = vrot.lane.b32.xlu2 %v721_v57, %s1880_s26  ;;  %v540_v57 = vld [vmem:[#allocation2 + $0x8] sm:$0xf] }
  0x25   : > { %1844 = vrot.lane.b32.xlu0 %v1843_v31, %s1878_s24 }
  0x2c   : > { %819 = vrot.lane.b32.xlu1 %v811_v38, %s1879_s25 }
  0x6e   : > { %v1835_v39 = vpop.permute.xlu2 %1834 }
  0x6f   : > { %v1837_v41 = vunpack.i.h.bf16 %v1835_v39  ;;  %v1836_v42 = vunpack.i.l.bf16 %v1835_v39 }
  0x71   : > { %v375_v44 = vmax.f32 %v1719_v13, %v1837_v41  ;;  %v374_v45 = vmax.f32 %v1718_v12, %v1836_v42 }
  0x73   : > { %v420_v47 = vmax.f32 %v374_v45, %v375_v44 }
  0x75   : > { %v428_v49 = vpack.c.bf16 %v420_v47, %v420_v47 }
  0x76   : > { %v1840_v52 = vpop.permute.xlu2 %1839 }
  0x77   : > { %v473_v53 = vshrl.u32 %v428_v49, 16  ;;  %v476_v54 = vshll.u32 %v428_v49, 16  ;;  %v1842_v55 = vunpack.i.h.bf16 %v1840_v52  ;;  %v1841_v56 = vunpack.i.l.bf16 %v1840_v52 }
  0x79   : > { %v475_v58 = vrot.slane %v473_v53, 7  ;;  %v381_v59 = vmax.f32 %v1731_v21, %v1842_v55  ;;  %v380_v60 = vmax.f32 %v1730_v20, %v1841_v56 }
  0x7b   : > { %v478_v0 = vor.u32 %v476_v54, %v475_v58  ;;  %v479_v7 = vrot.slane %v475_v58, 4  ;;  %v423_v10 = vmax.f32 %v380_v60, %v381_v59 }
  0x7d   : > { %v556_v12 = vsel %vm2041_vm4, %v478_v0, %v555_v61  ;;  %v559_v13 = vsel %vm2046_vm5, %v479_v7, %v558_v62  ;;  %v431_v18 = vpack.c.bf16 %v423_v10, %v423_v10  ;;  %v546_v7 = vld [vmem:[#allocation2 + $0xc] sm:$0x1] }
  0x7e   : > { %557 = vst [vmem:[#allocation2 + $0x18] sm:$0xf] %v556_v12 }
  0x7f   : > { %560 = vst [vmem:[#allocation2 + $0x1c] sm:$0x1] %v559_v13  ;;  %v497_v19 = vshrl.u32 %v431_v18, 16  ;;  %v500_v20 = vshll.u32 %v431_v18, 16 }
  0x81   : > { %v499_v21 = vrot.slane %v497_v19, 7 }
  0x83   : > { %v502_v32 = vor.u32 %v500_v20, %v499_v21  ;;  %v503_v33 = vrot.slane %v499_v21, 4 }
  0x85   : > { %v574_v38 = vsel %vm2041_vm4, %v502_v32, %v573_v22  ;;  %v577_v39 = vsel %vm2046_vm5, %v503_v33, %v576_v23 }
  0x86   : > { %v1825_v26 = vpop.permute.xlu1 %1824  ;;  %575 = vst [vmem:[#allocation2 + $0x30] sm:$0xf] %v574_v38  ;;  %v549_v38 = vld [vmem:[#allocation2 + $0x10] sm:$0xf] }
  0x87   : > { %v1815_v31 = vpop.permute.xlu0 %1814  ;;  %v1827_v34 = vunpack.i.h.bf16 %v1825_v26  ;;  %v1826_v35 = vunpack.i.l.bf16 %v1825_v26  ;;  %578 = vst [vmem:[#allocation2 + $0x34] sm:$0x1] %v577_v39 }
  0x88   : > { %v1817_v36 = vunpack.i.h.bf16 %v1815_v31  ;;  %v1816_v37 = vunpack.i.l.bf16 %v1815_v31 }
  0x89   : > { %v379_v41 = vmax.f32 %v1727_v4, %v1827_v34  ;;  %v378_v42 = vmax.f32 %v1726_v3, %v1826_v35 }
  0x8a   : > { %v371_v43 = vmax.f32 %v1711_v6, %v1817_v36  ;;  %v370_v44 = vmax.f32 %v1710_v5, %v1816_v37  ;;  %v570_v5 = vld [vmem:[#allocation2 + $0x2c] sm:$0x1] }
  0x8b   : > { %v422_v45 = vmax.f32 %v378_v42, %v379_v41 }
  0x8c   : > { %v418_v46 = vmax.f32 %v370_v44, %v371_v43  ;;  %v552_v43 = vld [vmem:[#allocation2 + $0x14] sm:$0x1]  ;;  %v561_v44 = vld [vmem:[#allocation2 + $0x20] sm:$0xf] }
  0x8d   : > { %v430_v47 = vpack.c.bf16 %v422_v45, %v422_v45  ;;  %v564_v45 = vld [vmem:[#allocation2 + $0x24] sm:$0x1] }
  0x8e   : > { %v426_v48 = vpack.c.bf16 %v418_v46, %v418_v46  ;;  %v1830_v49 = vpop.permute.xlu1 %1829 }
  0x8f   : > { %v1820_v50 = vpop.permute.xlu0 %1819  ;;  %v489_v51 = vshrl.u32 %v430_v47, 16  ;;  %v1832_v53 = vunpack.i.h.bf16 %v1830_v49  ;;  %v1831_v1 = vunpack.i.l.bf16 %v1830_v49  ;;  %v492_v6 = vshll.u32 %v430_v47, 16 }
  0x90   : > { %v457_v52 = vshrl.u32 %v426_v48, 16  ;;  %v460_v4 = vshll.u32 %v426_v48, 16  ;;  %v1822_v3 = vunpack.i.h.bf16 %v1820_v50  ;;  %v1821_v54 = vunpack.i.l.bf16 %v1820_v50 }
  0x91   : > { %v491_v55 = vrot.slane %v489_v51, 7  ;;  %v373_v58 = vmax.f32 %v1715_v15, %v1832_v53  ;;  %v372_v59 = vmax.f32 %v1714_v14, %v1831_v1 }
  0x92   : > { %v459_v56 = vrot.slane %v457_v52, 7  ;;  %v377_v60 = vmax.f32 %v1723_v17, %v1822_v3  ;;  %v376_v61 = vmax.f32 %v1722_v16, %v1821_v54  ;;  %v579_v54 = vld [vmem:[#allocation2 + $0x38] sm:$0xf] }
  0x93   : > { %v494_v62 = vor.u32 %v492_v6, %v491_v55  ;;  %v495_v0 = vrot.slane %v491_v55, 4  ;;  %v419_v13 = vmax.f32 %v372_v59, %v373_v58  ;;  %v582_v58 = vld [vmem:[#allocation2 + $0x3c] sm:$0x1]  ;;  %v585_v59 = vld [vmem:[#allocation2 + $0x40] sm:$0xf] }
  0x94   : > { %v462_v10 = vor.u32 %v460_v4, %v459_v56  ;;  %v463_v12 = vrot.slane %v459_v56, 4  ;;  %v421_v18 = vmax.f32 %v376_v61, %v377_v60 }
  0x95   : > { %v568_v19 = vsel %vm2041_vm4, %v494_v62, %v567_v2  ;;  %v571_v8 = vsel %vm2046_vm5, %v495_v0, %v570_v5  ;;  %v427_v15 = vpack.c.bf16 %v419_v13, %v419_v13  ;;  %v588_v0 = vld [vmem:[#allocation2 + $0x44] sm:$0x1] }
  0x96   : > { %v541_v14 = vsel %vm2041_vm4, %v462_v10, %v540_v57  ;;  %569 = vst [vmem:[#allocation2 + $0x28] sm:$0xf] %v568_v19  ;;  %v547_v9 = vsel %vm2046_vm5, %v463_v12, %v546_v7  ;;  %v429_v16 = vpack.c.bf16 %v421_v18, %v421_v18  ;;  %v1850_v20 = vpop.permute.xlu1 %1849  ;;  %v1667_v57 = vld [vmem:[#allocation2 + $0x18] sm:$0xf]  ;;  %v1647_v12 = vld [vmem:[#allocation2 + $0x30] sm:$0xf] }
  0x97   : > { %v1845_v17 = vpop.permute.xlu0 %1844  ;;  %572 = vst [vmem:[#allocation2 + $0x2c] sm:$0x1] %v571_v8  ;;  %v1852_v23 = vunpack.i.h.bf16 %v1850_v20  ;;  %v1851_v26 = vunpack.i.l.bf16 %v1850_v20  ;;  %v465_v31 = vshrl.u32 %v427_v15, 16  ;;  %v468_v41 = vshll.u32 %v427_v15, 16 }
  0x98   : > { %v1847_v21 = vunpack.i.h.bf16 %v1845_v17  ;;  %v1846_v22 = vunpack.i.l.bf16 %v1845_v17  ;;  %542 = vst [vmem:[#allocation2 + $0x8] sm:$0xf] %v541_v14  ;;  %v481_v32 = vshrl.u32 %v429_v16, 16  ;;  %v484_v33 = vshll.u32 %v429_v16, 16 }
  0x99   : > { %548 = vst [vmem:[#allocation2 + $0xc] sm:$0x1] %v547_v9  ;;  %v385_v36 = vmax.f32 %v1739_v30, %v1852_v23  ;;  %v384_v37 = vmax.f32 %v1738_v29, %v1851_v26  ;;  %v467_v39 = vrot.slane %v465_v31, 7  ;;  %v2107_v18 = vunpack.c.l.b16 %v1667_v57 }
  0x9a   : > { %v383_v34 = vmax.f32 %v1735_v28, %v1847_v21  ;;  %v382_v35 = vmax.f32 %v1734_v27, %v1846_v22  ;;  %v483_v42 = vrot.slane %v481_v32, 7  ;;  %v2118_v16 = vunpack.c.l.b16 %v1647_v12  ;;  %v1644_v21 = vld [vmem:[#allocation2 + $0x18] sm:$0xf]  ;;  %v2195_v12 = vld [vmem:[#allocation2 + $0x34] sm:$0x1] }
  0x9b   : > { %v425_v47 = vmax.f32 %v384_v37, %v385_v36  ;;  %v470_v48 = vor.u32 %v468_v41, %v467_v39  ;;  %v471_v28 = vrot.slane %v467_v39, 4  ;;  %v1036_v20 = vpack.c.b16 %v2107_v18, %v2107_v18  ;;  %v1670_v36 = vld [vmem:[#allocation2 + $0x30] sm:$0xf] }
  0x9c   : > { %v424_v46 = vmax.f32 %v382_v35, %v383_v34  ;;  %v486_v49 = vor.u32 %v484_v33, %v483_v42  ;;  %v487_v24 = vrot.slane %v483_v42, 4  ;;  %v856_v11 = vpack.c.b16 %v2118_v16, %v2118_v16 }
  0x9d   : > { %v433_v50 = vpack.c.bf16 %v425_v47, %v425_v47  ;;  %v1646_v51 = vld [vmem:[#allocation2 + $0x28] sm:$0xf]  ;;  %v550_v25 = vsel %vm2041_vm4, %v470_v48, %v549_v38  ;;  %v553_v29 = vsel %vm2046_vm5, %v471_v28, %v552_v43  ;;  %v2130_v23 = vunpack.c.l.b16 %v1644_v21 }
  0x9e   : > { %v432_v27 = vpack.c.bf16 %v424_v46, %v424_v46  ;;  %v562_v30 = vsel %vm2041_vm4, %v486_v49, %v561_v44  ;;  %v565_v52 = vsel %vm2046_vm5, %v487_v24, %v564_v45  ;;  %551 = vst [vmem:[#allocation2 + $0x10] sm:$0xf] %v550_v25  ;;  %v2098_v55 = vunpack.c.l.b16 %v1646_v51 }
  0x9f   : > { %v513_v1 = vshrl.u32 %v433_v50, 16  ;;  %v516_v3 = vshll.u32 %v433_v50, 16  ;;  %554 = vst [vmem:[#allocation2 + $0x14] sm:$0x1] %v553_v29  ;;  %v1642_v6 = vld [vmem:[#allocation2 + $0x8] sm:$0xf]  ;;  %v853_v32 = vpack.c.b16 %v2130_v23, %v2130_v23  ;;  %v2148_v41 = vunpack.c.l.b16 %v1670_v36 }
  0xa0   : > { %v505_v4 = vshrl.u32 %v432_v27, 16  ;;  %v508_v53 = vshll.u32 %v432_v27, 16  ;;  %563 = vst [vmem:[#allocation2 + $0x20] sm:$0xf] %v562_v30  ;;  %v2100_v5 = vunpack.c.l.b16 %v1642_v6  ;;  %v855_v60 = vpack.c.b16 %v2098_v55, %v2098_v55  ;;  %v612_v30 = vld [vmem:[#allocation2 + $0x8] sm:$0xe] }
  0xa1   : > { %v515_v2 = vrot.slane %v513_v1, 7  ;;  %566 = vst [vmem:[#allocation2 + $0x24] sm:$0x1] %v565_v52  ;;  %v1039_v47 = vpack.c.b16 %v2148_v41, %v2148_v41  ;;  %v1658_v57 = vld [vmem:[#allocation2 + $0x8] sm:$0xe] }
  0xa2   : > { %v507_v56 = vrot.slane %v505_v4, 7  ;;  %867 = vrot.lane.b32.xlu1 %v855_v60, %s1881_s27  ;;  %v851_v13 = vpack.c.b16 %v2100_v5, %v2100_v5  ;;  %v1663_v60 = vld [vmem:[#allocation2 + $0x30] sm:$0xe]  ;;  %v2211_v36 = vld [vmem:[#allocation2 + $0x34] sm:$0x1] }
  0xa3   : > { %v518_v7 = vor.u32 %v516_v3, %v515_v2  ;;  %v519_v10 = vrot.slane %v515_v2, 4 }
  0xa4   : > { %v510_v61 = vor.u32 %v508_v53, %v507_v56  ;;  %v511_v62 = vrot.slane %v507_v56, 4  ;;  %859 = vrot.lane.b32.xlu2 %v851_v13, %s1881_s27  ;;  %v1669_v53 = vld [vmem:[#allocation2 + $0x28] sm:$0xf]  ;;  %v796_v56 = vunpack.c.l.b16 %v612_v30 }
  0xa5   : > { %v586_v14 = vsel %vm2041_vm4, %v518_v7, %v585_v59  ;;  %v589_v9 = vsel %vm2046_vm5, %v519_v10, %v588_v0  ;;  %v1643_v15 = vld [vmem:[#allocation2 + $0x10] sm:$0xf]  ;;  %v2181_v2 = vunpack.c.l.b16 %v1669_v53  ;;  %v979_v0 = vunpack.c.l.b16 %v1658_v57  ;;  %v2191_v7 = vld [vmem:[#allocation2 + $0x2c] sm:$0x1]  ;;  %v616_v13 = vld [vmem:[#allocation2 + $0x28] sm:$0xe] }
  0xa6   : > { %v580_v19 = vsel %vm2041_vm4, %v510_v61, %v579_v54  ;;  %v583_v8 = vsel %vm2046_vm5, %v511_v62, %v582_v58  ;;  %v2120_v17 = vunpack.c.l.b16 %v1643_v15  ;;  %587 = vst [vmem:[#allocation2 + $0x40] sm:$0xf] %v586_v14  ;;  %v1666_v22 = vld [vmem:[#allocation2 + $0x10] sm:$0xf]  ;;  %v2168_v51 = vld [vmem:[#allocation2 + $0x14] sm:$0x1]  ;;  %v800_v21 = vunpack.c.l.b16 %v616_v13 }
  0xa7   : > { %581 = vst [vmem:[#allocation2 + $0x38] sm:$0xf] %v580_v19  ;;  %v2132_v26 = vunpack.c.l.b16 %v1666_v22  ;;  %v1645_v31 = vld [vmem:[#allocation2 + $0x20] sm:$0xf]  ;;  %v1659_v25 = vld [vmem:[#allocation2 + $0x10] sm:$0xe]  ;;  %v884_v1 = vunpack.c.l.b16 %v2168_v51  ;;  %v1038_v10 = vpack.c.b16 %v2181_v2, %v2181_v2 }
  0xa8   : > { %584 = vst [vmem:[#allocation2 + $0x3c] sm:$0x1] %v583_v8  ;;  %v852_v63 = vpack.c.b16 %v2120_v17, %v2120_v17  ;;  %v2139_v35 = vunpack.c.l.b16 %v1645_v31  ;;  %v615_v43 = vld [vmem:[#allocation2 + $0x20] sm:$0xe]  ;;  %v2156_v46 = vld [vmem:[#allocation2 + $0x24] sm:$0x1]  ;;  %v980_v3 = vunpack.c.l.b16 %v1659_v25  ;;  %v984_v8 = vunpack.c.l.b16 %v1663_v60 }
  0xa9   : > { %590 = vst [vmem:[#allocation2 + $0x44] sm:$0x1] %v589_v9  ;;  %v1035_v33 = vpack.c.b16 %v2132_v26, %v2132_v26  ;;  %v799_v48 = vunpack.c.l.b16 %v615_v43  ;;  %v700_v49 = vunpack.c.l.b16 %v2156_v46  ;;  %v1668_v50 = vld [vmem:[#allocation2 + $0x20] sm:$0xf]  ;;  %v2176_v54 = vld [vmem:[#allocation2 + $0xc] sm:$0x1]  ;;  %v702_v9 = vunpack.c.l.b16 %v2191_v7 }
  0xaa   : > { %861 = vrot.lane.b32.xlu0 %v852_v63, %s1881_s27  ;;  %1045 = vrot.lane.b32.xlu1 %v1036_v20, %s1882_s28  ;;  %v854_v37 = vpack.c.b16 %v2139_v35, %v2139_v35  ;;  %v2172_v4 = vunpack.c.l.b16 %v1668_v50  ;;  %v988_v58 = vpack.c.b16 %v884_v1, %v980_v3  ;;  %v694_v59 = vunpack.c.l.b16 %v2176_v54  ;;  %v2187_v61 = vld [vmem:[#allocation2 + $0xc] sm:$0x1]  ;;  %v614_v22 = vld [vmem:[#allocation2 + $0x18] sm:$0xe]  ;;  %v617_v31 = vld [vmem:[#allocation2 + $0x30] sm:$0xe] }
  0xab   : > { %v807_v24 = vpack.c.b16 %v700_v49, %v799_v48  ;;  %v883_v14 = vunpack.c.l.b16 %v2187_v61  ;;  %v888_v20 = vunpack.c.l.b16 %v2195_v12  ;;  %v613_v43 = vld [vmem:[#allocation2 + $0x10] sm:$0xe]  ;;  %v1662_v30 = vld [vmem:[#allocation2 + $0x28] sm:$0xe]  ;;  %v2227_v53 = vld [vmem:[#allocation2 + $0x14] sm:$0x1] }
  0xac   : > { %869 = vrot.lane.b32.xlu2 %v856_v11, %s1881_s27  ;;  %v1037_v6 = vpack.c.b16 %v2172_v4, %v2172_v4  ;;  %v804_v62 = vpack.c.b16 %v694_v59, %v796_v56  ;;  %v996_v19 = vrot.slane %v988_v58, 1  ;;  %v797_v50 = vunpack.c.l.b16 %v613_v43  ;;  %v1682_v3 = vld [vmem:[#allocation2 + $0x10] sm:$0xe]  ;;  %v2249_v43 = vld [vmem:[#allocation2 + $0x24] sm:$0x1] }
  0xad   : > { %v1649_v34 = vld [vmem:[#allocation2 + $0x40] sm:$0xf]  ;;  %v815_v52 = vrot.slane %v807_v24, 1  ;;  %v987_v63 = vpack.c.b16 %v883_v14, %v979_v0  ;;  %v992_v11 = vpack.c.b16 %v888_v20, %v984_v8  ;;  %v983_v57 = vunpack.c.l.b16 %v1662_v30 }
  0xae   : > { %v2145_v38 = vunpack.c.l.b16 %v1649_v34  ;;  %v1671_v39 = vld [vmem:[#allocation2 + $0x38] sm:$0xf]  ;;  %v812_v15 = vrot.slane %v804_v62, 1  ;;  %v2209_v34 = vld [vmem:[#allocation2 + $0x1c] sm:$0x1]  ;;  %v1067_v0 = vunpack.c.l.b16 %v2227_v53 }
  0xaf   : > { %v2150_v42 = vunpack.c.l.b16 %v1671_v39  ;;  %v1648_v28 = vld [vmem:[#allocation2 + $0x38] sm:$0xf]  ;;  %v2213_v39 = vld [vmem:[#allocation2 + $0x14] sm:$0x1]  ;;  %v2234_v13 = vld [vmem:[#allocation2 + $0x3c] sm:$0x1] }
  0xb0   : > { %v858_v44 = vpack.c.b16 %v2145_v38, %v2145_v38  ;;  %v2166_v27 = vunpack.c.l.b16 %v1648_v28  ;;  %v704_v28 = vunpack.c.l.b16 %v2211_v36  ;;  %v696_v24 = vunpack.c.l.b16 %v2213_v39  ;;  %v618_v60 = vld [vmem:[#allocation2 + $0x38] sm:$0xe] }
  0xb1   : > { %v1040_v45 = vpack.c.b16 %v2150_v42, %v2150_v42 }
  0xb2   : > { %1043 = vrot.lane.b32.xlu0 %v1035_v33, %s1882_s28  ;;  %863 = vrot.lane.b32.xlu1 %v853_v32, %s1881_s27  ;;  %v857_v29 = vpack.c.b16 %v2166_v27, %v2166_v27  ;;  %v995_v32 = vrot.slane %v987_v63, 1  ;;  %v808_v33 = vpack.c.b16 %v702_v9, %v800_v21  ;;  %v706_v21 = vunpack.c.l.b16 %v2234_v13 }
  0xb4   : > { %865 = vrot.lane.b32.xlu2 %v854_v37, %s1881_s27  ;;  %v798_v37 = vunpack.c.l.b16 %v614_v22  ;;  %v816_v48 = vrot.slane %v808_v33, 1  ;;  %v2243_v22 = vld [vmem:[#allocation2 + $0x8] sm:$0xf] }
  0xba   : > { %1053 = vrot.lane.b32.xlu0 %v1040_v45, %s1882_s28  ;;  %873 = vrot.lane.b32.xlu1 %v858_v44, %s1881_s27  ;;  %v1000_v44 = vrot.slane %v992_v11, 1  ;;  %v801_v45 = vunpack.c.l.b16 %v617_v31  ;;  %v1661_v11 = vld [vmem:[#allocation2 + $0x20] sm:$0xe]  ;;  %v1686_v31 = vld [vmem:[#allocation2 + $0x30] sm:$0xe] }
  0xbc   : > { %1051 = vrot.lane.b32.xlu2 %v1039_v47, %s1882_s28  ;;  %v698_v47 = vunpack.c.l.b16 %v2209_v34 }
  0xbe   : > { %v806_v25 = vpack.c.b16 %v698_v47, %v798_v37 }
  0xc0   : > { %v814_v58 = vrot.slane %v806_v25, 1  ;;  %v693_v25 = vunpack.c.l.b16 %v2243_v22 }
  0xc2   : > { %871 = vrot.lane.b32.xlu0 %v857_v29, %s1881_s27  ;;  %827 = vrot.lane.b32.xlu1 %v815_v52, %s1879_s25  ;;  %v2222_v29 = vld [vmem:[#allocation2 + $0x2c] sm:$0x1]  ;;  %v809_v52 = vpack.c.b16 %v704_v28, %v801_v45  ;;  %v2251_v45 = vld [vmem:[#allocation2 + $0x34] sm:$0x1] }
  0xc3   : > { %v887_v56 = vunpack.c.l.b16 %v2222_v29 }
  0xc4   : > { %1047 = vrot.lane.b32.xlu2 %v1037_v6, %s1882_s28  ;;  %v805_v6 = vpack.c.b16 %v696_v24, %v797_v50  ;;  %v817_v62 = vrot.slane %v809_v52, 1  ;;  %v1683_v50 = vld [vmem:[#allocation2 + $0x18] sm:$0xe] }
  0xc5   : > { %v991_v8 = vpack.c.b16 %v887_v56, %v983_v57  ;;  %v886_v57 = vunpack.c.l.b16 %v2249_v43 }
  0xc7   : > { %v999_v33 = vrot.slane %v991_v8, 1 }
  0xca   : > { %1049 = vrot.lane.b32.xlu0 %v1038_v10, %s1882_s28  ;;  %1005 = vrot.lane.b32.xlu1 %v996_v19, %s1883_s29  ;;  %v1163_v10 = vunpack.c.l.b16 %v1682_v3  ;;  %v813_v19 = vrot.slane %v805_v6, 1  ;;  %v1167_v3 = vunpack.c.l.b16 %v1686_v31 }
  0xcc   : > { %821 = vrot.lane.b32.xlu2 %v812_v15, %s1879_s25  ;;  %v802_v15 = vunpack.c.l.b16 %v618_v60  ;;  %v1171_v63 = vpack.c.b16 %v1067_v0, %v1163_v10  ;;  %v820_v60 = vpop.permute.xlu1 %819  ;;  %v1071_v10 = vunpack.c.l.b16 %v2251_v45 }
  0xce   : > { %v810_v37 = vpack.c.b16 %v706_v21, %v802_v15  ;;  %v1179_v52 = vrot.slane %v1171_v63, 1  ;;  %v708_v15 = vpack.c.b16 %v694_v59, %v693_v25  ;;  %v1175_v63 = vpack.c.b16 %v1071_v10, %v1167_v3 }
  0xd0   : > { %v1183_v59 = vrot.slane %v1175_v63, 1 }
  0xd2   : > { %1003 = vrot.lane.b32.xlu0 %v995_v32, %s1883_s29  ;;  %1013 = vrot.lane.b32.xlu1 %v1000_v44, %s1883_s29  ;;  %v2245_v32 = vld [vmem:[#allocation2 + $0x28] sm:$0xf]  ;;  %v772_v44 = vpop.permute.xlu2 %771 }
  0xd3   : > { %v1206_v30 = vsel %vm1203_vm6, %v2036_v40, %v772_v44  ;;  %v701_v6 = vunpack.c.l.b16 %v2245_v32 }
  0xd4   : > { %829 = vrot.lane.b32.xlu2 %v816_v48, %s1879_s25  ;;  %v982_v48 = vunpack.c.l.b16 %v1661_v11  ;;  %v2264_v40 = vsel %vm1228_vm7, %v1206_v30, %v820_v60  ;;  %v2282_v30 = vld [vmem:[#allocation2 + $0x1c] sm:$0x1] }
  0xd5   : > { %v712_v31 = vpack.c.b16 %v702_v9, %v701_v6 }
  0xd6   : > { %v990_v8 = vpack.c.b16 %v886_v57, %v982_v48  ;;  %v1660_v48 = vld [vmem:[#allocation2 + $0x18] sm:$0xe] }
  0xd7   : > { %v753_v25 = vshll.u32 %v712_v31, 16  ;;  %v981_v9 = vunpack.c.l.b16 %v1660_v48  ;;  %v2294_v48 = vld [vmem:[#allocation2 + $0x10] sm:$0xf] }
  0xd8   : > { %v998_v44 = vrot.slane %v990_v8, 1  ;;  %v751_v8 = vshrl.u32 %v712_v31, 16 }
  0xd9   : > { %v755_v60 = vrot.slane %v753_v25, 1 }
  0xda   : > { %825 = vrot.lane.b32.xlu0 %v814_v58, %s1879_s25  ;;  %831 = vrot.lane.b32.xlu1 %v817_v62, %s1879_s25  ;;  %v2259_v58 = vld [vmem:[#allocation2 + $0x1c] sm:$0x1]  ;;  %v818_v62 = vrot.slane %v810_v37, 1 }
  0xdb   : > { %v1068_v11 = vunpack.c.l.b16 %v2259_v58  ;;  %v756_v46 = vor.u32 %v755_v60, %v751_v8 }
  0xdc   : > { %823 = vrot.lane.b32.xlu2 %v813_v19, %s1879_s25  ;;  %v1164_v19 = vunpack.c.l.b16 %v1683_v50  ;;  %v725_v50 = vshll.u32 %v708_v15, 16 }
  0xde   : > { %v1172_v37 = vpack.c.b16 %v1068_v11, %v1164_v19  ;;  %v727_v3 = vrot.slane %v725_v50, 1  ;;  %v892_v19 = vpack.c.b16 %v884_v1, %v2120_v17  ;;  %v2297_v50 = vld [vmem:[#allocation2 + $0x3c] sm:$0x1]  ;;  %v695_v17 = vunpack.c.l.b16 %v2294_v48 }
  0xe0   : > { %v1180_v7 = vrot.slane %v1172_v37, 1  ;;  %v709_v60 = vpack.c.b16 %v696_v24, %v695_v17  ;;  %v894_v24 = vpack.c.b16 %v886_v57, %v2139_v35 }
  0xe2   : > { %1011 = vrot.lane.b32.xlu0 %v999_v33, %s1883_s29  ;;  %1187 = vrot.lane.b32.xlu1 %v1179_v52, %s1884_s30  ;;  %v2276_v33 = vld [vmem:[#allocation2 + $0x20] sm:$0xf]  ;;  %v723_v52 = vshrl.u32 %v708_v15, 16  ;;  %v732_v29 = vshll.u32 %v709_v60, 16  ;;  %v923_v43 = vshll.u32 %v894_v24, 16 }
  0xe3   : > { %v699_v54 = vunpack.c.l.b16 %v2276_v33 }
  0xe4   : > { %833 = vrot.lane.b32.xlu2 %v818_v62, %s1879_s25  ;;  %v885_v62 = vunpack.c.l.b16 %v2282_v30  ;;  %v728_v37 = vor.u32 %v727_v3, %v723_v52  ;;  %v2309_v52 = vld [vmem:[#allocation2 + $0x18] sm:$0xf]  ;;  %v907_v3 = vshrl.u32 %v892_v19, 16 }
  0xe5   : > { %v711_v6 = vpack.c.b16 %v700_v49, %v699_v54  ;;  %v909_v49 = vshll.u32 %v892_v19, 16 }
  0xe6   : > { %v989_v63 = vpack.c.b16 %v885_v62, %v981_v9  ;;  %v895_v9 = vpack.c.b16 %v887_v56, %v2098_v55 }
  0xe7   : > { %v746_v15 = vshll.u32 %v711_v6, 16  ;;  %v744_v1 = vshrl.u32 %v711_v6, 16  ;;  %v911_v25 = vrot.slane %v909_v49, 1  ;;  %v734_v49 = vrot.slane %v732_v29, 1 }
  0xe8   : > { %v997_v54 = vrot.slane %v989_v63, 1  ;;  %v930_v63 = vshll.u32 %v895_v9, 16 }
  0xe9   : > { %v748_v31 = vrot.slane %v746_v15, 1  ;;  %v912_v8 = vor.u32 %v911_v25, %v907_v3  ;;  %v1079_v3 = vpack.c.b16 %v1071_v10, %v2148_v41 }
  0xea   : > { %1009 = vrot.lane.b32.xlu0 %v998_v44, %s1883_s29  ;;  %1195 = vrot.lane.b32.xlu1 %v1183_v59, %s1884_s30  ;;  %v1687_v44 = vld [vmem:[#allocation2 + $0x38] sm:$0xe]  ;;  %v891_v59 = vpack.c.b16 %v883_v14, %v2100_v5  ;;  %v697_v14 = vunpack.c.l.b16 %v2309_v52  ;;  %v932_v39 = vrot.slane %v930_v63, 1 }
  0xeb   : > { %v1168_v51 = vunpack.c.l.b16 %v1687_v44  ;;  %v749_v61 = vor.u32 %v748_v31, %v744_v1  ;;  %v2324_v44 = vld [vmem:[#allocation2 + $0x38] sm:$0xf]  ;;  %v730_v31 = vshrl.u32 %v709_v60, 16  ;;  %v1114_v63 = vshll.u32 %v1079_v3, 16 }
  0xec   : > { %1189 = vrot.lane.b32.xlu2 %v1180_v7, %s1884_s30  ;;  %v1072_v7 = vunpack.c.l.b16 %v2297_v50  ;;  %v902_v5 = vshll.u32 %v891_v59, 16  ;;  %v900_v56 = vshrl.u32 %v891_v59, 16  ;;  %v705_v17 = vunpack.c.l.b16 %v2324_v44 }
  0xed   : > { %v735_v35 = vor.u32 %v734_v49, %v730_v31  ;;  %v1112_v36 = vshrl.u32 %v1079_v3, 16  ;;  %v1665_v31 = vld [vmem:[#allocation2 + $0x40] sm:$0xe] }
  0xee   : > { %v1176_v6 = vpack.c.b16 %v1072_v7, %v1168_v51  ;;  %v904_v19 = vrot.slane %v902_v5, 1 }
  0xf0   : > { %v1184_v55 = vrot.slane %v1176_v6, 1  ;;  %v905_v51 = vor.u32 %v904_v19, %v900_v56  ;;  %v2343_v6 = vld [vmem:[#allocation2 + $0x44] sm:$0x1]  ;;  %v1076_v56 = vpack.c.b16 %v1068_v11, %v2107_v18 }
  0xf2   : > { %773 = vrot.lane.b32.xlu0 %v728_v37, %s1880_s26  ;;  %781 = vrot.lane.b32.xlu1 %v756_v46, %s1880_s26  ;;  %v710_v37 = vpack.c.b16 %v698_v47, %v697_v14  ;;  %v928_v46 = vshrl.u32 %v895_v9, 16  ;;  %v2331_v47 = vld [vmem:[#allocation2 + $0x30] sm:$0xf]  ;;  %v925_v9 = vrot.slane %v923_v43, 1 }
  0xf3   : > { %v703_v59 = vunpack.c.l.b16 %v2331_v47 }
  0xf4   : > { %1007 = vrot.lane.b32.xlu2 %v997_v54, %s1883_s29  ;;  %v896_v54 = vpack.c.b16 %v888_v20, %v2118_v16  ;;  %v739_v34 = vshll.u32 %v710_v37, 16  ;;  %v933_v1 = vor.u32 %v932_v39, %v928_v46  ;;  %v737_v25 = vshrl.u32 %v710_v37, 16 }
  0xf5   : > { %v714_v16 = vpack.c.b16 %v706_v21, %v705_v17  ;;  %v921_v20 = vshrl.u32 %v894_v24, 16  ;;  %v713_v14 = vpack.c.b16 %v704_v28, %v703_v59  ;;  %v1116_v28 = vrot.slane %v1114_v63, 1  ;;  %v2382_v59 = vld [vmem:[#allocation2 + $0x24] sm:$0x1] }
  0xf6   : > { %v937_v57 = vshll.u32 %v896_v54, 16  ;;  %v741_v12 = vrot.slane %v739_v34, 1  ;;  %v1075_v46 = vpack.c.b16 %v1067_v0, %v2132_v26  ;;  %v893_v17 = vpack.c.b16 %v885_v62, %v2130_v23 }
  0xf7   : > { %v767_v13 = vshll.u32 %v714_v16, 16  ;;  %v926_v21 = vor.u32 %v925_v9, %v921_v20  ;;  %v760_v45 = vshll.u32 %v713_v14, 16  ;;  %v765_v10 = vshrl.u32 %v714_v16, 16 }
  0xf8   : > { %v939_v5 = vrot.slane %v937_v57, 1  ;;  %v758_v39 = vshrl.u32 %v713_v14, 16  ;;  %v1086_v58 = vshll.u32 %v1075_v46, 16  ;;  %v1080_v57 = vpack.c.b16 %v1072_v7, %v2150_v42 }
  0xf9   : > { %v769_v29 = vrot.slane %v767_v13, 1  ;;  %v762_v24 = vrot.slane %v760_v45, 1  ;;  %v916_v62 = vshll.u32 %v893_v17, 16  ;;  %v1084_v16 = vshrl.u32 %v1075_v46, 16 }
  0xfa   : > { %779 = vrot.lane.b32.xlu0 %v749_v61, %s1880_s26  ;;  %957 = vrot.lane.b32.xlu1 %v912_v8, %s1885_s6  ;;  %v935_v61 = vshrl.u32 %v896_v54, 16  ;;  %v742_v8 = vor.u32 %v741_v12, %v737_v25  ;;  %v1093_v54 = vshll.u32 %v1076_v56, 16  ;;  %v986_v20 = vunpack.c.l.b16 %v1665_v31 }
  0xfb   : > { %v770_v49 = vor.u32 %v769_v29, %v765_v10  ;;  %v763_v18 = vor.u32 %v762_v24, %v758_v39  ;;  %v1121_v42 = vshll.u32 %v1080_v57, 16  ;;  %v1069_v7 = vunpack.c.l.b16 %v2382_v59 }
  0xfc   : > { %1197 = vrot.lane.b32.xlu2 %v1184_v55, %s1884_s30  ;;  %v890_v55 = vunpack.c.l.b16 %v2343_v6  ;;  %v940_v41 = vor.u32 %v939_v5, %v935_v61  ;;  %v1095_v11 = vrot.slane %v1093_v54, 1  ;;  %v1119_v14 = vshrl.u32 %v1080_v57, 16 }
  0xfd   : > { %v1077_v13 = vpack.c.b16 %v1069_v7, %v2172_v4  ;;  %v1664_v4 = vld [vmem:[#allocation2 + $0x38] sm:$0xe] }
  0xfe   : > { %v2326_v15 = vpop.permute.xlu2 %859  ;;  %v898_v19 = vpack.c.b16 %v890_v55, %v2145_v38  ;;  %v1091_v38 = vshrl.u32 %v1076_v56, 16  ;;  %v994_v61 = vpack.c.b16 %v890_v55, %v986_v20  ;;  %v1672_v55 = vld [vmem:[#allocation2 + $0x40] sm:$0xf] }
  0xff   : > { %v2380_v23 = vsel %vm1245_vm8, %v2264_v40, %v2326_v15  ;;  %v914_v40 = vshrl.u32 %v893_v17, 16  ;;  %v918_v15 = vrot.slane %v916_v62, 1  ;;  %v1100_v45 = vshll.u32 %v1077_v13, 16  ;;  %v1688_v62 = vld [vmem:[#allocation2 + $0x40] sm:$0xe] }
 0x100   : > { %v951_v34 = vshll.u32 %v898_v19, 16  ;;  %v949_v53 = vshrl.u32 %v898_v19, 16  ;;  %v1096_v30 = vor.u32 %v1095_v11, %v1091_v38  ;;  %v1685_v19 = vld [vmem:[#allocation2 + $0x28] sm:$0xe]  ;;  %v1033_v24 = vunpack.c.l.b16 %v1672_v55 }
 0x101   : > { %v1098_v46 = vshrl.u32 %v1077_v13, 16  ;;  %v1166_v38 = vunpack.c.l.b16 %v1685_v19  ;;  %v1673_v11 = vld [vmem:[#allocation2 + $0x48] sm:$0xf]  ;;  %v1684_v13 = vld [vmem:[#allocation2 + $0x20] sm:$0xe] }
 0x102   : > { %955 = vrot.lane.b32.xlu0 %v905_v51, %s1885_s6  ;;  %963 = vrot.lane.b32.xlu1 %v933_v1, %s1885_s6  ;;  %v1117_v51 = vor.u32 %v1116_v28, %v1112_v36  ;;  %v953_v0 = vrot.slane %v951_v34, 1  ;;  %v2370_v1 = vld [vmem:[#allocation2 + $0x3c] sm:$0x1]  ;;  %v1677_v28 = vld [vmem:[#allocation2 + $0x2c] sm:$0x1]  ;;  %v985_v34 = vunpack.c.l.b16 %v1664_v4 }
 0x103   : > { %v889_v25 = vunpack.c.l.b16 %v2370_v1 }
 0x104   : > { %775 = vrot.lane.b32.xlu2 %v735_v35, %s1880_s26  ;;  %v1088_v35 = vrot.slane %v1086_v58, 1  ;;  %v954_v12 = vor.u32 %v953_v0, %v949_v53  ;;  %v1041_v58 = vpack.c.b16 %v1033_v24, %v1033_v24 }
 0x105   : > { %v897_v3 = vpack.c.b16 %v889_v25, %v2166_v27  ;;  %v993_v1 = vpack.c.b16 %v889_v25, %v985_v34  ;;  %v1681_v25 = vld [vmem:[#allocation2 + $0x4c] sm:$0x1]  ;;  %v1689_v34 = vld [vmem:[#allocation2 + $0x48] sm:$0xe] }
 0x106   : > { %v2345_v60 = vpop.permute.xlu2 %869  ;;  %v1089_v50 = vor.u32 %v1088_v35, %v1084_v16 }
 0x107   : > { %v944_v63 = vshll.u32 %v897_v3, 16  ;;  %v942_v29 = vshrl.u32 %v897_v3, 16  ;;  %v1001_v20 = vrot.slane %v993_v1, 1 }
 0x109   : > { %v946_v56 = vrot.slane %v944_v63, 1  ;;  %v1074_v63 = vunpack.c.l.b16 %v1681_v25  ;;  %v1351_v25 = vld [vmem:[%s2593_s1 + $0x10] sm:$0x3] }
 0x10a   : > { %777 = vrot.lane.b32.xlu0 %v742_v8, %s1880_s26  ;;  %961 = vrot.lane.b32.xlu1 %v926_v21, %s1885_s6  ;;  %v1123_v8 = vrot.slane %v1121_v42, 1  ;;  %v919_v21 = vor.u32 %v918_v15, %v914_v40  ;;  %v1169_v15 = vunpack.c.l.b16 %v1688_v62 }
 0x10b   : > { %v947_v54 = vor.u32 %v946_v56, %v942_v29  ;;  %v1165_v29 = vunpack.c.l.b16 %v1684_v13 }
 0x10c   : > { %965 = vrot.lane.b32.xlu2 %v940_v41, %s1885_s6  ;;  %v1002_v41 = vrot.slane %v994_v61, 1  ;;  %v1124_v27 = vor.u32 %v1123_v8, %v1119_v14 }
 0x10e   : > { %v2357_v37 = vpop.permute.xlu2 %865 }
 0x112   : > { %785 = vrot.lane.b32.xlu0 %v770_v49, %s1880_s26  ;;  %1147 = vrot.lane.b32.xlu1 %v1117_v51, %s1886_s7  ;;  %v1102_v49 = vrot.slane %v1100_v45, 1  ;;  %v1070_v51 = vunpack.c.l.b16 %v1677_v28 }
 0x114   : > { %783 = vrot.lane.b32.xlu2 %v763_v18, %s1880_s26  ;;  %v2368_v26 = vpop.permute.xlu1 %867  ;;  %v1680_v18 = vld [vmem:[#allocation2 + $0x44] sm:$0x1]  ;;  %v1103_v17 = vor.u32 %v1102_v49, %v1098_v46  ;;  %v1078_v31 = vpack.c.b16 %v1070_v51, %v2181_v2  ;;  %v1174_v57 = vpack.c.b16 %v1070_v51, %v1166_v38  ;;  %v1170_v38 = vunpack.c.l.b16 %v1689_v34 }
 0x115   : > { %v1073_v53 = vunpack.c.l.b16 %v1680_v18 }
 0x116   : > { %v2372_v43 = vpop.permute.xlu2 %1051  ;;  %v1182_v42 = vrot.slane %v1174_v57, 1 }
 0x117   : > { %v1081_v16 = vpack.c.b16 %v1073_v53, %v1033_v24  ;;  %v1177_v8 = vpack.c.b16 %v1073_v53, %v1169_v15  ;;  %v1173_v24 = vpack.c.b16 %v1069_v7, %v1165_v29  ;;  %v1707_v29 = vld [vmem:[%s2593_s1 + $0x8] sm:$0xff] }
 0x119   : > { %v1128_v2 = vshll.u32 %v1081_v16, 16  ;;  %v1185_v56 = vrot.slane %v1177_v8, 1  ;;  %v1181_v51 = vrot.slane %v1173_v24, 1 }
 0x11a   : > { %1141 = vrot.lane.b32.xlu0 %v1096_v30, %s1886_s7  ;;  %969 = vrot.lane.b32.xlu1 %v954_v12, %s1885_s6  ;;  %v1034_v30 = vunpack.c.l.b16 %v1673_v11 }
 0x11b   : > { %v1130_v45 = vrot.slane %v1128_v2, 1 }
 0x11c   : > { %v2388_v9 = vpop.permute.xlu0 %861  ;;  %1139 = vrot.lane.b32.xlu2 %v1089_v50, %s1886_s7  ;;  %v2392_v6 = vpop.permute.xlu1 %1045  ;;  %v1107_v50 = vshll.u32 %v1078_v31, 16  ;;  %v1042_v40 = vpack.c.b16 %v1034_v30, %v1034_v30  ;;  %v1082_v28 = vpack.c.b16 %v1074_v63, %v1034_v30 }
 0x11e   : > { %v2394_v5 = vpop.permute.xlu2 %1047  ;;  %v1109_v61 = vrot.slane %v1107_v50, 1  ;;  %v1135_v49 = vshll.u32 %v1082_v28, 16  ;;  %v1133_v18 = vshrl.u32 %v1082_v28, 16  ;;  %v1706_v28 = vld [vmem:[%s2593_s1] sm:$0xff] }
 0x122   : > { %959 = vrot.lane.b32.xlu0 %v919_v21, %s1885_s6  ;;  %1017 = vrot.lane.b32.xlu1 %v1002_v41, %s1883_s29  ;;  %v1105_v21 = vshrl.u32 %v1078_v31, 16 }
 0x124   : > { %v2401_v10 = vpop.permute.xlu0 %1043  ;;  %1149 = vrot.lane.b32.xlu2 %v1124_v27, %s1886_s7  ;;  %v2404_v36 = vpop.permute.xlu1 %863  ;;  %v1126_v27 = vshrl.u32 %v1081_v16, 16  ;;  %v1110_v55 = vor.u32 %v1109_v61, %v1105_v21  ;;  %v1381_v61 = vunpack.c.l.b16 %v1351_v25 }
 0x126   : > { %v2406_v39 = vpop.permute.xlu2 %821  ;;  %v1131_v4 = vor.u32 %v1130_v45, %v1126_v27  ;;  %v1384_v21 = vpack.c.b16 %v1381_v61, %v1381_v61 }
 0x128   : > { %v1402_v45 = vsel %vm1400_vm9, %v1384_v21, 0 }
 0x129   : > { %1771 = vmatpush.bf16.msra.mxu2 %v1402_v45  ;;  %1409 = vmatpush.bf16.msra.mxu0 %v1402_v45 }
 0x12a   : > { %967 = vrot.lane.b32.xlu0 %v947_v54, %s1885_s6  ;;  %1055 = vrot.lane.b32.xlu1 %v1041_v58, %s1882_s28  ;;  %v1137_v58 = vrot.slane %v1135_v49, 1 }
 0x12b   : > { %1770 = vmatpush.bf16.msra.mxu1 %v1402_v45  ;;  %1772 = vmatpush.bf16.msra.mxu3 %v1402_v45 }
 0x12c   : > { %v2410_v0 = vpop.permute.xlu0 %1053  ;;  %1143 = vrot.lane.b32.xlu2 %v1103_v17, %s1886_s7  ;;  %v2414_v35 = vpop.permute.xlu1 %873  ;;  %v1178_v17 = vpack.c.b16 %v1074_v63, %v1170_v38  ;;  %v1138_v1 = vor.u32 %v1137_v58, %v1133_v18 }
 0x12d   : > { %1774 = vmatpush.bf16.msra.mxu2 %v1707_v29  ;;  %1410 = vmatpush.bf16.msra.mxu0 %v1707_v29 }
 0x12e   : > { %v2416_v12 = vpop.permute.xlu2 %829  ;;  %v1186_v59 = vrot.slane %v1178_v17, 1 }
 0x12f   : > { %1773 = vmatpush.bf16.msra.mxu1 %v1707_v29  ;;  %1775 = vmatpush.bf16.msra.mxu3 %v1707_v29 }
 0x131   : > { %1777 = vmatpush.bf16.msra.mxu2 %v1706_v28  ;;  %1411 = vmatpush.bf16.msra.mxu0 %v1706_v28 }
 0x132   : > { %1015 = vrot.lane.b32.xlu0 %v1001_v20, %s1883_s29  ;;  %1193 = vrot.lane.b32.xlu1 %v1182_v42, %s1884_s30 }
 0x133   : > { %1776 = vmatpush.bf16.msra.mxu1 %v1706_v28  ;;  %1778 = vmatpush.bf16.msra.mxu3 %v1706_v28 }
 0x134   : > { %v2420_v3 = vpop.permute.xlu0 %871  ;;  %1057 = vrot.lane.b32.xlu2 %v1042_v40, %s1882_s28  ;;  %v2423_v14 = vpop.permute.xlu1 %827 }
 0x136   : > { %v824_v41 = vpop.permute.xlu2 %823 }
 0x13a   : > { %1145 = vrot.lane.b32.xlu0 %v1110_v55, %s1886_s7  ;;  %1199 = vrot.lane.b32.xlu1 %v1185_v56, %s1884_s30 }
 0x13c   : > { %v2427_v19 = vpop.permute.xlu0 %1049  ;;  %1151 = vrot.lane.b32.xlu2 %v1131_v4, %s1886_s7  ;;  %v1006_v46 = vpop.permute.xlu1 %1005 }
 0x13e   : > { %v2432_v54 = vpop.permute.xlu2 %833 }
 0x142   : > { %1191 = vrot.lane.b32.xlu0 %v1181_v51, %s1884_s30 }
 0x144   : > { %v2435_v11 = vpop.permute.xlu0 %1003  ;;  %v1014_v53 = vpop.permute.xlu1 %1013  ;;  %1201 = vrot.lane.b32.xlu2 %v1186_v59, %s1884_s30 }
 0x146   : > { %v2437_v7 = vpop.permute.xlu2 %1189 }
 0x14a   : > { %1153 = vrot.lane.b32.xlu0 %v1138_v1, %s1886_s7 }
 0x14c   : > { %v2441_v31 = vpop.permute.xlu0 %825  ;;  %v832_v57 = vpop.permute.xlu1 %831 }
 0x14e   : > { %v2443_v30 = vpop.permute.xlu2 %1007 }
 0x154   : > { %v2445_v62 = vpop.permute.xlu0 %1011  ;;  %v2447_v16 = vpop.permute.xlu1 %1187 }
 0x156   : > { %v2449_v20 = vpop.permute.xlu2 %1197 }
 0x15c   : > { %v2451_v50 = vpop.permute.xlu0 %1009  ;;  %v2453_v42 = vpop.permute.xlu1 %1195 }
 0x15e   : > { %v776_v40 = vpop.permute.xlu2 %775 }
 0x15f   : > { %v1212_v15 = vsel %vm1203_vm6, %v2294_v48, %v776_v40 }
 0x160   : > { %v2458_v2 = vsel %vm1228_vm7, %v1212_v15, %v824_v41 }
 0x164   : > { %v774_v8 = vpop.permute.xlu0 %773  ;;  %v782_v13 = vpop.permute.xlu1 %781 }
 0x165   : > { %v1221_v63 = vsel %vm1203_vm6, %v2245_v32, %v782_v13  ;;  %v1209_v41 = vsel %vm1203_vm6, %v2243_v22, %v774_v8 }
 0x166   : > { %v1240_v27 = vsel %vm1228_vm7, %v1221_v63, %v2416_v12  ;;  %v966_v48 = vpop.permute.xlu2 %965  ;;  %v1232_v22 = vsel %vm1228_vm7, %v1209_v41, %v2406_v39 }
 0x167   : > { %v1257_v55 = vsel %vm1245_vm8, %v1240_v27, %v2345_v60  ;;  %v1249_v24 = vsel %vm1245_vm8, %v1232_v22, %v2388_v9 }
 0x168   : > { %v1274_v32 = vsel %vm1262_vm10, %v1257_v55, %v966_v48 }
 0x169   : > { %v1291_v12 = vsel %vm1279_vm11, %v1274_v32, %v1014_v53 }
 0x16a   : > { %v1308_v56 = vsel %vm1296_vm12, %v1291_v12, %v2410_v0 }
 0x16c   : > { %v780_v60 = vpop.permute.xlu0 %779  ;;  %v958_v4 = vpop.permute.xlu1 %957 }
 0x16d   : > { %v1266_v49 = vsel %vm1262_vm10, %v1249_v24, %v958_v4  ;;  %v1218_v17 = vsel %vm1203_vm6, %v2276_v33, %v780_v60 }
 0x16e   : > { %v1283_v39 = vsel %vm1279_vm11, %v1266_v49, %v1006_v46  ;;  %v784_v51 = vpop.permute.xlu2 %783 }
 0x16f   : > { %v1224_v0 = vsel %vm1203_vm6, %v2331_v47, %v784_v51  ;;  %v1238_v47 = vsel %vm1228_vm7, %v1218_v17, %v2423_v14 }
 0x170   : > { %v2490_v34 = vsel %vm1228_vm7, %v1224_v0, %v832_v57  ;;  %v1255_v59 = vsel %vm1245_vm8, %v1238_v47, %v2368_v26 }
 0x171   : > { %v1259_v0 = vsel %vm1245_vm8, %v2490_v34, %v2420_v3 }
 0x174   : > { %v956_v18 = vpop.permute.xlu0 %955  ;;  %v964_v58 = vpop.permute.xlu1 %963 }
 0x175   : > { %v1264_v9 = vsel %vm1262_vm10, %v2380_v23, %v956_v18  ;;  %v1272_v57 = vsel %vm1262_vm10, %v1255_v59, %v964_v58 }
 0x176   : > { %v1281_v38 = vsel %vm1279_vm11, %v1264_v9, %v2435_v11  ;;  %v1140_v46 = vpop.permute.xlu2 %1139  ;;  %v1289_v23 = vsel %vm1279_vm11, %v1272_v57, %v2445_v62 }
 0x177   : > { %v1306_v25 = vsel %vm1296_vm12, %v1289_v23, %v2372_v43  ;;  %v1298_v26 = vsel %vm1296_vm12, %v1281_v38, %v2401_v10 }
 0x178   : > { %v1315_v63 = vsel %vm1313_vm13, %v1298_v26, %v1140_v46 }
 0x17c   : > { %v778_v53 = vpop.permute.xlu0 %777  ;;  %v962_v1 = vpop.permute.xlu1 %961 }
 0x17d   : > { %v1215_v61 = vsel %vm1203_vm6, %v2309_v52, %v778_v53  ;;  %v1300_v52 = vsel %vm1296_vm12, %v1283_v39, %v2392_v6  ;;  %v1251_v6 = vsel %vm1245_vm8, %v2458_v2, %v2404_v36 }
 0x17e   : > { %v1150_v40 = vpop.permute.xlu2 %1149 }
 0x17f   : > { %v1325_v11 = vsel %vm1313_vm13, %v1308_v56, %v1150_v40 }
 0x180   : > { %v1342_v33 = vsel %vm1330_vm14, %v1325_v11, %v2449_v20  ;;  %v1236_v20 = vsel %vm1228_vm7, %v1215_v61, %v2441_v31 }
 0x181   : > { %v1365_v13 = vunpack.c.l.b16 %v1342_v33  ;;  %v1253_v10 = vsel %vm1245_vm8, %v1236_v20, %v2357_v37 }
 0x182   : > { %v1270_v55 = vsel %vm1262_vm10, %v1253_v10, %v962_v1 }
 0x183   : > { %v1287_v37 = vsel %vm1279_vm11, %v1270_v55, %v2451_v50 }
 0x184   : > { %v786_v15 = vpop.permute.xlu0 %785  ;;  %v1148_v14 = vpop.permute.xlu1 %1147  ;;  %v1304_v39 = vsel %vm1296_vm12, %v1287_v37, %v2427_v19 }
 0x185   : > { %v1323_v8 = vsel %vm1313_vm13, %v1306_v25, %v1148_v14  ;;  %v1227_v36 = vsel %vm1203_vm6, %v2324_v44, %v786_v15 }
 0x186   : > { %v1340_v62 = vsel %vm1330_vm14, %v1323_v8, %v2453_v42  ;;  %v1332_v42 = vsel %vm1330_vm14, %v1315_v63, %v2447_v16  ;;  %v1144_v60 = vpop.permute.xlu2 %1143  ;;  %v1244_v58 = vsel %vm1228_vm7, %v1227_v36, %v2432_v54 }
 0x187   : > { %v1364_v21 = vunpack.c.l.b16 %v1340_v62  ;;  %v1360_v45 = vunpack.c.l.b16 %v1332_v42  ;;  %v1261_v47 = vsel %vm1245_vm8, %v1244_v58, %v2414_v35 }
 0x189   : > { %v1370_v43 = vpack.c.b16 %v1365_v13, %v1364_v21 }
 0x18b   : > { %1700 = vmatmul.msk.bf16.vlgmr.msra.gmra.mxu2 %vm1387_vm15, %v1370_v43 }
 0x18c   : > { %v1142_v27 = vpop.permute.xlu0 %1141  ;;  %v970_v29 = vpop.permute.xlu1 %969 }
 0x18d   : > { %v1317_v48 = vsel %vm1313_vm13, %v1300_v52, %v1142_v27  ;;  %v1278_v3 = vsel %vm1262_vm10, %v1261_v47, %v970_v29 }
 0x18e   : > { %v1334_v31 = vsel %vm1330_vm14, %v1317_v48, %v2437_v7  ;;  %v1058_v50 = vpop.permute.xlu2 %1057 }
 0x18f   : > { %v1361_v41 = vunpack.c.l.b16 %v1334_v31 }
 0x191   : > { %v1368_v32 = vpack.c.b16 %v1361_v41, %v1360_v45 }
 0x193   : > { %1698 = vmatmul.msk.bf16.vlgmr.msra.gmra.mxu0 %vm1387_vm15, %v1368_v32 }
 0x194   : > { %v960_v16 = vpop.permute.xlu0 %959  ;;  %v1018_v22 = vpop.permute.xlu1 %1017 }
 0x195   : > { %v1268_v12 = vsel %vm1262_vm10, %v1251_v6, %v960_v16  ;;  %v1295_v54 = vsel %vm1279_vm11, %v1278_v3, %v1018_v22 }
 0x196   : > { %v1285_v7 = vsel %vm1279_vm11, %v1268_v12, %v2443_v30  ;;  %v1152_v30 = vpop.permute.xlu2 %1151  ;;  %v1312_v23 = vsel %vm1296_vm12, %v1295_v54, %v1058_v50 }
 0x197   : > { %v1302_v2 = vsel %vm1296_vm12, %v1285_v7, %v2394_v5 }
 0x198   : > { %v1319_v9 = vsel %vm1313_vm13, %v1302_v2, %v1144_v60 }
 0x19c   : > { %v968_v56 = vpop.permute.xlu0 %967  ;;  %v1056_v4 = vpop.permute.xlu1 %1055 }
 0x19d   : > { %v1276_v19 = vsel %vm1262_vm10, %v1259_v0, %v968_v56 }
 0x19e   : > { %v1202_v57 = vpop.permute.xlu2 %1201 }
 0x1a4   : > { %v1016_v28 = vpop.permute.xlu0 %1015  ;;  %v1194_v49 = vpop.permute.xlu1 %1193 }
 0x1a5   : > { %v1293_v44 = vsel %vm1279_vm11, %v1276_v19, %v1016_v28 }
 0x1a6   : > { %v1310_v34 = vsel %vm1296_vm12, %v1293_v44, %v1056_v4  ;;  %v1489_v44 = vlaneseq }
 0x1a7   : > { %v1327_v59 = vsel %vm1313_vm13, %v1310_v34, %v1152_v30 }
 0x1a8   : > { %vm1491_vm1 = vcmp.lt.s32.totalorder %v1489_v44, 256 }
 0x1ac   : > { %v1146_v24 = vpop.permute.xlu0 %1145  ;;  %v1200_v1 = vpop.permute.xlu1 %1199 }
 0x1ad   : > { %v1321_v51 = vsel %vm1313_vm13, %v1304_v39, %v1146_v24  ;;  %v1344_v40 = vsel %vm1330_vm14, %v1327_v59, %v1200_v1 }
 0x1ae   : > { %v1338_v18 = vsel %vm1330_vm14, %v1321_v51, %v1194_v49  ;;  %v1366_v33 = vunpack.c.l.b16 %v1344_v40 }
 0x1af   : > { %v1363_v5 = vunpack.c.l.b16 %v1338_v18 }
 0x1b4   : > { %v1192_v38 = vpop.permute.xlu0 %1191 }
 0x1b5   : > { %v1336_v46 = vsel %vm1330_vm14, %v1319_v9, %v1192_v38 }
 0x1b6   : > { %v1362_v17 = vunpack.c.l.b16 %v1336_v46 }
 0x1b8   : > { %v1369_v53 = vpack.c.b16 %v1363_v5, %v1362_v17 }
 0x1ba   : > { %1699 = vmatmul.msk.bf16.vlgmr.msra.gmra.mxu1 %vm1387_vm15, %v1369_v53 }
 0x1bc   : > { %v1154_v11 = vpop.permute.xlu0 %1153 }
 0x1bd   : > { %v1329_v35 = vsel %vm1313_vm13, %v1312_v23, %v1154_v11 }
 0x1be   : > { %v1346_v15 = vsel %vm1330_vm14, %v1329_v35, %v1202_v57 }
 0x1bf   : > { %v1367_v14 = vunpack.c.l.b16 %v1346_v15 }
 0x1c1   : > { %v1371_v25 = vpack.c.b16 %v1367_v14, %v1366_v33 }
 0x1c3   : > { %1701 = vmatmul.msk.bf16.vlgmr.msra.gmra.mxu3 %vm1387_vm15, %v1371_v25 }
 0x20e   : > { %v1423_v26 = vpop.f32.mrf.mxu2 }
 0x20f   : > { %v1466_v29 = vmul.f32 %v1423_v26, %v1423_v26 }
 0x210   : > { %v1413_v61 = vpop.f32.mrf.mxu0 }
 0x211   : > { %v1462_v43 = vmul.f32 %v1413_v61, %v1413_v61 }
 0x216   : > { %v1425_v8 = vpop.f32.mrf.mxu2 }
 0x217   : > { %v1753_v62 = vpack.c.bf16 %v1425_v8, %v1423_v26  ;;  %v1467_v12 = vmul.f32 %v1425_v8, %v1425_v8 }
 0x218   : > { %v1415_v13 = vpop.f32.mrf.mxu0 }
 0x219   : > { %v1743_v21 = vpack.c.bf16 %v1415_v13, %v1413_v61  ;;  %1768 = vst [vmem:[%s2573_s17 + $0x10] sm:$0xff] %v1753_v62   ;;  %v1463_v63 = vmul.f32 %v1415_v13, %v1415_v13  ;;  %v1449_v10 = vadd.f32 %v1415_v13, %v1413_v61 }
 0x21b   : > { %1744 = vst [vmem:[%s2573_s17] sm:$0xff] %v1743_v21   ;;  %v1470_v27 = vadd.f32 %v1463_v63, %v1462_v43 }
 0x237   : > { %v1418_v20 = vpop.f32.mrf.mxu1 }
 0x238   : > { %v1464_v52 = vmul.f32 %v1418_v20, %v1418_v20  ;;  %v1450_v42 = vadd.f32 %v1449_v10, %v1418_v20 }
 0x23a   : > { %v1471_v45 = vadd.f32 %v1470_v27, %v1464_v52 }
 0x23f   : > { %v1420_v48 = vpop.f32.mrf.mxu1 }
 0x240   : > { %v1748_v31 = vpack.c.bf16 %v1420_v48, %v1418_v20  ;;  %v1465_v41 = vmul.f32 %v1420_v48, %v1420_v48  ;;  %v1451_v55 = vadd.f32 %v1450_v42, %v1420_v48 }
 0x242   : > { %1767 = vst [vmem:[%s2573_s17 + $0x8] sm:$0xff] %v1748_v31   ;;  %v1472_v37 = vadd.f32 %v1471_v45, %v1465_v41  ;;  %v1452_v32 = vadd.f32 %v1451_v55, %v1423_v26 }
 0x244   : > { %v1473_v16 = vadd.f32 %v1472_v37, %v1466_v29  ;;  %v1453_v7 = vadd.f32 %v1452_v32, %v1425_v8 }
 0x246   : > { %v1428_v6 = vpop.f32.mrf.mxu3  ;;  %v1474_v56 = vadd.f32 %v1473_v16, %v1467_v12 }
 0x247   : > { %v1468_v22 = vmul.f32 %v1428_v6, %v1428_v6  ;;  %v1454_v60 = vadd.f32 %v1453_v7, %v1428_v6 }
 0x249   : > { %v1475_v4 = vadd.f32 %v1474_v56, %v1468_v22 }
 0x24e   : > { %v1430_v28 = vpop.f32.mrf.mxu3 }
 0x24f   : > { %v1758_v50 = vpack.c.bf16 %v1430_v28, %v1428_v6  ;;  %v1455_v24 = vadd.f32 %v1454_v60, %v1430_v28  ;;  %v1469_v49 = vmul.f32 %v1430_v28, %v1430_v28 }
 0x251   : > { %1769 = vst [vmem:[%s2573_s17 + $0x18] sm:$0xff] %v1758_v50   ;;  %v1456_v39 = vrot.slane %v1455_v24, 4  ;;  %v1476_v51 = vadd.f32 %v1475_v4, %v1469_v49 }
 0x253   : > { %v1457_v36 = vadd.f32 %v1456_v39, %v1455_v24  ;;  %v1477_v2 = vrot.slane %v1476_v51, 4 }
 0x255   : > { %v1458_v30 = vrot.slane %v1457_v36, 2  ;;  %v1478_v0 = vadd.f32 %v1477_v2, %v1476_v51 }
 0x257   : > { %v1459_v18 = vadd.f32 %v1458_v30, %v1457_v36  ;;  %v1479_v58 = vrot.slane %v1478_v0, 2 }
 0x259   : > { %v1480_v19 = vadd.f32 %v1479_v58, %v1478_v0  ;;  %v1460_v9 = vrot.slane %v1459_v18, 1 }
 0x25b   : > { %v1481_v38 = vrot.slane %v1480_v19, 1  ;;  %v1461_v5 = vadd.f32 %v1460_v9, %v1459_v18 }
 0x25d   : > { %v1482_v46 = vadd.f32 %v1481_v38, %v1480_v19 }
 0x25f   : > { %v1485_v17 = vrot.slane %v1482_v46, 7 }
 0x261   : > { %v1487_v47 = vsel %vm1486_vm0, %v1461_v5, %v1485_v17 }
 0x262   : > { %1493 = vst.msk [vmem:[%s268_s23] sm:$0x3] %vm1491_vm1, %v1487_v47 }
 0x263 PF: > { %s16_s20 = sadd.s32 1, %s1875_s20   ;;  %s2602_s18 = smov %s1871_s19 }
 0x264   : > { %p13_p5 = scmp.ge.s32.totalorder %s16_s20, 4   ;;  %s2603_s19 = smov %s2605_s2 }
 0x266   :  { %15 = sbr.rel (!%p13_p5) target bundleno = 2 (0x2), region = 86 }

// kernel: down_forward.4
= control target key start
LH: loop header
LB: loop body
LE: loop exit
PB: predicated region body
PF: predicated region fallthrough
CT: control target
= control target key end

     0   :  { %11 = vsyncpa [#allocation4], 0  ;;  %s2752_s18 = smov 0   ;;  %s2754_s19 = smov 0   ;;  %s3230_s0 = inlined_call_operand.vmem [shape: bf16[2,8,8,128], index: 0, kind: input, shape index: {}]   ;;  %s3231_s1 = inlined_call_operand.hbm [shape: bf16[1152,128], index: 1, kind: input, shape index: {}]   ;;  %s3232_s2 = inlined_call_operand.vmem [shape: f32[1,128], index: 2, kind: input, shape index: {}]   ;;  %s3233_s3 = inlined_call_operand.vmem [shape: f32[1,128], index: 3, kind: input, shape index: {}]   ;;  %s3234_s4 = inlined_call_operand.vmem [shape: bf16[2,8,8,128], index: 4, kind: output, shape index: {0}]   ;;  %s3235_s5 = inlined_call_operand.vmem [shape: f32[2,1,1,256], index: 5, kind: output, shape index: {1}]  }
   0x1   :  { %s2756_s20 = smov 0  }
   0x2 LB: > { %s2138_s21 = sadd.s32 4294967295, %s2716_s20   ;;  %s29_s22 = sadd.s32 1, %s2712_s19  ;;  %s2716_s20 = sphi %s2756_s20, %s17_s20   ;;  %s2712_s19 = sphi %s2754_s19, %s3241_s19   ;;  %s2708_s18 = sphi %s2752_s18, %s3240_s18  }
   0x3   : > { %p31_p0 = scmp.ge.s32.totalorder %s29_s22, 2  ;;  %p2140_p1 = scmp.ge.s32.totalorder %s2716_s20, 1 }
   0x4   : > { %p179_p2 = scmp.lt.s32.totalorder %s2716_s20, 3  ;;  %p2628_p4 = scmp.eq.s32.totalorder %s2138_s21, 0 }
   0x5   : > { %s3243_s22 = smov (%p31_p0, %s29_s22), 0  ;;  %s190_s25 = sshll.u32 %s3231_s1, 4  ;;  %s191_s25 = int_to_ptr.hbm [resolvable:$true] %s190_s25 }
   0x6   : > { %p180_p3 = pnand %p2140_p1, %p179_p2  ;;  %s2718_s26 = smov [#allocation3]  }
   0x7   : > { %s192_s27 = sshll.u32 %s2718_s26, 4  ;;  %s2719_s28 = smov 64   ;;  %s193_s27 = int_to_ptr.vmem [resolvable:$true] %s192_s27 }
   0x8   : > { %p2624_p5 = pneg %p180_p3  ;;  %s2720_s29 = smov 4  }
   0x9   : > { %222 = sbr.rel (%p180_p3) target bundleno = 359 (0x167), region = 36 }
   0xa   : > { %p2625_p6 = pnand %p2628_p4, %p2624_p5 }
   0xc   : > { %2627 = dma.hbm_to_vmem [thread:$0]  (!%p2625_p6), %s191_s25, 9216, %s193_s27, [#allocation4], %s2719_s28, %s2719_s28, %s2720_s29  }
   0xe   : > { %2703 = dma.done.wait (%p2628_p4), [#allocation4], 9216  }
   0xf   : > { %2705 = vsyncadd (%p2628_p4), [#allocation4], 4294958080  ;;  %p263_p7 = scmp.lt.s32.totalorder %s2708_s18, 1  ;;  %v2721_v0 = vmov 0   ;;  %v2497_v1 = vld [vmem:[#allocation3 + $0x38] sm:$0xff]  ;;  %v2496_v3 = vld [vmem:[#allocation3 + $0x30] sm:$0xff] }
  0x10   : > { %347 = vst [vmem:[#allocation2 + $0x20] sm:$0xf] %v2721_v0  ;;  %v2513_v2 = vld [vmem:[#allocation3 + $0xb8] sm:$0xff]  ;;  %2604 = vmatpush.bf16.msra.mxu1 %v2497_v1  ;;  %1666 = vmatpush.bf16.msra.mxu0 %v2497_v1  ;;  %v2512_v4 = vld [vmem:[#allocation3 + $0xb0] sm:$0xff]  ;;  %v2495_v6 = vld [vmem:[#allocation3 + $0x28] sm:$0xff]  ;;  %vm448_vm0 = vcmask 1043456  }
  0x11   : > { %s3245_s18 = smov (!%p263_p7, %s2708_s18), 1  ;;  %348 = vst [vmem:[#allocation2 + $0x24] sm:$0x1] %v2721_v0  ;;  %1724 = vmatpush.bf16.msra.mxu2 %v2513_v2  ;;  %v2521_v5 = vld [vmem:[#allocation3 + $0xf8] sm:$0xff]  ;;  %v2520_v7 = vld [vmem:[#allocation3 + $0xf0] sm:$0xff]  ;;  %v2511_v12 = vld [vmem:[#allocation3 + $0xa8] sm:$0xff] }
  0x12   : > { %349 = vst [vmem:[#allocation2 + $0x28] sm:$0xf] %v2721_v0  ;;  %s2488_s30 = sshll.u32 %s3245_s18, 5  ;;  %1753 = vmatpush.bf16.msra.mxu3 %v2521_v5  ;;  %v2801_v11 = vld [vmem:[%s3232_s2] ss:$0 sm:$0xff]  ;;  %v2519_v17 = vld [vmem:[#allocation3 + $0xe8] sm:$0xff] }
  0x13   : > { %350 = vst [vmem:[#allocation2 + $0x2c] sm:$0x1] %v2721_v0  ;;  %s2790_s8 = scalar_lea.vmem %s3230_s0, %s2488_s30  ;;  %v2806_v14 = vld [vmem:[%s3233_s3] ss:$0 sm:$0xff]  ;;  %v2494_v19 = vld [vmem:[#allocation3 + $0x20] sm:$0xff]  ;;  %v2493_v32 = vld [vmem:[#allocation3 + $0x18] sm:$0xff]  ;;  %s3199_s15 = scalar_lea.vmem %s3234_s4, %s2488_s30 }
  0x14   : > { %339 = vst [vmem:[#allocation2] sm:$0xf] %v2721_v0  ;;  %v2598_v8 = vld [vmem:[%s2790_s8 + $0x8] sm:$0xff]   ;;  %2605 = vmatpush.bf16.msra.mxu1 %v2496_v3  ;;  %1667 = vmatpush.bf16.msra.mxu0 %v2496_v3  ;;  %v2599_v10 = vld [vmem:[%s2790_s8 + $0x10] sm:$0xff]   ;;  %v2563_v21 = vld [vmem:[%s2790_s8] sm:$0xff]   ;;  %vm454_vm2 = vcmask 1040384  }
  0x15   : > { %340 = vst [vmem:[#allocation2 + $0x4] sm:$0x1] %v2721_v0  ;;  %v2569_v9 = vunpack.c.h.bf16 %v2598_v8  ;;  %1725 = vmatpush.bf16.msra.mxu2 %v2512_v4  ;;  %v2572_v13 = vunpack.c.l.bf16 %v2599_v10  ;;  %v2573_v15 = vunpack.c.h.bf16 %v2599_v10  ;;  %v2568_v22 = vunpack.c.l.bf16 %v2598_v8  ;;  %v2510_v23 = vld [vmem:[#allocation3 + $0xa0] sm:$0xff]  ;;  %v2822_v34 = vld [vmem:[%s2790_s8 + $0x18] sm:$0xff]   ;;  %v2509_v36 = vld [vmem:[#allocation3 + $0x98] sm:$0xff]  ;;  %s2149_s16 = sshll.u32 %s3245_s18, 1 }
  0x16   : > { %341 = vst [vmem:[#allocation2 + $0x8] sm:$0xf] %v2721_v0  ;;  %1754 = vmatpush.bf16.msra.mxu3 %v2520_v7  ;;  %v2564_v25 = vunpack.c.l.bf16 %v2563_v21  ;;  %v2565_v28 = vunpack.c.h.bf16 %v2563_v21  ;;  %v2518_v30 = vld [vmem:[#allocation3 + $0xe0] sm:$0xff]  ;;  %v2576_v39 = vunpack.c.l.bf16 %v2822_v34  ;;  %vm449_vm1 = vsmask.f32 7938  ;;  %v2517_v47 = vld [vmem:[#allocation3 + $0xd8] sm:$0xff]  ;;  %s285_s23 = scalar_lea.vmem %s3235_s5, %s2149_s16 }
  0x17   : > { %342 = vst [vmem:[#allocation2 + $0xc] sm:$0x1] %v2721_v0  ;;  %v314_v16 = vmul.f32 %v2801_v11, %v2569_v9  ;;  %v315_v18 = vmul.f32 %v2801_v11, %v2572_v13  ;;  %v316_v26 = vmul.f32 %v2801_v11, %v2573_v15  ;;  %v313_v35 = vmul.f32 %v2801_v11, %v2568_v22  ;;  %v2492_v48 = vld [vmem:[#allocation3 + $0x10] sm:$0xff]  ;;  %vm2834_vm4 = vmand %vm448_vm0, %vm449_vm1  ;;  %v2491_v8 = vld [vmem:[#allocation3 + $0x8] sm:$0xff] }
  0x18   : > { %343 = vst [vmem:[#allocation2 + $0x10] sm:$0xf] %v2721_v0  ;;  %2606 = vmatpush.bf16.msra.mxu1 %v2495_v6  ;;  %1668 = vmatpush.bf16.msra.mxu0 %v2495_v6  ;;  %v311_v31 = vmul.f32 %v2801_v11, %v2564_v25  ;;  %v312_v43 = vmul.f32 %v2801_v11, %v2565_v28  ;;  %v2508_v49 = vld [vmem:[#allocation3 + $0x90] sm:$0xff]  ;;  %vm455_vm3 = vsmask.f32 256  ;;  %v2490_v21 = vld [vmem:[#allocation3] sm:$0xff] }
  0x19   : > { %344 = vst [vmem:[#allocation2 + $0x14] sm:$0x1] %v2721_v0  ;;  %v326_v20 = vadd.f32 %v2806_v14, %v314_v16  ;;  %1726 = vmatpush.bf16.msra.mxu2 %v2511_v12  ;;  %v327_v24 = vadd.f32 %v2806_v14, %v315_v18  ;;  %v328_v40 = vadd.f32 %v2806_v14, %v316_v26  ;;  %v472_v54 = vld [vmem:[#allocation2 + $0x20] sm:$0xf]  ;;  %v475_v55 = vld [vmem:[#allocation2 + $0x24] sm:$0x1]  ;;  %vm2843_vm5 = vmand %vm454_vm2, %vm455_vm3 }
  0x1a   : > { %345 = vst [vmem:[#allocation2 + $0x18] sm:$0xf] %v2721_v0  ;;  %1755 = vmatpush.bf16.msra.mxu3 %v2519_v17  ;;  %v323_v38 = vadd.f32 %v2806_v14, %v311_v31  ;;  %v317_v51 = vmul.f32 %v2801_v11, %v2576_v39  ;;  %v325_v58 = vadd.f32 %v2806_v14, %v313_v35  ;;  %v478_v61 = vld [vmem:[#allocation2 + $0x28] sm:$0xf]  ;;  %v481_v62 = vld [vmem:[#allocation2 + $0x2c] sm:$0x1] }
  0x1b   : > { %346 = vst [vmem:[#allocation2 + $0x1c] sm:$0x1] %v2721_v0  ;;  %v334_v27 = vmax.f32 %v326_v20, 0.0  ;;  %v335_v29 = vmax.f32 %v327_v24, 0.0  ;;  %v336_v57 = vmax.f32 %v328_v40, 0.0  ;;  %v2516_v7 = vld [vmem:[#allocation3 + $0xd0] sm:$0xff] }
  0x1c   : > { %351 = vst [vmem:[#allocation2 + $0x30] sm:$0xf] %v2721_v0  ;;  %2607 = vmatpush.bf16.msra.mxu1 %v2494_v19  ;;  %1669 = vmatpush.bf16.msra.mxu0 %v2494_v19  ;;  %v331_v46 = vmax.f32 %v323_v38, 0.0  ;;  %v329_v63 = vadd.f32 %v2806_v14, %v317_v51  ;;  %v2847_v6 = vld [vmem:[#allocation2 + $0x4] sm:$0x1]  ;;  %v2507_v17 = vld [vmem:[#allocation3 + $0x88] sm:$0xff] }
  0x1d   : > { %352 = vst [vmem:[#allocation2 + $0x34] sm:$0x1] %v2721_v0  ;;  %v362_v33 = vpack.c.bf16 %v334_v27, %v334_v27  ;;  %1727 = vmatpush.bf16.msra.mxu2 %v2510_v23  ;;  %v363_v37 = vpack.c.bf16 %v335_v29, %v335_v29  ;;  %v451_v12 = vld [vmem:[#allocation2 + $0x8] sm:$0xf]  ;;  %v364_v20 = vpack.c.bf16 %v336_v57, %v336_v57  ;;  %v603_v22 = vunpack.c.l.b16 %v2847_v6  ;;  %v522_v23 = vld [vmem:[#allocation2] sm:$0xe] }
  0x1e   : > { %353 = vst [vmem:[#allocation2 + $0x38] sm:$0xf] %v2721_v0  ;;  %1756 = vmatpush.bf16.msra.mxu3 %v2518_v30  ;;  %v359_v56 = vpack.c.bf16 %v331_v46, %v331_v46  ;;  %v337_v13 = vmax.f32 %v329_v63, 0.0  ;;  %v457_v19 = vld [vmem:[#allocation2 + $0xc] sm:$0x1]  ;;  %v333_v26 = vmax.f32 %v325_v58, 0.0 }
  0x1f   : > { %354 = vst [vmem:[#allocation2 + $0x3c] sm:$0x1] %v2721_v0  ;;  %v392_v41 = vshrl.u32 %v362_v33, 16  ;;  %v395_v42 = vshll.u32 %v362_v33, 16  ;;  %v400_v44 = vshrl.u32 %v363_v37, 16  ;;  %v403_v45 = vshll.u32 %v363_v37, 16 }
  0x20   : > { %355 = vst [vmem:[#allocation2 + $0x40] sm:$0xf] %v2721_v0  ;;  %2608 = vmatpush.bf16.msra.mxu1 %v2493_v32  ;;  %1670 = vmatpush.bf16.msra.mxu0 %v2493_v32  ;;  %v368_v4 = vshrl.u32 %v359_v56, 16  ;;  %v371_v5 = vshll.u32 %v359_v56, 16  ;;  %v365_v24 = vpack.c.bf16 %v337_v13, %v337_v13  ;;  %v2505_v27 = vld [vmem:[#allocation3 + $0x78] sm:$0xff]  ;;  %v2506_v28 = vld [vmem:[#allocation3 + $0x80] sm:$0xff]  ;;  %v361_v40 = vpack.c.bf16 %v333_v26, %v333_v26 }
  0x21   : > { %356 = vst [vmem:[#allocation2 + $0x44] sm:$0x1] %v2721_v0  ;;  %v394_v50 = vrot.slane %v392_v41, 7  ;;  %1728 = vmatpush.bf16.msra.mxu2 %v2509_v36  ;;  %v402_v52 = vrot.slane %v400_v44, 7  ;;  %v2515_v31 = vld [vmem:[#allocation3 + $0xc8] sm:$0xff]  ;;  %v408_v32 = vshrl.u32 %v364_v20, 16  ;;  %v690_v44 = vunpack.c.l.b16 %v522_v23 }
  0x22   : > { %357 = vst [vmem:[#allocation2 + $0x48] sm:$0xf] %v2721_v0  ;;  %1757 = vmatpush.bf16.msra.mxu3 %v2517_v47  ;;  %v370_v18 = vrot.slane %v368_v4, 7  ;;  %v411_v33 = vshll.u32 %v364_v20, 16  ;;  %v416_v35 = vshrl.u32 %v365_v24, 16  ;;  %v419_v36 = vshll.u32 %v365_v24, 16 }
  0x23   : > { %358 = vst [vmem:[#allocation2 + $0x4c] sm:$0x1] %v2721_v0  ;;  %v397_v59 = vor.u32 %v395_v42, %v394_v50  ;;  %v398_v60 = vrot.slane %v394_v50, 4  ;;  %v324_v0 = vadd.f32 %v2806_v14, %v312_v43  ;;  %v405_v1 = vor.u32 %v403_v45, %v402_v52  ;;  %v484_v37 = vld [vmem:[#allocation2 + $0x30] sm:$0xf]  ;;  %v2529_v43 = vld [vmem:[#allocation3 + $0x138] sm:$0xff] }
  0x24   : > { %v406_v2 = vrot.slane %v402_v52, 4  ;;  %2609 = vmatpush.bf16.msra.mxu1 %v2492_v48  ;;  %1671 = vmatpush.bf16.msra.mxu0 %v2492_v48  ;;  %v373_v29 = vor.u32 %v371_v5, %v370_v18  ;;  %v374_v30 = vrot.slane %v370_v18, 4  ;;  %v487_v38 = vld [vmem:[#allocation2 + $0x34] sm:$0x1]  ;;  %v410_v45 = vrot.slane %v408_v32, 7  ;;  %v2504_v52 = vld [vmem:[#allocation3 + $0x70] sm:$0xff] }
  0x25   : > { %v473_v9 = vsel %vm2834_vm4, %v397_v59, %v472_v54  ;;  %v476_v10 = vsel %vm2843_vm5, %v398_v60, %v475_v55  ;;  %1729 = vmatpush.bf16.msra.mxu2 %v2508_v49  ;;  %v479_v15 = vsel %vm2834_vm4, %v405_v1, %v478_v61  ;;  %v332_v25 = vmax.f32 %v324_v0, 0.0  ;;  %v490_v46 = vld [vmem:[#allocation2 + $0x38] sm:$0xf]  ;;  %v2545_v49 = vld [vmem:[#allocation3 + $0x1b8] sm:$0xff]  ;;  %v2862_v54 = vld [vmem:[#allocation2] sm:$0xf] }
  0x26   : > { %474 = vst [vmem:[#allocation2 + $0x20] sm:$0xf] %v473_v9  ;;  %v482_v16 = vsel %vm2843_vm5, %v406_v2, %v481_v62  ;;  %1758 = vmatpush.bf16.msra.mxu3 %v2516_v7  ;;  %v452_v41 = vsel %vm2834_vm4, %v373_v29, %v451_v12  ;;  %v458_v42 = vsel %vm2843_vm5, %v374_v30, %v457_v19  ;;  %v493_v47 = vld [vmem:[#allocation2 + $0x3c] sm:$0x1]  ;;  %v418_v48 = vrot.slane %v416_v35, 7  ;;  %v2514_v57 = vld [vmem:[#allocation3 + $0xc0] sm:$0xff] }
  0x27   : > { %477 = vst [vmem:[#allocation2 + $0x24] sm:$0x1] %v476_v10  ;;  %v360_v39 = vpack.c.bf16 %v332_v25, %v332_v25  ;;  %v384_v51 = vshrl.u32 %v361_v40, 16  ;;  %v413_v55 = vor.u32 %v411_v33, %v410_v45  ;;  %v414_v56 = vrot.slane %v410_v45, 4  ;;  %v2528_v61 = vld [vmem:[#allocation3 + $0x130] sm:$0xff]  ;;  %v2553_v24 = vld [vmem:[#allocation3 + $0x1f8] sm:$0xff] }
  0x28   : > { %480 = vst [vmem:[#allocation2 + $0x28] sm:$0xf] %v479_v15  ;;  %2610 = vmatpush.bf16.msra.mxu1 %v2491_v8  ;;  %1672 = vmatpush.bf16.msra.mxu0 %v2491_v8  ;;  %v387_v59 = vshll.u32 %v361_v40, 16  ;;  %v421_v62 = vor.u32 %v419_v36, %v418_v48  ;;  %v422_v63 = vrot.slane %v418_v48, 4  ;;  %v698_v4 = vpack.c.b16 %v603_v22, %v690_v44  ;;  %v460_v8 = vld [vmem:[#allocation2 + $0x10] sm:$0xf] }
  0x29   : > { %483 = vst [vmem:[#allocation2 + $0x2c] sm:$0x1] %v482_v16  ;;  %1730 = vmatpush.bf16.msra.mxu2 %v2507_v17  ;;  %v376_v50 = vshrl.u32 %v360_v39, 16  ;;  %v379_v58 = vshll.u32 %v360_v39, 16  ;;  %v386_v1 = vrot.slane %v384_v51, 7  ;;  %v485_v5 = vsel %vm2834_vm4, %v413_v55, %v484_v37  ;;  %v2544_v17 = vld [vmem:[#allocation3 + $0x1b0] sm:$0xff] }
  0x2a   : > { %453 = vst [vmem:[#allocation2 + $0x8] sm:$0xf] %v452_v41  ;;  %1759 = vmatpush.bf16.msra.mxu3 %v2515_v31  ;;  %v488_v7 = vsel %vm2843_vm5, %v414_v56, %v487_v38  ;;  %v463_v9 = vld [vmem:[#allocation2 + $0x14] sm:$0x1]  ;;  %v466_v10 = vld [vmem:[#allocation2 + $0x18] sm:$0xf]  ;;  %v491_v13 = vsel %vm2834_vm4, %v421_v62, %v490_v46  ;;  %v494_v15 = vsel %vm2843_vm5, %v422_v63, %v493_v47  ;;  %v602_v25 = vunpack.c.l.b16 %v2862_v54 }
  0x2b   : > { %459 = vst [vmem:[#allocation2 + $0xc] sm:$0x1] %v458_v42  ;;  %v378_v0 = vrot.slane %v376_v50, 7  ;;  %v389_v20 = vor.u32 %v387_v59, %v386_v1  ;;  %v469_v23 = vld [vmem:[#allocation2 + $0x1c] sm:$0x1]  ;;  %v706_v39 = vrot.slane %v698_v4, 1 }
  0x2c   : > { %2611 = vmatpush.bf16.msra.mxu1 %v2490_v21  ;;  %1673 = vmatpush.bf16.msra.mxu0 %v2490_v21  ;;  %486 = vst [vmem:[#allocation2 + $0x30] sm:$0xf] %v485_v5  ;;  %v390_v21 = vrot.slane %v386_v1, 4  ;;  %v2503_v26 = vld [vmem:[#allocation3 + $0x68] sm:$0xff]  ;;  %v2502_v44 = vld [vmem:[#allocation3 + $0x60] sm:$0xff]  ;;  %v2552_v47 = vld [vmem:[#allocation3 + $0x1f0] sm:$0xff]  ;;  %v2901_v55 = vpack.c.b16 %v603_v22, %v602_v25 }
  0x2d   : > { %v2864_v60 = vld [vmem:[#allocation2 + $0x20] sm:$0xf]  ;;  %1731 = vmatpush.bf16.msra.mxu2 %v2506_v28  ;;  %v382_v16 = vrot.slane %v378_v0, 4  ;;  %489 = vst [vmem:[#allocation2 + $0x34] sm:$0x1] %v488_v7  ;;  %v381_v19 = vor.u32 %v379_v58, %v378_v0  ;;  %v467_v32 = vsel %vm2834_vm4, %v389_v20, %v466_v10  ;;  %v2527_v40 = vld [vmem:[#allocation3 + $0x128] sm:$0xff] }
  0x2e   : > { %v610_v2 = vunpack.c.l.b16 %v2864_v60  ;;  %1760 = vmatpush.bf16.msra.mxu3 %v2514_v57  ;;  %492 = vst [vmem:[#allocation2 + $0x38] sm:$0xf] %v491_v13  ;;  %v470_v37 = vsel %vm2843_vm5, %v390_v21, %v469_v23  ;;  %v2543_v42 = vld [vmem:[#allocation3 + $0x1a8] sm:$0xff]  ;;  %v2526_v51 = vld [vmem:[#allocation3 + $0x120] sm:$0xff]  ;;  %v2501_v57 = vld [vmem:[#allocation3 + $0x58] sm:$0xff] }
  0x2f   : > { %v2873_v12 = vld [vmem:[#allocation2 + $0x28] sm:$0xf]  ;;  %495 = vst [vmem:[#allocation2 + $0x3c] sm:$0x1] %v494_v15  ;;  %v461_v31 = vsel %vm2834_vm4, %v381_v19, %v460_v8  ;;  %v2500_v19 = vld [vmem:[#allocation3 + $0x50] sm:$0xff] }
  0x30   : > { %1695 = vmatpush.bf16.msrb.mxu1 %v2505_v27  ;;  %1782 = vmatpush.bf16.msrb.mxu0 %v2529_v43  ;;  %v612_v18 = vunpack.c.l.b16 %v2873_v12  ;;  %v464_v27 = vsel %vm2843_vm5, %v382_v16, %v463_v9  ;;  %462 = vst [vmem:[#allocation2 + $0x10] sm:$0xf] %v461_v31  ;;  %v496_v12 = vld [vmem:[#allocation2 + $0x40] sm:$0xf] }
  0x31   : > { %1840 = vmatpush.bf16.msrb.mxu2 %v2545_v49  ;;  %v507_v29 = vld [vmem:[#allocation2 + $0x8] sm:$0xf]  ;;  %465 = vst [vmem:[#allocation2 + $0x14] sm:$0x1] %v464_v27  ;;  %v971_v49 = vunpack.c.l.b16 %v706_v39 }
  0x32   : > { %v1180_v28 = vpack.c.b16 %v612_v18, %v610_v2  ;;  %v523_v30 = vld [vmem:[#allocation2 + $0x8] sm:$0xe]  ;;  %1869 = vmatpush.bf16.msrb.mxu3 %v2553_v24  ;;  %v515_v33 = vld [vmem:[#allocation2 + $0xc] sm:$0x1]  ;;  %v604_v35 = vunpack.c.l.b16 %v507_v29  ;;  %468 = vst [vmem:[#allocation2 + $0x18] sm:$0xf] %v467_v32 }
  0x33   : > { %v691_v36 = vunpack.c.l.b16 %v523_v30  ;;  %v605_v38 = vunpack.c.l.b16 %v515_v33  ;;  %471 = vst [vmem:[#allocation2 + $0x1c] sm:$0x1] %v470_v37  ;;  %v2150_v45 = vld [vmem:[#allocation2 + $0x8] sm:$0xf]  ;;  %v2893_v46 = vld [vmem:[#allocation2 + $0xc] sm:$0x1] }
  0x34   : > { %1696 = vmatpush.bf16.msrb.mxu1 %v2504_v52  ;;  %1783 = vmatpush.bf16.msrb.mxu0 %v2528_v61  ;;  %v1162_v41 = vpack.c.b16 %v604_v35, %v602_v25  ;;  %v2895_v50 = vld [vmem:[#allocation2 + $0x30] sm:$0xf]  ;;  %v730_v54 = vunpack.c.l.b16 %v2150_v45  ;;  %v731_v59 = vunpack.c.l.b16 %v2893_v46  ;;  %v2525_v61 = vld [vmem:[#allocation3 + $0x118] sm:$0xff]  ;;  %v2551_v29 = vld [vmem:[#allocation3 + $0x1e8] sm:$0xff] }
  0x35   : > { %1841 = vmatpush.bf16.msrb.mxu2 %v2544_v17  ;;  %1684 = vmatmul.bf16.vlgmr.msra.gmra.mxu1 %v1180_v28  ;;  %v699_v43 = vpack.c.b16 %v605_v38, %v691_v36  ;;  %v2897_v52 = vld [vmem:[#allocation2 + $0x38] sm:$0xf]  ;;  %v2904_v62 = vpack.c.b16 %v605_v38, %v604_v35  ;;  %v614_v63 = vunpack.c.l.b16 %v2895_v50  ;;  %v629_v17 = vshll.u32 %v2901_v55, 16  ;;  %v2542_v28 = vld [vmem:[#allocation3 + $0x1a0] sm:$0xff]  ;;  %v2524_v33 = vld [vmem:[#allocation3 + $0x110] sm:$0xff] }
  0x36   : > { %1674 = vmatmul.bf16.vlgmr.msra.gmra.mxu0 %v1162_v41  ;;  %1870 = vmatpush.bf16.msrb.mxu3 %v2552_v47  ;;  %v616_v5 = vunpack.c.l.b16 %v2897_v52  ;;  %v2924_v21 = vpack.c.b16 %v731_v59, %v730_v54  ;;  %v627_v36 = vshrl.u32 %v2901_v55, 16  ;;  %v2499_v38 = vld [vmem:[#allocation3 + $0x48] sm:$0xff]  ;;  %v2947_v55 = vld [vmem:[#allocation2 + $0x2c] sm:$0x1] }
  0x37   : > { %v707_v48 = vrot.slane %v699_v43, 1  ;;  %v2151_v58 = vld [vmem:[#allocation2 + $0x10] sm:$0xf]  ;;  %v636_v30 = vshll.u32 %v2904_v62, 16  ;;  %v631_v37 = vrot.slane %v629_v17, 1  ;;  %v634_v45 = vshrl.u32 %v2904_v62, 16 }
  0x38   : > { %1697 = vmatpush.bf16.msrb.mxu1 %v2503_v26  ;;  %1784 = vmatpush.bf16.msrb.mxu0 %v2527_v40  ;;  %v2907_v0 = vld [vmem:[#allocation2 + $0x10] sm:$0xf]  ;;  %v2909_v1 = vld [vmem:[#allocation2 + $0x14] sm:$0x1]  ;;  %v732_v6 = vunpack.c.l.b16 %v2151_v58  ;;  %v1189_v31 = vpack.c.b16 %v616_v5, %v614_v63  ;;  %v757_v41 = vshll.u32 %v2924_v21, 16 }
  0x39   : > { %1842 = vmatpush.bf16.msrb.mxu2 %v2543_v42  ;;  %v977_v56 = vunpack.c.l.b16 %v707_v48  ;;  %v2911_v4 = vld [vmem:[#allocation2 + $0x14] sm:$0x1]  ;;  %v2914_v7 = vld [vmem:[#allocation2 + $0x18] sm:$0xf]  ;;  %v607_v8 = vunpack.c.l.b16 %v2909_v1  ;;  %v524_v10 = vld [vmem:[#allocation2 + $0x10] sm:$0xe]  ;;  %v606_v24 = vunpack.c.l.b16 %v2907_v0 }
  0x3a   : > { %v733_v9 = vunpack.c.l.b16 %v2911_v4  ;;  %v525_v13 = vld [vmem:[#allocation2 + $0x18] sm:$0xe]  ;;  %v2918_v15 = vld [vmem:[#allocation2 + $0x1c] sm:$0x1]  ;;  %v1165_v16 = vpack.c.b16 %v732_v6, %v730_v54  ;;  %v692_v23 = vunpack.c.l.b16 %v524_v10  ;;  %v608_v25 = vunpack.c.l.b16 %v2914_v7  ;;  %1871 = vmatpush.bf16.msrb.mxu3 %v2551_v29  ;;  %v2945_v54 = vld [vmem:[#allocation2 + $0x24] sm:$0x1] }
  0x3b   : > { %v1164_v22 = vpack.c.b16 %v977_v56, %v971_v49  ;;  %v609_v20 = vunpack.c.l.b16 %v2918_v15  ;;  %v693_v27 = vunpack.c.l.b16 %v525_v13  ;;  %v638_v47 = vrot.slane %v636_v30, 1  ;;  %v2523_v48 = vld [vmem:[#allocation3 + $0x108] sm:$0xff]  ;;  %v2498_v56 = vld [vmem:[#allocation3 + $0x40] sm:$0xff]  ;;  %v2537_v0 = vld [vmem:[#allocation3 + $0x178] sm:$0xff] }
  0x3c   : > { %1698 = vmatpush.bf16.msrb.mxu1 %v2502_v44  ;;  %1785 = vmatpush.bf16.msrb.mxu0 %v2526_v51  ;;  %v2930_v26 = vpack.c.b16 %v733_v9, %v732_v6  ;;  %v700_v32 = vpack.c.b16 %v607_v8, %v692_v23  ;;  %v1171_v40 = vpack.c.b16 %v608_v25, %v606_v24  ;;  %v2153_v44 = vld [vmem:[#allocation2 + $0x20] sm:$0xf]  ;;  %v2152_v49 = vld [vmem:[#allocation2 + $0x18] sm:$0xf]  ;;  %v2541_v51 = vld [vmem:[#allocation3 + $0x198] sm:$0xff]  ;;  %v759_v7 = vrot.slane %v757_v41, 1 }
  0x3d   : > { %1732 = vmatmul.bf16.vlgmr.msra.gmra.mxu2 %v1164_v22  ;;  %1761 = vmatmul.bf16.vlgmr.msra.gmra.mxu3 %v1165_v16  ;;  %v701_v35 = vpack.c.b16 %v609_v20, %v693_v27  ;;  %v2950_v6 = vld [vmem:[#allocation2 + $0x24] sm:$0x1]  ;;  %v736_v62 = vunpack.c.l.b16 %v2153_v44  ;;  %v526_v22 = vld [vmem:[#allocation2 + $0x20] sm:$0xe]  ;;  %v734_v16 = vunpack.c.l.b16 %v2152_v49  ;;  %v527_v17 = vld [vmem:[#allocation2 + $0x28] sm:$0xe]  ;;  %v632_v23 = vor.u32 %v631_v37, %v627_v36 }
  0x3e   : > { %1843 = vmatpush.bf16.msrb.mxu2 %v2542_v28  ;;  %v708_v39 = vrot.slane %v700_v32, 1  ;;  %v764_v42 = vshll.u32 %v2930_v26, 16  ;;  %v762_v10 = vshrl.u32 %v2930_v26, 16  ;;  %v2522_v27 = vld [vmem:[#allocation3 + $0x100] sm:$0xff]  ;;  %v2953_v28 = vld [vmem:[#allocation2 + $0x1c] sm:$0x1]  ;;  %v611_v29 = vunpack.c.l.b16 %v2945_v54 }
  0x3f   : > { %v709_v43 = vrot.slane %v701_v35, 1  ;;  %v613_v30 = vunpack.c.l.b16 %v2947_v55  ;;  %v694_v32 = vunpack.c.l.b16 %v526_v22  ;;  %v621_v26 = vpack.c.b16 %v609_v20, %v608_v25  ;;  %v2536_v1 = vld [vmem:[#allocation3 + $0x170] sm:$0xff]  ;;  %v3046_v3 = vld [vmem:[#allocation2 + $0x10] sm:$0xf] }
  0x40   : > { %1699 = vmatpush.bf16.msrb.mxu1 %v2501_v57  ;;  %1786 = vmatpush.bf16.msrb.mxu0 %v2525_v61  ;;  %v755_v57 = vshrl.u32 %v2924_v21, 16  ;;  %v983_v58 = vunpack.c.l.b16 %v708_v39  ;;  %v766_v13 = vrot.slane %v764_v42, 1  ;;  %v639_v21 = vor.u32 %v638_v47, %v634_v45  ;;  %v2970_v44 = vld [vmem:[#allocation3 + $0x230] sm:$0xff] }
  0x41   : > { %v989_v61 = vunpack.c.l.b16 %v709_v43  ;;  %v737_v36 = vunpack.c.l.b16 %v2950_v6  ;;  %v695_v37 = vunpack.c.l.b16 %v527_v17  ;;  %v1174_v39 = vpack.c.b16 %v736_v62, %v734_v16  ;;  %v2540_v43 = vld [vmem:[#allocation3 + $0x190] sm:$0xff] }
  0x42   : > { %1844 = vmatpush.bf16.msrb.mxu2 %v2541_v51  ;;  %v767_v41 = vor.u32 %v766_v13, %v762_v10  ;;  %v702_v42 = vpack.c.b16 %v611_v29, %v694_v32  ;;  %v650_v25 = vshll.u32 %v621_v26, 16  ;;  %v2535_v51 = vld [vmem:[#allocation3 + $0x168] sm:$0xff]  ;;  %v648_v10 = vshrl.u32 %v621_v26, 16  ;;  %v2154_v13 = vld [vmem:[#allocation2 + $0x28] sm:$0xf] }
  0x43   : > { %v1173_v35 = vpack.c.b16 %v989_v61, %v983_v58  ;;  %v703_v20 = vpack.c.b16 %v613_v30, %v695_v37  ;;  %v2978_v47 = vpack.c.b16 %v737_v36, %v736_v62  ;;  %v2577_v58 = vunpack.c.h.bf16 %v2822_v34  ;;  %v2534_v34 = vld [vmem:[#allocation3 + $0x160] sm:$0xff]  ;;  %v2987_v32 = vld [vmem:[#allocation3 + $0x228] sm:$0xff] }
  0x44   : > { %1700 = vmatpush.bf16.msrb.mxu1 %v2500_v19  ;;  %1787 = vmatpush.bf16.msrb.mxu0 %v2524_v33  ;;  %v2550_v19 = vld [vmem:[#allocation3 + $0x1e0] sm:$0xff]  ;;  %v2959_v33 = vld [vmem:[#allocation3 + $0x238] sm:$0xff]  ;;  %v978_v49 = vunpack.c.l.b16 %v767_v41  ;;  %v710_v61 = vrot.slane %v702_v42, 1  ;;  %v652_v62 = vrot.slane %v650_v25, 1 }
  0x45   : > { %1689 = vmatmul.bf16.gmra.mxu1 %v1189_v31  ;;  %v620_v31 = vpack.c.b16 %v607_v8, %v606_v24  ;;  %1872 = vmatpush.bf16.msrb.mxu3 %v2550_v19  ;;  %v970_v8 = vunpack.c.l.b16 %v632_v23  ;;  %v976_v24 = vunpack.c.l.b16 %v639_v21  ;;  %v2155_v19 = vld [vmem:[#allocation2 + $0x30] sm:$0xf]  ;;  %v778_v21 = vshll.u32 %v2978_v47, 16 }
  0x46   : > { %1679 = vmatmul.bf16.gmra.mxu0 %v1171_v40  ;;  %v760_v40 = vor.u32 %v759_v7, %v755_v57  ;;  %1845 = vmatpush.bf16.msrb.mxu2 %v2540_v43  ;;  %v711_v7 = vrot.slane %v703_v20, 1  ;;  %v995_v37 = vunpack.c.l.b16 %v710_v61  ;;  %v528_v41 = vld [vmem:[#allocation2 + $0x30] sm:$0xe]  ;;  %v740_v42 = vunpack.c.l.b16 %v2155_v19 }
  0x47   : > { %v643_v15 = vshll.u32 %v620_v31, 16  ;;  %v1163_v57 = vpack.c.b16 %v976_v24, %v970_v8  ;;  %v653_v8 = vor.u32 %v652_v62, %v648_v10  ;;  %v2994_v24 = vld [vmem:[#allocation2 + $0x34] sm:$0x1]  ;;  %v3014_v19 = vpack.c.b16 %v613_v30, %v612_v18 }
  0x48   : > { %1701 = vmatpush.bf16.msrb.mxu1 %v2499_v38  ;;  %1788 = vmatpush.bf16.msrb.mxu0 %v2523_v48  ;;  %v735_v38 = vunpack.c.l.b16 %v2953_v28  ;;  %v972_v48 = vunpack.c.l.b16 %v760_v40  ;;  %v738_v40 = vunpack.c.l.b16 %v2154_v13  ;;  %v2538_v20 = vld [vmem:[#allocation3 + $0x180] sm:$0xff] }
  0x49   : > { %v645_v22 = vrot.slane %v643_v15, 1  ;;  %v529_v15 = vld [vmem:[#allocation2 + $0x38] sm:$0xe]  ;;  %v988_v54 = vunpack.c.l.b16 %v653_v8 }
  0x4a   : > { %v2974_v45 = vpack.c.b16 %v735_v38, %v734_v16  ;;  %v318_v16 = vmul.f32 %v2801_v11, %v2577_v58  ;;  %v1166_v17 = vpack.c.b16 %v978_v49, %v972_v48  ;;  %v776_v48 = vshrl.u32 %v2978_v47, 16 }
  0x4b   : > { %v780_v49 = vrot.slane %v778_v21, 1  ;;  %v696_v47 = vunpack.c.l.b16 %v528_v41 }
  0x4c   : > { %1702 = vmatpush.bf16.msrb.mxu1 %v2498_v56  ;;  %1789 = vmatpush.bf16.msrb.mxu0 %v2522_v27  ;;  %v2549_v56 = vld [vmem:[#allocation3 + $0x1d8] sm:$0xff]  ;;  %v771_v23 = vshll.u32 %v2974_v45, 16  ;;  %v2985_v27 = vld [vmem:[#allocation2 + $0x34] sm:$0x1]  ;;  %v330_v26 = vadd.f32 %v2806_v14, %v318_v16  ;;  %v769_v14 = vshrl.u32 %v2974_v45, 16 }
  0x4d   : > { %1737 = vmatmul.bf16.gmra.mxu2 %v1173_v35  ;;  %1766 = vmatmul.bf16.gmra.mxu3 %v1174_v39  ;;  %v2990_v35 = vld [vmem:[#allocation2 + $0x3c] sm:$0x1]  ;;  %v2992_v39 = vld [vmem:[#allocation2 + $0x2c] sm:$0x1]  ;;  %v615_v58 = vunpack.c.l.b16 %v2985_v27  ;;  %v781_v16 = vor.u32 %v780_v49, %v776_v48 }
  0x4e   : > { %1873 = vmatpush.bf16.msrb.mxu3 %v2549_v56  ;;  %v338_v25 = vmax.f32 %v330_v26, 0.0  ;;  %v773_v43 = vrot.slane %v771_v23, 1  ;;  %v2548_v56 = vld [vmem:[#allocation3 + $0x1d0] sm:$0xff]  ;;  %v739_v61 = vunpack.c.l.b16 %v2992_v39  ;;  %v617_v45 = vunpack.c.l.b16 %v2990_v35  ;;  %v3040_v48 = vld [vmem:[#allocation2 + $0x1c] sm:$0x1] }
  0x4f   : > { %v499_v26 = vld [vmem:[#allocation2 + $0x44] sm:$0x1]  ;;  %v990_v8 = vunpack.c.l.b16 %v781_v16  ;;  %v2557_v16 = vld [vmem:[#allocation3 + $0x218] sm:$0xff] }
  0x50   : > { %1811 = vmatpush.bf16.msra.mxu1 %v2537_v0  ;;  %1898 = vmatpush.bf16.msra.mxu0 %v2959_v33  ;;  %v641_v0 = vshrl.u32 %v620_v31, 16  ;;  %v2539_v31 = vld [vmem:[#allocation3 + $0x188] sm:$0xff]  ;;  %v3018_v23 = vpack.c.b16 %v739_v61, %v738_v40 }
  0x51   : > { %1846 = vmatpush.bf16.msrb.mxu2 %v2539_v31  ;;  %v704_v31 = vpack.c.b16 %v615_v58, %v696_v47 }
  0x52   : > { %v646_v11 = vor.u32 %v645_v22, %v641_v0  ;;  %v366_v0 = vpack.c.bf16 %v338_v25, %v338_v25  ;;  %v741_v22 = vunpack.c.l.b16 %v2994_v24  ;;  %1874 = vmatpush.bf16.msrb.mxu3 %v2548_v56  ;;  %v662_v56 = vshrl.u32 %v3014_v19, 16 }
  0x53   : > { %v712_v49 = vrot.slane %v704_v31, 1  ;;  %v858_v31 = vunpack.c.l.b16 %v3046_v3  ;;  %v2191_v3 = vld [vmem:[#allocation2 + $0x18] sm:$0xe] }
  0x54   : > { %1812 = vmatpush.bf16.msra.mxu1 %v2536_v1  ;;  %1899 = vmatpush.bf16.msra.mxu0 %v2970_v44  ;;  %v1001_v1 = vunpack.c.l.b16 %v711_v7  ;;  %v697_v7 = vunpack.c.l.b16 %v529_v15  ;;  %v982_v62 = vunpack.c.l.b16 %v646_v11  ;;  %v424_v60 = vshrl.u32 %v366_v0, 16  ;;  %v2547_v11 = vld [vmem:[#allocation3 + $0x1c8] sm:$0xff] }
  0x55   : > { %1703 = vmatmul.bf16.vlgmr.msrb.gmra.mxu1 %v1163_v57  ;;  %v3003_v57 = vpack.c.b16 %v611_v29, %v610_v2  ;;  %1847 = vmatpush.bf16.msrb.mxu2 %v2538_v20  ;;  %v427_v13 = vshll.u32 %v366_v0, 16  ;;  %v1183_v2 = vpack.c.b16 %v740_v42, %v738_v40  ;;  %v774_v29 = vor.u32 %v773_v43, %v769_v14  ;;  %v2166_v40 = vld [vmem:[#allocation2 + $0x8] sm:$0xe]  ;;  %v3038_v43 = vld [vmem:[#allocation2 + $0x14] sm:$0x1] }
  0x56   : > { %1790 = vmatmul.bf16.vlgmr.msrb.gmra.mxu0 %v1166_v17  ;;  %v1182_v10 = vpack.c.b16 %v1001_v1, %v995_v37  ;;  %v2532_v17 = vld [vmem:[#allocation3 + $0x150] sm:$0xff]  ;;  %v426_v21 = vrot.slane %v424_v60, 7  ;;  %v3029_v37 = vld [vmem:[#allocation3 + $0x220] sm:$0xff]  ;;  %v1172_v41 = vpack.c.b16 %v988_v54, %v982_v62  ;;  %v664_v15 = vshll.u32 %v3014_v19, 16  ;;  %1875 = vmatpush.bf16.msrb.mxu3 %v2547_v11 }
  0x57   : > { %v657_v18 = vshll.u32 %v3003_v57, 16  ;;  %v984_v1 = vunpack.c.l.b16 %v774_v29  ;;  %v785_v14 = vshll.u32 %v3018_v23, 16  ;;  %v2167_v0 = vld [vmem:[#allocation2 + $0x10] sm:$0xe]  ;;  %v859_v62 = vunpack.c.l.b16 %v3038_v43  ;;  %v2168_v43 = vld [vmem:[#allocation2 + $0x18] sm:$0xe] }
  0x58   : > { %1813 = vmatpush.bf16.msra.mxu1 %v2535_v51  ;;  %1900 = vmatpush.bf16.msra.mxu0 %v2987_v32  ;;  %v2533_v51 = vld [vmem:[#allocation3 + $0x158] sm:$0xff]  ;;  %v429_v55 = vor.u32 %v427_v13, %v426_v21  ;;  %v430_v30 = vrot.slane %v426_v21, 4  ;;  %v861_v60 = vunpack.c.l.b16 %v3040_v48  ;;  %v818_v13 = vunpack.c.l.b16 %v2166_v40 }
  0x59   : > { %2612 = vmatpush.bf16.msra.mxu2 %v2959_v33  ;;  %v705_v33 = vpack.c.b16 %v617_v45, %v697_v7  ;;  %v1175_v47 = vpack.c.b16 %v990_v8, %v984_v1  ;;  %v659_v7 = vrot.slane %v657_v18, 1  ;;  %v666_v54 = vrot.slane %v664_v15, 1 }
  0x5a   : > { %v497_v20 = vsel %vm2834_vm4, %v429_v55, %v496_v12  ;;  %v500_v25 = vsel %vm2843_vm5, %v430_v30, %v499_v26  ;;  %v787_v29 = vrot.slane %v785_v14, 1  ;;  %v819_v12 = vunpack.c.l.b16 %v2167_v0  ;;  %v3057_v55 = vld [vmem:[#allocation2 + $0x3c] sm:$0x1] }
  0x5b   : > { %498 = vst [vmem:[#allocation2 + $0x40] sm:$0xf] %v497_v20  ;;  %v1007_v26 = vunpack.c.l.b16 %v712_v49  ;;  %v826_v11 = vpack.c.b16 %v731_v59, %v818_v13  ;;  %v743_v15 = vunpack.c.l.b16 %v3057_v55  ;;  %v3077_v49 = vpack.c.b16 %v615_v58, %v614_v63 }
  0x5c   : > { %1814 = vmatpush.bf16.msra.mxu1 %v2534_v34  ;;  %v3022_v34 = vpack.c.b16 %v741_v22, %v740_v42  ;;  %v655_v42 = vshrl.u32 %v3003_v57, 16  ;;  %1901 = vmatpush.bf16.msra.mxu0 %v3029_v37  ;;  %501 = vst [vmem:[#allocation2 + $0x44] sm:$0x1] %v500_v25  ;;  %v3048_v57 = vld [vmem:[#allocation2 + $0x18] sm:$0xf]  ;;  %v827_v46 = vpack.c.b16 %v733_v9, %v819_v12 }
  0x5d   : > { %1742 = vmatmul.bf16.gmra.mxu2 %v1182_v10  ;;  %1771 = vmatmul.bf16.gmra.mxu3 %v1183_v2  ;;  %v2156_v10 = vld [vmem:[#allocation2 + $0x38] sm:$0xf]  ;;  %v783_v2 = vshrl.u32 %v3018_v23, 16  ;;  %v671_v58 = vshll.u32 %v3077_v49, 16 }
  0x5e   : > { %v792_v53 = vshll.u32 %v3022_v34, 16  ;;  %2613 = vmatpush.bf16.msra.mxu2 %v2970_v44  ;;  %v2531_v44 = vld [vmem:[#allocation3 + $0x148] sm:$0xff]  ;;  %v790_v19 = vshrl.u32 %v3022_v34, 16  ;;  %v742_v23 = vunpack.c.l.b16 %v2156_v10  ;;  %v874_v34 = vpack.c.b16 %v859_v62, %v858_v31 }
  0x5f   : > { %v660_v40 = vor.u32 %v659_v7, %v655_v42  ;;  %v788_v25 = vor.u32 %v787_v29, %v783_v2  ;;  %v834_v7 = vrot.slane %v826_v11, 1  ;;  %v835_v52 = vrot.slane %v827_v46, 1  ;;  %v3091_v2 = vld [vmem:[#allocation2 + $0x24] sm:$0x1]  ;;  %v3093_v29 = vld [vmem:[#allocation2 + $0x2c] sm:$0x1] }
  0x60   : > { %1815 = vmatpush.bf16.msra.mxu1 %v2533_v51  ;;  %v713_v51 = vrot.slane %v705_v33, 1  ;;  %v794_v21 = vrot.slane %v792_v53, 1  ;;  %v860_v33 = vunpack.c.l.b16 %v3048_v57  ;;  %1902 = vmatpush.bf16.msra.mxu0 %v2557_v16  ;;  %v752_v63 = vpack.c.b16 %v743_v15, %v742_v23  ;;  %v3118_v57 = vld [vmem:[#allocation2 + $0x34] sm:$0x1] }
  0x61   : > { %v994_v50 = vunpack.c.l.b16 %v660_v40  ;;  %v996_v27 = vunpack.c.l.b16 %v788_v25  ;;  %v883_v35 = vshrl.u32 %v874_v34, 16  ;;  %v865_v11 = vunpack.c.l.b16 %v3093_v29  ;;  %v2554_v25 = vld [vmem:[#allocation3 + $0x200] sm:$0xff] }
  0x62   : > { %2614 = vmatpush.bf16.msra.mxu2 %v2987_v32  ;;  %v1013_v18 = vunpack.c.l.b16 %v713_v51  ;;  %v875_v30 = vpack.c.b16 %v861_v60, %v860_v33  ;;  %v2530_v32 = vld [vmem:[#allocation3 + $0x140] sm:$0xff]  ;;  %v2157_v1 = vld [vmem:[#allocation2 + $0x40] sm:$0xf]  ;;  %v795_v14 = vor.u32 %v794_v21, %v790_v19  ;;  %v799_v21 = vshll.u32 %v752_v63, 16 }
  0x63   : > { %v3069_v8 = vld [vmem:[#allocation2 + $0x44] sm:$0x1]  ;;  %v744_v20 = vunpack.c.l.b16 %v2157_v1  ;;  %v669_v40 = vshrl.u32 %v3077_v49, 16 }
  0x64   : > { %1816 = vmatpush.bf16.msra.mxu1 %v2532_v17  ;;  %v2546_v17 = vld [vmem:[#allocation3 + $0x1c0] sm:$0xff]  ;;  %v1191_v59 = vpack.c.b16 %v1013_v18, %v1007_v26  ;;  %v745_v42 = vunpack.c.l.b16 %v3069_v8  ;;  %v892_v53 = vshll.u32 %v875_v30, 16  ;;  %v1002_v4 = vunpack.c.l.b16 %v795_v14  ;;  %v3099_v26 = vld [vmem:[#allocation2 + $0x20] sm:$0xf]  ;;  %v3101_v18 = vld [vmem:[#allocation2 + $0x28] sm:$0xf] }
  0x65   : > { %1708 = vmatmul.bf16.gmra.mxu1 %v1172_v41  ;;  %1876 = vmatpush.bf16.msrb.mxu3 %v2546_v17  ;;  %v667_v41 = vor.u32 %v666_v54, %v662_v56  ;;  %v1192_v51 = vpack.c.b16 %v744_v20, %v742_v23  ;;  %v885_v56 = vshll.u32 %v874_v34, 16  ;;  %v3097_v17 = vunpack.c.l.b16 %v835_v52 }
  0x66   : > { %1795 = vmatmul.bf16.gmra.mxu0 %v1175_v47  ;;  %2615 = vmatpush.bf16.msra.mxu2 %v3029_v37  ;;  %v625_v37 = vpack.c.b16 %v617_v45, %v616_v5  ;;  %v753_v9 = vpack.c.b16 %v745_v42, %v744_v20  ;;  %v2556_v47 = vld [vmem:[#allocation3 + $0x210] sm:$0xff]  ;;  %v890_v45 = vshrl.u32 %v875_v30, 16  ;;  %v894_v10 = vrot.slane %v892_v53, 1 }
  0x67   : > { %v1000_v0 = vunpack.c.l.b16 %v667_v41  ;;  %v887_v5 = vrot.slane %v885_v56, 1  ;;  %1903 = vmatpush.bf16.msra.mxu0 %v2556_v47  ;;  %v1184_v19 = vpack.c.b16 %v1002_v4, %v996_v27  ;;  %v673_v41 = vrot.slane %v671_v58, 1 }
  0x68   : > { %1817 = vmatpush.bf16.msra.mxu1 %v2531_v44  ;;  %v678_v54 = vshll.u32 %v625_v37, 16  ;;  %v2555_v44 = vld [vmem:[#allocation3 + $0x208] sm:$0xff]  ;;  %v806_v12 = vshll.u32 %v753_v9, 16  ;;  %v895_v30 = vor.u32 %v894_v10, %v890_v45  ;;  %v676_v1 = vshrl.u32 %v625_v37, 16 }
  0x69   : > { %v1181_v13 = vpack.c.b16 %v1000_v0, %v994_v50  ;;  %v888_v34 = vor.u32 %v887_v5, %v883_v35  ;;  %v862_v14 = vunpack.c.l.b16 %v3099_v26  ;;  %v864_v46 = vunpack.c.l.b16 %v3101_v18 }
  0x6a   : > { %2616 = vmatpush.bf16.msra.mxu2 %v2557_v16  ;;  %v3095_v16 = vunpack.c.l.b16 %v834_v7  ;;  %v680_v20 = vrot.slane %v678_v54, 1  ;;  %v804_v56 = vshrl.u32 %v753_v9, 16  ;;  %v808_v53 = vrot.slane %v806_v12, 1 }
  0x6b   : > { %1904 = vmatpush.bf16.msra.mxu0 %v2555_v44  ;;  %v974_v50 = vunpack.c.l.b16 %v888_v34  ;;  %v980_v0 = vunpack.c.l.b16 %v895_v30  ;;  %v877_v37 = vpack.c.b16 %v865_v11, %v864_v46  ;;  %v674_v27 = vor.u32 %v673_v41, %v669_v40  ;;  %v2178_v34 = vld [vmem:[#allocation2 + $0x30] sm:$0xf]  ;;  %v2179_v30 = vld [vmem:[#allocation2 + $0x38] sm:$0xf] }
  0x6c   : > { %1818 = vmatpush.bf16.msra.mxu1 %v2530_v32  ;;  %v1167_v23 = vpack.c.b16 %v3097_v17, %v3095_v16  ;;  %v863_v32 = vunpack.c.l.b16 %v3091_v2  ;;  %v681_v4 = vor.u32 %v680_v20, %v676_v1  ;;  %v809_v58 = vor.u32 %v808_v53, %v804_v56 }
  0x6d   : > { %1747 = vmatmul.bf16.gmra.mxu2 %v1191_v59  ;;  %1776 = vmatmul.bf16.gmra.mxu3 %v1192_v51  ;;  %v797_v59 = vshrl.u32 %v752_v63, 16  ;;  %v801_v51 = vrot.slane %v799_v21, 1  ;;  %v1168_v63 = vpack.c.b16 %v860_v33, %v858_v31  ;;  %v906_v52 = vshll.u32 %v877_v37, 16  ;;  %v3120_v31 = vld [vmem:[#allocation2 + $0x3c] sm:$0x1] }
  0x6e   : > { %2617 = vmatpush.bf16.msra.mxu2 %v2556_v47  ;;  %v876_v49 = vpack.c.b16 %v863_v32, %v862_v14  ;;  %v1169_v47 = vpack.c.b16 %v980_v0, %v974_v50  ;;  %v1006_v35 = vunpack.c.l.b16 %v674_v27  ;;  %v1012_v5 = vunpack.c.l.b16 %v681_v4 }
  0x6f   : > { %1905 = vmatpush.bf16.msra.mxu0 %v2554_v25  ;;  %v802_v9 = vor.u32 %v801_v51, %v797_v59  ;;  %v1014_v10 = vunpack.c.l.b16 %v809_v58  ;;  %v908_v21 = vrot.slane %v906_v52, 1  ;;  %v947_v18 = vunpack.c.l.b16 %v2191_v3  ;;  %v2181_v3 = vld [vmem:[#allocation2 + $0x48] sm:$0xf] }
  0x70   : > { %v899_v7 = vshll.u32 %v876_v49, 16  ;;  %v897_v54 = vshrl.u32 %v876_v49, 16  ;;  %v1190_v12 = vpack.c.b16 %v1012_v5, %v1006_v35  ;;  %v867_v1 = vunpack.c.l.b16 %v3118_v57 }
  0x71   : > { %v1008_v45 = vunpack.c.l.b16 %v802_v9  ;;  %v869_v20 = vunpack.c.l.b16 %v3120_v31  ;;  %v868_v59 = vunpack.c.l.b16 %v2179_v30  ;;  %v955_v56 = vpack.c.b16 %v861_v60, %v947_v18 }
  0x72   : > { %2618 = vmatpush.bf16.msra.mxu2 %v2555_v44  ;;  %v901_v44 = vrot.slane %v899_v7, 1 }
  0x73   : > { %v1193_v33 = vpack.c.b16 %v1014_v10, %v1008_v45  ;;  %v879_v49 = vpack.c.b16 %v869_v20, %v868_v59  ;;  %v963_v4 = vrot.slane %v955_v56, 1  ;;  %v2193_v45 = vld [vmem:[#allocation2 + $0x28] sm:$0xe]  ;;  %v820_v10 = vunpack.c.l.b16 %v2168_v43 }
  0x74   : > { %v902_v40 = vor.u32 %v901_v44, %v897_v54 }
  0x75   : > { %1713 = vmatmul.bf16.gmra.mxu1 %v1181_v13  ;;  %v2190_v13 = vld [vmem:[#allocation2 + $0x10] sm:$0xe]  ;;  %v920_v58 = vshll.u32 %v879_v49, 16  ;;  %v981_v60 = vunpack.c.l.b16 %v963_v4  ;;  %v918_v35 = vshrl.u32 %v879_v49, 16 }
  0x76   : > { %1800 = vmatmul.bf16.gmra.mxu0 %v1184_v19  ;;  %2619 = vmatpush.bf16.msra.mxu2 %v2554_v25  ;;  %v904_v19 = vshrl.u32 %v877_v37, 16  ;;  %v946_v26 = vunpack.c.l.b16 %v2190_v13  ;;  %v866_v25 = vunpack.c.l.b16 %v2178_v34  ;;  %v986_v53 = vunpack.c.l.b16 %v902_v40 }
  0x77   : > { %v1177_v37 = vpack.c.b16 %v864_v46, %v862_v14  ;;  %v922_v5 = vrot.slane %v920_v58, 1  ;;  %v3132_v14 = vld [vmem:[#allocation2 + $0x44] sm:$0x1]  ;;  %v3134_v46 = vld [vmem:[#allocation2 + $0x4c] sm:$0x1]  ;;  %v828_v34 = vpack.c.b16 %v735_v38, %v820_v10 }
  0x78   : > { %v909_v41 = vor.u32 %v908_v21, %v904_v19  ;;  %v954_v51 = vpack.c.b16 %v859_v62, %v946_v26  ;;  %v878_v0 = vpack.c.b16 %v867_v1, %v866_v25  ;;  %v2169_v62 = vld [vmem:[#allocation2 + $0x20] sm:$0xe]  ;;  %v949_v19 = vunpack.c.l.b16 %v2193_v45 }
  0x79   : > { %v821_v13 = vunpack.c.l.b16 %v2169_v62  ;;  %v3136_v21 = vld [vmem:[#allocation2 + $0x40] sm:$0xf]  ;;  %v871_v26 = vunpack.c.l.b16 %v3132_v14  ;;  %v873_v18 = vunpack.c.l.b16 %v3134_v46  ;;  %v836_v6 = vrot.slane %v828_v34, 1 }
  0x7a   : > { %v992_v50 = vunpack.c.l.b16 %v909_v41  ;;  %v962_v27 = vrot.slane %v954_v51, 1  ;;  %v913_v9 = vshll.u32 %v878_v0, 16  ;;  %v911_v7 = vshrl.u32 %v878_v0, 16 }
  0x7b   : > { %v829_v30 = vpack.c.b16 %v737_v36, %v821_v13  ;;  %v870_v40 = vunpack.c.l.b16 %v3136_v21  ;;  %v872_v41 = vunpack.c.l.b16 %v2181_v3  ;;  %v957_v56 = vpack.c.b16 %v865_v11, %v949_v19  ;;  %v2170_v11 = vld [vmem:[#allocation2 + $0x28] sm:$0xe]  ;;  %v2196_v13 = vld [vmem:[#allocation2 + $0x40] sm:$0xe] }
  0x7c   : > { %v975_v48 = vunpack.c.l.b16 %v962_v27  ;;  %v915_v52 = vrot.slane %v913_v9, 1  ;;  %v1186_v38 = vpack.c.b16 %v868_v59, %v866_v25  ;;  %v985_v49 = vunpack.c.l.b16 %v836_v6  ;;  %v2194_v59 = vld [vmem:[#allocation2 + $0x30] sm:$0xe] }
  0x7d   : > { %1848 = vmatmul.bf16.vlgmr.msrb.gmra.mxu2 %v1168_v63  ;;  %1877 = vmatmul.bf16.vlgmr.msrb.gmra.mxu3 %v1169_v47  ;;  %v1178_v63 = vpack.c.b16 %v992_v50, %v986_v53  ;;  %v2192_v47 = vld [vmem:[#allocation2 + $0x20] sm:$0xe]  ;;  %v880_v16 = vpack.c.b16 %v871_v26, %v870_v40  ;;  %v881_v28 = vpack.c.b16 %v873_v18, %v872_v41  ;;  %v837_v36 = vrot.slane %v829_v30, 1 }
  0x7e   : > { %v1170_v54 = vpack.c.b16 %v981_v60, %v975_v48  ;;  %v948_v44 = vunpack.c.l.b16 %v2192_v47  ;;  %v822_v48 = vunpack.c.l.b16 %v2170_v11  ;;  %v2195_v60 = vld [vmem:[#allocation2 + $0x38] sm:$0xe]  ;;  %v952_v34 = vunpack.c.l.b16 %v2196_v13 }
  0x7f   : > { %v927_v2 = vshll.u32 %v880_v16, 16  ;;  %v991_v29 = vunpack.c.l.b16 %v837_v36  ;;  %v932_v58 = vshrl.u32 %v881_v28, 16  ;;  %v1195_v39 = vpack.c.b16 %v872_v41, %v870_v40 }
  0x80   : > { %v956_v51 = vpack.c.b16 %v863_v32, %v948_v44  ;;  %v934_v32 = vshll.u32 %v881_v28, 16  ;;  %v830_v45 = vpack.c.b16 %v739_v61, %v822_v48 }
  0x81   : > { %v929_v9 = vrot.slane %v927_v2, 1  ;;  %v1176_v62 = vpack.c.b16 %v991_v29, %v985_v49 }
  0x82   : > { %v964_v17 = vrot.slane %v956_v51, 1  ;;  %v936_v43 = vrot.slane %v934_v32, 1 }
  0x84   : > { %v987_v27 = vunpack.c.l.b16 %v964_v17 }
  0x85   : > { %1718 = vmatmul.bf16.gmra.mxu1 %v1190_v12  ;;  %v916_v12 = vor.u32 %v915_v52, %v911_v7  ;;  %v937_v52 = vor.u32 %v936_v43, %v932_v58 }
  0x86   : > { %1805 = vmatmul.bf16.gmra.mxu0 %v1193_v33  ;;  %v923_v33 = vor.u32 %v922_v5, %v918_v35  ;;  %v950_v35 = vunpack.c.l.b16 %v2194_v59  ;;  %v951_v5 = vunpack.c.l.b16 %v2195_v60 }
  0x87   : > { %v998_v53 = vunpack.c.l.b16 %v916_v12  ;;  %v1016_v19 = vunpack.c.l.b16 %v937_v52  ;;  %v838_v12 = vrot.slane %v830_v45, 1 }
  0x88   : > { %v1004_v50 = vunpack.c.l.b16 %v923_v33  ;;  %v958_v21 = vpack.c.b16 %v867_v1, %v950_v35  ;;  %v959_v3 = vpack.c.b16 %v869_v20, %v951_v5 }
  0x8a   : > { %v1187_v0 = vpack.c.b16 %v1004_v50, %v998_v53  ;;  %v966_v51 = vrot.slane %v958_v21, 1  ;;  %v967_v24 = vrot.slane %v959_v3, 1  ;;  %v2172_v53 = vld [vmem:[#allocation2 + $0x38] sm:$0xe]  ;;  %v2173_v50 = vld [vmem:[#allocation2 + $0x40] sm:$0xe] }
  0x8b   : > { %v824_v28 = vunpack.c.l.b16 %v2172_v53  ;;  %v825_v40 = vunpack.c.l.b16 %v2173_v50 }
  0x8c   : > { %v999_v31 = vunpack.c.l.b16 %v966_v51  ;;  %v1005_v1 = vunpack.c.l.b16 %v967_v24 }
  0x8d   : > { %1853 = vmatmul.bf16.gmra.mxu2 %v1177_v37  ;;  %1882 = vmatmul.bf16.gmra.mxu3 %v1178_v63  ;;  %v2171_v37 = vld [vmem:[#allocation2 + $0x30] sm:$0xe]  ;;  %v925_v63 = vshrl.u32 %v880_v16, 16  ;;  %v960_v16 = vpack.c.b16 %v871_v26, %v952_v34  ;;  %v832_v14 = vpack.c.b16 %v743_v15, %v824_v28  ;;  %v833_v46 = vpack.c.b16 %v745_v42, %v825_v40 }
  0x8e   : > { %v823_v25 = vunpack.c.l.b16 %v2171_v37 }
  0x8f   : > { %v930_v7 = vor.u32 %v929_v9, %v925_v63  ;;  %v968_v6 = vrot.slane %v960_v16, 1 }
  0x90   : > { %v831_v10 = vpack.c.b16 %v741_v22, %v823_v25  ;;  %v997_v22 = vunpack.c.l.b16 %v838_v12 }
  0x91   : > { %v1010_v44 = vunpack.c.l.b16 %v930_v7  ;;  %v1011_v26 = vunpack.c.l.b16 %v968_v6 }
  0x92   : > { %v839_v33 = vrot.slane %v831_v10, 1 }
  0x93   : > { %v1196_v61 = vpack.c.b16 %v1016_v19, %v1010_v44 }
  0x95   : > { %1819 = vmatmul.bf16.vlgmr.msra.gmra.mxu1 %v1167_v23  ;;  %v965_v23 = vrot.slane %v957_v56, 1  ;;  %v1003_v56 = vunpack.c.l.b16 %v839_v33 }
  0x96   : > { %1906 = vmatmul.bf16.vlgmr.msra.gmra.mxu0 %v1170_v54  ;;  %v2197_v54 = vld [vmem:[#allocation2 + $0x48] sm:$0xe] }
  0x97   : > { %v993_v4 = vunpack.c.l.b16 %v965_v23  ;;  %v953_v30 = vunpack.c.l.b16 %v2197_v54  ;;  %v1185_v20 = vpack.c.b16 %v1003_v56, %v997_v22  ;;  %v840_v23 = vrot.slane %v832_v14, 1 }
  0x99   : > { %v1179_v47 = vpack.c.b16 %v993_v4, %v987_v27  ;;  %v961_v57 = vpack.c.b16 %v873_v18, %v953_v30  ;;  %v1009_v29 = vunpack.c.l.b16 %v840_v23 }
  0x9b   : > { %v969_v36 = vrot.slane %v961_v57, 1 }
  0x9d   : > { %1858 = vmatmul.bf16.gmra.mxu2 %v1186_v38  ;;  %1887 = vmatmul.bf16.gmra.mxu3 %v1187_v0  ;;  %v1188_v38 = vpack.c.b16 %v1005_v1, %v999_v31  ;;  %v1017_v18 = vunpack.c.l.b16 %v969_v36  ;;  %v841_v0 = vrot.slane %v833_v46, 1 }
  0x9f   : > { %v1197_v32 = vpack.c.b16 %v1017_v18, %v1011_v26  ;;  %v1015_v11 = vunpack.c.l.b16 %v841_v0 }
  0xa1   : > { %v1194_v37 = vpack.c.b16 %v1015_v11, %v1009_v29 }
  0xa5   : > { %1824 = vmatmul.bf16.gmra.mxu1 %v1176_v62 }
  0xa6   : > { %1911 = vmatmul.bf16.gmra.mxu0 %v1179_v47 }
  0xad   : > { %1863 = vmatmul.bf16.gmra.mxu2 %v1195_v39  ;;  %1892 = vmatmul.bf16.gmra.mxu3 %v1196_v61 }
  0xb2   : > { %v1685_v41 = vpop.f32.mrf.mxu1 }
  0xb3   : > { %v1675_v17 = vpop.f32.mrf.mxu0 }
  0xb5   : > { %1829 = vmatmul.bf16.gmra.mxu1 %v1185_v20 }
  0xb6   : > { %1916 = vmatmul.bf16.gmra.mxu0 %v1188_v38 }
  0xba   : > { %v1687_v2 = vpop.f32.mrf.mxu1 }
  0xbb   : > { %v1677_v49 = vpop.f32.mrf.mxu0 }
  0xbd   : > { %1921 = vmatmul.bf16.vlgmr.msra.gmra.mxu2 %v1197_v32 }
  0xc0   : > { %v1733_v27 = vpop.f32.mrf.mxu2  ;;  %v1762_v63 = vpop.f32.mrf.mxu3 }
  0xc2   : > { %v1690_v4 = vpop.f32.mrf.mxu1 }
  0xc3   : > { %v1680_v55 = vpop.f32.mrf.mxu0 }
  0xc5   : > { %1834 = vmatmul.bf16.gmra.mxu1 %v1194_v37 }
  0xc8   : > { %v1735_v15 = vpop.f32.mrf.mxu2  ;;  %v1764_v42 = vpop.f32.mrf.mxu3 }
  0xca   : > { %v1692_v8 = vpop.f32.mrf.mxu1 }
  0xcb   : > { %v1682_v9 = vpop.f32.mrf.mxu0 }
  0xd0   : > { %v1738_v58 = vpop.f32.mrf.mxu2  ;;  %v1767_v48 = vpop.f32.mrf.mxu3 }
  0xd2   : > { %v1704_v43 = vpop.f32.mrf.mxu1 }
  0xd3   : > { %v1705_v62 = vadd.f32 %v1704_v43, %v1675_v17  ;;  %v1791_v59 = vpop.f32.mrf.mxu0 }
  0xd5   : > { %v1734_v25 = vadd.f32 %v1733_v27, %v1705_v62 }
  0xd7   : > { %v1763_v60 = vadd.f32 %v1762_v63, %v1734_v25 }
  0xd8   : > { %v1740_v7 = vpop.f32.mrf.mxu2  ;;  %v3172_v5 = vpop.f32.mrf.mxu3 }
  0xd9   : > { %v1792_v47 = vadd.f32 %v1791_v59, %v1763_v60 }
  0xda   : > { %v1706_v52 = vpop.f32.mrf.mxu1 }
  0xdb   : > { %v1707_v35 = vadd.f32 %v1706_v52, %v1677_v49  ;;  %v1793_v10 = vpop.f32.mrf.mxu0 }
  0xdd   : > { %v1736_v45 = vadd.f32 %v1735_v15, %v1707_v35 }
  0xdf   : > { %v1765_v63 = vadd.f32 %v1764_v42, %v1736_v45 }
  0xe0   : > { %v1743_v13 = vpop.f32.mrf.mxu2  ;;  %v1772_v19 = vpop.f32.mrf.mxu3 }
  0xe1   : > { %v1794_v15 = vadd.f32 %v1793_v10, %v1765_v63 }
  0xe2   : > { %v1709_v54 = vpop.f32.mrf.mxu1 }
  0xe3   : > { %v1710_v44 = vadd.f32 %v1709_v54, %v1680_v55  ;;  %v1796_v3 = vpop.f32.mrf.mxu0 }
  0xe5   : > { %v1739_v21 = vadd.f32 %v1738_v58, %v1710_v44 }
  0xe7   : > { %v1768_v12 = vadd.f32 %v1767_v48, %v1739_v21 }
  0xe8   : > { %v1745_v34 = vpop.f32.mrf.mxu2  ;;  %v3174_v61 = vpop.f32.mrf.mxu3 }
  0xe9   : > { %v1797_v33 = vadd.f32 %v1796_v3, %v1768_v12 }
  0xea   : > { %v1711_v30 = vpop.f32.mrf.mxu1 }
  0xeb   : > { %v1712_v39 = vadd.f32 %v1711_v30, %v1682_v9  ;;  %v1798_v24 = vpop.f32.mrf.mxu0 }
  0xed   : > { %v1741_v51 = vadd.f32 %v1740_v7, %v1712_v39 }
  0xef   : > { %v1770_v54 = vadd.f32 %v3172_v5, %v1741_v51 }
  0xf0   : > { %v1748_v22 = vpop.f32.mrf.mxu2  ;;  %v3176_v50 = vpop.f32.mrf.mxu3 }
  0xf2   : > { %v1714_v56 = vpop.f32.mrf.mxu1 }
  0xf3   : > { %v1715_v53 = vadd.f32 %v1714_v56, %v1685_v41  ;;  %v1801_v57 = vpop.f32.mrf.mxu0 }
  0xf5   : > { %v1744_v16 = vadd.f32 %v1743_v13, %v1715_v53 }
  0xf7   : > { %v1773_v31 = vadd.f32 %v1772_v19, %v1744_v16 }
  0xf8   : > { %v1750_v20 = vpop.f32.mrf.mxu2  ;;  %v3184_v38 = vpop.f32.mrf.mxu3 }
  0xf9   : > { %v3178_v1 = vadd.f32 %v1801_v57, %v1773_v31 }
  0xfa   : > { %v1716_v28 = vpop.f32.mrf.mxu1 }
  0xfb   : > { %v1717_v40 = vadd.f32 %v1716_v28, %v1687_v2  ;;  %v3182_v36 = vpop.f32.mrf.mxu0 }
  0xfd   : > { %v3180_v6 = vadd.f32 %v1745_v34, %v1717_v40  ;;  %v1799_v34 = vadd.f32 %v1798_v24, %v1770_v54 }
 0x100   : > { %v1849_v17 = vpop.f32.mrf.mxu2  ;;  %v1878_v18 = vpop.f32.mrf.mxu3 }
 0x102   : > { %v1719_v14 = vpop.f32.mrf.mxu1 }
 0x103   : > { %v1720_v46 = vadd.f32 %v1719_v14, %v1690_v4  ;;  %v3188_v26 = vpop.f32.mrf.mxu0 }
 0x105   : > { %v3186_v41 = vadd.f32 %v1748_v22, %v1720_v46 }
 0x108   : > { %v1851_v23 = vpop.f32.mrf.mxu2  ;;  %v1880_v29 = vpop.f32.mrf.mxu3 }
 0x10a   : > { %v1721_v0 = vpop.f32.mrf.mxu1 }
 0x10b   : > { %v1722_v32 = vadd.f32 %v1721_v0, %v1692_v8  ;;  %v3192_v2 = vpop.f32.mrf.mxu0 }
 0x10d   : > { %v3190_v49 = vadd.f32 %v1750_v20, %v1722_v32 }
 0x110   : > { %v1854_v11 = vpop.f32.mrf.mxu2  ;;  %v1883_v48 = vpop.f32.mrf.mxu3 }
 0x112   : > { %v1820_v37 = vpop.f32.mrf.mxu1 }
 0x113   : > { %v1821_v27 = vadd.f32 %v1820_v37, %v1792_v47  ;;  %v1907_v55 = vpop.f32.mrf.mxu0 }
 0x115   : > { %v1850_v4 = vadd.f32 %v1849_v17, %v1821_v27 }
 0x117   : > { %v1879_v58 = vadd.f32 %v1878_v18, %v1850_v4  ;;  %v1775_v18 = vadd.f32 %v3174_v61, %v3180_v6 }
 0x118   : > { %v1856_v9 = vpop.f32.mrf.mxu2  ;;  %v1885_v3 = vpop.f32.mrf.mxu3 }
 0x119   : > { %v1908_v59 = vadd.f32 %v1907_v55, %v1879_v58 }
 0x11a   : > { %v1822_v43 = vpop.f32.mrf.mxu1 }
 0x11b   : > { %v1823_v62 = vadd.f32 %v1822_v43, %v1794_v15  ;;  %v1909_v8 = vpop.f32.mrf.mxu0  ;;  %v1956_v52 = vmul.f32 %v1908_v59, %v1908_v59 }
 0x11d   : > { %v1852_v25 = vadd.f32 %v1851_v23, %v1823_v62 }
 0x11f   : > { %v1881_v60 = vadd.f32 %v1880_v29, %v1852_v25 }
 0x120   : > { %v1859_v35 = vpop.f32.mrf.mxu2  ;;  %v1888_v28 = vpop.f32.mrf.mxu3 }
 0x121   : > { %v1910_v7 = vadd.f32 %v1909_v8, %v1881_v60 }
 0x122   : > { %v1825_v42 = vpop.f32.mrf.mxu1 }
 0x123   : > { %v2581_v47 = vpack.c.bf16 %v1910_v7, %v1908_v59  ;;  %v1943_v45 = vadd.f32 %v1910_v7, %v1908_v59  ;;  %v1957_v10 = vmul.f32 %v1910_v7, %v1910_v7  ;;  %v1826_v13 = vadd.f32 %v1825_v42, %v1797_v33  ;;  %v1912_v21 = vpop.f32.mrf.mxu0 }
 0x125   : > { %2582 = vst [vmem:[%s3199_s15] sm:$0xff] %v2581_v47   ;;  %v1964_v44 = vadd.f32 %v1957_v10, %v1956_v52  ;;  %v1855_v19 = vadd.f32 %v1854_v11, %v1826_v13  ;;  %v1804_v11 = vadd.f32 %v3182_v36, %v1775_v18  ;;  %v1780_v52 = vadd.f32 %v3184_v38, %v3190_v49 }
 0x127   : > { %v1884_v12 = vadd.f32 %v1883_v48, %v1855_v19  ;;  %v1809_v47 = vadd.f32 %v3192_v2, %v1780_v52 }
 0x128   : > { %v1861_v39 = vpop.f32.mrf.mxu2  ;;  %v1890_v27 = vpop.f32.mrf.mxu3 }
 0x129   : > { %v1913_v30 = vadd.f32 %v1912_v21, %v1884_v12 }
 0x12a   : > { %v1827_v22 = vpop.f32.mrf.mxu1 }
 0x12b   : > { %v1944_v56 = vadd.f32 %v1943_v45, %v1913_v30  ;;  %v1958_v53 = vmul.f32 %v1913_v30, %v1913_v30  ;;  %v1828_v16 = vadd.f32 %v1827_v22, %v1799_v34  ;;  %v1914_v20 = vpop.f32.mrf.mxu0 }
 0x12d   : > { %v1965_v57 = vadd.f32 %v1964_v44, %v1958_v53  ;;  %v1857_v31 = vadd.f32 %v1856_v9, %v1828_v16 }
 0x12f   : > { %v1886_v33 = vadd.f32 %v1885_v3, %v1857_v31 }
 0x130   : > { %v1864_v51 = vpop.f32.mrf.mxu2  ;;  %v1893_v7 = vpop.f32.mrf.mxu3 }
 0x131   : > { %v1915_v5 = vadd.f32 %v1914_v20, %v1886_v33 }
 0x132   : > { %v1830_v40 = vpop.f32.mrf.mxu1 }
 0x133   : > { %v2586_v17 = vpack.c.bf16 %v1915_v5, %v1913_v30  ;;  %v1945_v14 = vadd.f32 %v1944_v56, %v1915_v5  ;;  %v1959_v46 = vmul.f32 %v1915_v5, %v1915_v5  ;;  %v1831_v24 = vadd.f32 %v1830_v40, %v3178_v1  ;;  %v1917_v32 = vpop.f32.mrf.mxu0 }
 0x134   : > { %v1778_v1 = vadd.f32 %v3176_v50, %v3186_v41  ;;  %v1983_v5 = vlaneseq }
 0x135   : > { %2601 = vst [vmem:[%s3199_s15 + $0x8] sm:$0xff] %v2586_v17   ;;  %v1966_v23 = vadd.f32 %v1965_v57, %v1959_v46  ;;  %v1860_v0 = vadd.f32 %v1859_v35, %v1831_v24 }
 0x136   : > { %v1807_v62 = vadd.f32 %v3188_v26, %v1778_v1  ;;  %vm1985_vm6 = vcmp.lt.s32.totalorder %v1983_v5, 256 }
 0x137   : > { %v1889_v29 = vadd.f32 %v1888_v28, %v1860_v0 }
 0x138   : > { %v1866_v9 = vpop.f32.mrf.mxu2  ;;  %v1895_v21 = vpop.f32.mrf.mxu3 }
 0x139   : > { %v1918_v37 = vadd.f32 %v1917_v32, %v1889_v29 }
 0x13a   : > { %v1832_v63 = vpop.f32.mrf.mxu1 }
 0x13b   : > { %v1946_v55 = vadd.f32 %v1945_v14, %v1918_v37  ;;  %v1960_v4 = vmul.f32 %v1918_v37, %v1918_v37  ;;  %v1833_v15 = vadd.f32 %v1832_v63, %v1804_v11  ;;  %v1919_v6 = vpop.f32.mrf.mxu0 }
 0x13d   : > { %v1967_v58 = vadd.f32 %v1966_v23, %v1960_v4  ;;  %v1862_v61 = vadd.f32 %v1861_v39, %v1833_v15 }
 0x13f   : > { %v1891_v43 = vadd.f32 %v1890_v27, %v1862_v61 }
 0x140   : > { %v1922_v50 = vpop.f32.mrf.mxu2 }
 0x141   : > { %v1920_v48 = vadd.f32 %v1919_v6, %v1891_v43 }
 0x142   : > { %v1835_v25 = vpop.f32.mrf.mxu1 }
 0x143   : > { %v2591_v36 = vpack.c.bf16 %v1920_v48, %v1918_v37  ;;  %v1947_v8 = vadd.f32 %v1946_v55, %v1920_v48  ;;  %v1961_v59 = vmul.f32 %v1920_v48, %v1920_v48  ;;  %v1836_v60 = vadd.f32 %v1835_v25, %v1807_v62 }
 0x145   : > { %2602 = vst [vmem:[%s3199_s15 + $0x10] sm:$0xff] %v2591_v36   ;;  %v1968_v35 = vadd.f32 %v1967_v58, %v1961_v59  ;;  %v1865_v42 = vadd.f32 %v1864_v51, %v1836_v60 }
 0x147   : > { %v1894_v41 = vadd.f32 %v1893_v7, %v1865_v42 }
 0x148   : > { %v1924_v12 = vpop.f32.mrf.mxu2 }
 0x149   : > { %v1923_v45 = vadd.f32 %v1922_v50, %v1894_v41 }
 0x14a   : > { %v1837_v26 = vpop.f32.mrf.mxu1 }
 0x14b   : > { %v1948_v10 = vadd.f32 %v1947_v8, %v1923_v45  ;;  %v1962_v13 = vmul.f32 %v1923_v45, %v1923_v45  ;;  %v1838_v54 = vadd.f32 %v1837_v26, %v1809_v47 }
 0x14d   : > { %v1969_v44 = vadd.f32 %v1968_v35, %v1962_v13  ;;  %v1867_v19 = vadd.f32 %v1866_v9, %v1838_v54 }
 0x14f   : > { %v1896_v3 = vadd.f32 %v1895_v21, %v1867_v19 }
 0x151   : > { %v1925_v34 = vadd.f32 %v1924_v12, %v1896_v3 }
 0x153   : > { %v2596_v38 = vpack.c.bf16 %v1925_v34, %v1923_v45  ;;  %v1949_v49 = vadd.f32 %v1948_v10, %v1925_v34  ;;  %v1963_v30 = vmul.f32 %v1925_v34, %v1925_v34 }
 0x155   : > { %2603 = vst [vmem:[%s3199_s15 + $0x18] sm:$0xff] %v2596_v38   ;;  %v1950_v39 = vrot.slane %v1949_v49, 4  ;;  %v1970_v22 = vadd.f32 %v1969_v44, %v1963_v30 }
 0x157   : > { %v1951_v56 = vadd.f32 %v1950_v39, %v1949_v49  ;;  %v1971_v2 = vrot.slane %v1970_v22, 4 }
 0x159   : > { %v1952_v53 = vrot.slane %v1951_v56, 2  ;;  %v1972_v16 = vadd.f32 %v1971_v2, %v1970_v22 }
 0x15b   : > { %v1953_v57 = vadd.f32 %v1952_v53, %v1951_v56  ;;  %v1973_v31 = vrot.slane %v1972_v16, 2 }
 0x15d   : > { %v1974_v20 = vadd.f32 %v1973_v31, %v1972_v16  ;;  %v1954_v33 = vrot.slane %v1953_v57, 1 }
 0x15f   : > { %v1975_v28 = vrot.slane %v1974_v20, 1  ;;  %v1955_v40 = vadd.f32 %v1954_v33, %v1953_v57 }
 0x161   : > { %v1976_v51 = vadd.f32 %v1975_v28, %v1974_v20 }
 0x163   : > { %v1979_v17 = vrot.slane %v1976_v51, 7 }
 0x165   : > { %v1981_v14 = vsel %vm454_vm2, %v1955_v40, %v1979_v17 }
 0x166   : > { %1987 = vst.msk [vmem:[%s285_s23] sm:$0x3] %vm1985_vm6, %v1981_v14 }
 0x167 PF: > { %s17_s20 = sadd.s32 1, %s2716_s20   ;;  %s3240_s18 = smov %s2712_s19 }
 0x168   : > { %p14_p8 = scmp.ge.s32.totalorder %s17_s20, 4   ;;  %s3241_s19 = smov %s3243_s22 }
 0x16a   :  { %16 = sbr.rel (!%p14_p8) target bundleno = 2 (0x2), region = 91 }
 0x16f   :  { %2040 = vsyncpa [#allocation4], 1 }
 0x170   :  { %2042 = vsyncpa [#allocation4 + $0x1], 1 }

</bundles_post_ra>
